<compile_context>
chip_gen: v6e
topology: v6e:2x2x1
jax: 0.10.0
libtpu: 0.0.40
codegen_flags: <defaults>
</compile_context>

<pallas_src>
import jax
import jax.numpy as jnp
from jax import lax
from jax.experimental import pallas as pl
from jax.experimental.pallas import tpu as pltpu

HIDDEN_DIM = 128
INPUT_DIM = 3
NUM_LANDMARKS = 42
NUM_LAYERS = 3
OUTPUT_DIM = 3
FC_PAD = 128  # lane-dense FC output width (sliced back to OUTPUT_DIM outside)


# ----------------------------- fused kernel --------------------------------

def fused_lstm_fc_kernel(x_ref, wih_ref, whh_ref, b_ref, fcw_ref, fcb_ref,
                         out_ref, seq_sc, gates_sc, h_sc, c_sc):
    """One grid step = one LSTM layer.

    x_ref   : (S, B, H)  f32   time-major input, features zero-padded to H
    wih_ref : (H, 4H)    bf16  this layer's W_ih^T (layer-0 rows zero-padded)
    whh_ref : (H, 4H)    bf16  this layer's W_hh^T
    b_ref   : (1, 4H)    f32   this layer's b_ih + b_hh
    fcw_ref : (H, FC_PAD) bf16 FC weight^T, zero-padded to 128 lanes
    fcb_ref : (1, FC_PAD) f32  FC bias, zero-padded
    out_ref : (B, FC_PAD) f32  padded logits (only written on the last layer)
    seq_sc  : (S, B, H)  f32   inter-layer activations (persists across layers)
    gates_sc: (S, B, 4H) f32   precomputed input projection + bias
    h_sc    : (B, H)     f32   hidden-state carry
    c_sc    : (B, H)     f32   cell-state carry
    """
    S = x_ref.shape[0]
    H = HIDDEN_DIM
    layer = pl.program_id(0)
    last_layer = pl.num_programs(0) - 1

    # --- input projection + bias, hoisted off the serial recurrence ---------
    def project(src_ref):
        w_ih = wih_ref[...]          # (H, 4H) bf16, loaded once
        b = b_ref[...]               # (1, 4H) f32, loaded once
        for t in range(S):           # static unroll; no h dependency
            gates_sc[t] = (
                jnp.dot(src_ref[t].astype(jnp.bfloat16), w_ih,
                        preferred_element_type=jnp.float32)
                + b)

    @pl.when(layer == 0)
    def _():
        project(x_ref)               # layer 0 reads the input directly

    @pl.when(layer > 0)
    def _():
        project(seq_sc)              # deeper layers read previous layer's h_t

    # --- serial recurrence: only h_prev @ W_hh^T on the critical path -------
    h_sc[...] = jnp.zeros_like(h_sc)
    c_sc[...] = jnp.zeros_like(c_sc)
    w_hh = whh_ref[...]              # (H, 4H) bf16, loaded once per layer

    def step(t, carry):
        h_prev = h_sc[...]
        gates = gates_sc[t] + jnp.dot(
            h_prev.astype(jnp.bfloat16), w_hh,
            preferred_element_type=jnp.float32)          # (B, 4H) f32
        i = jax.nn.sigmoid(gates[:, 0 * H:1 * H])
        f = jax.nn.sigmoid(gates[:, 1 * H:2 * H])
        g = jnp.tanh(gates[:, 2 * H:3 * H])
        o = jax.nn.sigmoid(gates[:, 3 * H:4 * H])
        c = f * c_sc[...] + i * g
        h = o * jnp.tanh(c)
        c_sc[...] = c
        h_sc[...] = h
        seq_sc[t] = h                # input for the next layer
        return carry

    lax.fori_loop(0, S, step, 0, unroll=True)

    # --- FC head, fused into the epilogue of the last layer -----------------
    @pl.when(layer == last_layer)
    def _():
        out_ref[...] = (
            jnp.dot(h_sc[...].astype(jnp.bfloat16), fcw_ref[...],
                    preferred_element_type=jnp.float32)
            + fcb_ref[...])


# ----------------------------- wrapper --------------------------------------

def lstm_move_predictor(x, packed):
    """x: (batch, seq, num_landmarks, landmark_dim) -> (batch, output_dim)."""
    B, S, L, D = x.shape
    F = L * D
    H = HIDDEN_DIM
    assert F <= H, "layer-0 feature dim must pad to <= hidden dim"

    x = x.reshape(B, S, F)
    x = jnp.pad(x, ((0, 0), (0, 0), (0, H - F)))         # 126 -> 128 (zeros)
    x_tm = jnp.transpose(x, (1, 0, 2))                    # time-major (S, B, H)

    out_padded = pl.pallas_call(
        fused_lstm_fc_kernel,
        out_shape=jax.ShapeDtypeStruct((B, FC_PAD), jnp.float32),
        grid=(NUM_LAYERS,),
        in_specs=[
            pl.BlockSpec((S, B, H), lambda l: (0, 0, 0)),           # x (resident)
            pl.BlockSpec((None, H, 4 * H), lambda l: (l, 0, 0)),    # W_ih^T[l]
            pl.BlockSpec((None, H, 4 * H), lambda l: (l, 0, 0)),    # W_hh^T[l]
            pl.BlockSpec((None, 1, 4 * H), lambda l: (l, 0, 0)),    # bias[l]
            pl.BlockSpec((H, FC_PAD), lambda l: (0, 0)),            # FC W^T
            pl.BlockSpec((1, FC_PAD), lambda l: (0, 0)),            # FC bias
        ],
        out_specs=pl.BlockSpec((B, FC_PAD), lambda l: (0, 0)),
        scratch_shapes=[
            pltpu.VMEM((S, B, H), jnp.float32),       # inter-layer activations
            pltpu.VMEM((S, B, 4 * H), jnp.float32),   # precomputed gate inputs
            pltpu.VMEM((B, H), jnp.float32),          # h carry
            pltpu.VMEM((B, H), jnp.float32),          # c carry
        ],
        compiler_params=pltpu.CompilerParams(
            dimension_semantics=("arbitrary",)),
    )(x_tm, packed["w_ih"], packed["w_hh"], packed["b"],
      packed["fc_w_t"], packed["fc_b"])

    return out_padded[:, :OUTPUT_DIM]


# ----------------------------- params ---------------------------------------

def init_params(key):
    """PyTorch-shaped raw params: uniform(-k, k), k = 1/sqrt(hidden)."""
    k = 1.0 / jnp.sqrt(jnp.float32(HIDDEN_DIM))
    layers = []
    feat = INPUT_DIM * NUM_LANDMARKS
    for layer in range(NUM_LAYERS):
        in_f = feat if layer == 0 else HIDDEN_DIM
        key, k1, k2, k3, k4 = jax.random.split(key, 5)
        w_ih = jax.random.uniform(k1, (4 * HIDDEN_DIM, in_f), jnp.float32, -k, k)
        w_hh = jax.random.uniform(k2, (4 * HIDDEN_DIM, HIDDEN_DIM), jnp.float32, -k, k)
        b_ih = jax.random.uniform(k3, (4 * HIDDEN_DIM,), jnp.float32, -k, k)
        b_hh = jax.random.uniform(k4, (4 * HIDDEN_DIM,), jnp.float32, -k, k)
        layers.append((w_ih, w_hh, b_ih, b_hh))
    key, k5, k6 = jax.random.split(key, 3)
    fc_w = jax.random.uniform(k5, (OUTPUT_DIM, HIDDEN_DIM), jnp.float32, -k, k)
    fc_b = jax.random.uniform(k6, (OUTPUT_DIM,), jnp.float32, -k, k)
    return {"lstm": layers, "fc_w": fc_w, "fc_b": fc_b}


def pack_params(raw):
    """Split/pad per-layer W_ih^T and W_hh^T (bf16), fold biases, pad FC head."""
    H = HIDDEN_DIM
    w_ih_l, w_hh_l, b_l = [], [], []
    for (w_ih, w_hh, b_ih, b_hh) in raw["lstm"]:
        w_ih_t = w_ih.T                                   # (in_f, 4H)
        in_f = w_ih_t.shape[0]
        if in_f < H:
            w_ih_t = jnp.pad(w_ih_t, ((0, H - in_f), (0, 0)))   # zero rows
        w_ih_l.append(w_ih_t.astype(jnp.bfloat16))
        w_hh_l.append(w_hh.T.astype(jnp.bfloat16))
        b_l.append((b_ih + b_hh).reshape(1, 4 * H))
    fc_w_t = jnp.pad(raw["fc_w"].T, ((0, 0), (0, FC_PAD - OUTPUT_DIM)))
    fc_b = jnp.pad(raw["fc_b"], (0, FC_PAD - OUTPUT_DIM)).reshape(1, FC_PAD)
    return {
        "w_ih": jnp.stack(w_ih_l),                        # (L, H, 4H) bf16
        "w_hh": jnp.stack(w_hh_l),                        # (L, H, 4H) bf16
        "b": jnp.stack(b_l),                              # (L, 1, 4H) f32
        "fc_w_t": fc_w_t.astype(jnp.bfloat16),            # (H, 128)   bf16
        "fc_b": fc_b,                                     # (1, 128)   f32
    }


# ----------------------------- reference -------------------------------------

def reference_forward(x, raw):
    """Plain-JAX f32 (lax.scan) reference of the same LSTM + FC semantics."""
    B, S, L, D = x.shape
    H = HIDDEN_DIM
    h_seq = x.reshape(B, S, L * D)
    for (w_ih, w_hh, b_ih, b_hh) in raw["lstm"]:
        wih_t, whh_t = w_ih.T, w_hh.T
        b = (b_ih + b_hh)[None, :]

        def step(carry, xt, wih_t=wih_t, whh_t=whh_t, b=b):
            hp, cp = carry
            g = xt @ wih_t + hp @ whh_t + b
            i = jax.nn.sigmoid(g[:, :H])
            f = jax.nn.sigmoid(g[:, H:2 * H])
            gg = jnp.tanh(g[:, 2 * H:3 * H])
            o = jax.nn.sigmoid(g[:, 3 * H:])
            c = f * cp + i * gg
            hn = o * jnp.tanh(c)
            return (hn, c), hn

        init = (jnp.zeros((B, H), jnp.float32), jnp.zeros((B, H), jnp.float32))
        _, ys = lax.scan(step, init, jnp.transpose(h_seq, (1, 0, 2)))
        h_seq = jnp.transpose(ys, (1, 0, 2))
    return h_seq[:, -1, :] @ raw["fc_w"].T + raw["fc_b"][None, :]


# ----------------------------- main ------------------------------------------

if __name__ == "__main__":
    key = jax.random.PRNGKey(0)
    kx, kp = jax.random.split(key)

    batch, seq = 2, 8
    x = jax.random.normal(kx, (batch, seq, NUM_LANDMARKS, INPUT_DIM), jnp.float32)
    raw = init_params(kp)
    packed = pack_params(raw)

    forward = jax.jit(lstm_move_predictor)
    out = jax.block_until_ready(forward(x, packed))

    ref = jax.block_until_ready(reference_forward(x, raw))
    assert out.shape == (batch, OUTPUT_DIM)
    # bf16 MXU operands vs f32 reference -> loosened tolerance (gate math is f32).
    assert jnp.allclose(out, ref, atol=5e-2, rtol=5e-2), (out, ref)

    print("KERNEL_OK")
</pallas_src>

<mosaic_0001>
module attributes {stable_mosaic.version = 11 : i64} {
  func.func @fused_lstm_fc_kernel(%arg0: i32, %arg1: memref<8x2x128xf32, #tpu.memory_space<vmem>>, %arg2: memref<1x128x512xbf16, #tpu.memory_space<vmem>>, %arg3: memref<1x128x512xbf16, #tpu.memory_space<vmem>>, %arg4: memref<1x1x512xf32, #tpu.memory_space<vmem>>, %arg5: memref<128x128xbf16, #tpu.memory_space<vmem>>, %arg6: memref<1x128xf32, #tpu.memory_space<vmem>>, %arg7: memref<2x128xf32, #tpu.memory_space<vmem>>, %arg8: memref<8x2x128xf32, #tpu.memory_space<vmem>>, %arg9: memref<8x2x512xf32, #tpu.memory_space<vmem>>, %arg10: memref<2x128xf32, #tpu.memory_space<vmem>>, %arg11: memref<2x128xf32, #tpu.memory_space<vmem>>) attributes {dimension_semantics = [#tpu.dimension_semantics<arbitrary>], iteration_bounds = array<i64: 3>, scalar_prefetch = 0 : i64, scratch_operands = 4 : i64, tpu.core_type = #tpu.core_type<tc>, window_params = [{pipeline_mode = #tpu.pipeline_mode<synchronous>, transform_indices = @transform_0, window_bounds = array<i64: 8, 2, 128>}, {transform_indices = @transform_1, window_bounds = array<i64: 1, 128, 512>}, {transform_indices = @transform_2, window_bounds = array<i64: 1, 128, 512>}, {transform_indices = @transform_3, window_bounds = array<i64: 1, 1, 512>}, {pipeline_mode = #tpu.pipeline_mode<synchronous>, transform_indices = @transform_4, window_bounds = array<i64: 128, 128>}, {pipeline_mode = #tpu.pipeline_mode<synchronous>, transform_indices = @transform_5, window_bounds = array<i64: 1, 128>}, {pipeline_mode = #tpu.pipeline_mode<synchronous>, transform_indices = @transform_6, window_bounds = array<i64: 2, 128>}]} {
    %c0_i32 = arith.constant 0 : i32
    %0 = arith.cmpi eq, %arg0, %c0_i32 : i32
    %1 = arith.extui %0 : i1 to i32
    %c0_i32_0 = arith.constant 0 : i32
    %2 = arith.cmpi ne, %1, %c0_i32_0 : i32
    scf.if %2 {
      %c0_141 = arith.constant 0 : index
      %c0_142 = arith.constant 0 : index
      %c0_143 = arith.constant 0 : index
      %327 = vector.load %arg2[%c0_141, %c0_142, %c0_143] : memref<1x128x512xbf16, #tpu.memory_space<vmem>>, vector<1x128x512xbf16>
      %328 = vector.shape_cast %327 : vector<1x128x512xbf16> to vector<128x512xbf16>
      %c0_144 = arith.constant 0 : index
      %c0_145 = arith.constant 0 : index
      %c0_146 = arith.constant 0 : index
      %329 = vector.load %arg4[%c0_144, %c0_145, %c0_146] : memref<1x1x512xf32, #tpu.memory_space<vmem>>, vector<1x1x512xf32>
      %330 = vector.shape_cast %329 : vector<1x1x512xf32> to vector<1x512xf32>
      %c0_147 = arith.constant 0 : index
      %c0_148 = arith.constant 0 : index
      %c0_149 = arith.constant 0 : index
      %331 = vector.load %arg1[%c0_147, %c0_148, %c0_149] : memref<8x2x128xf32, #tpu.memory_space<vmem>>, vector<1x2x128xf32>
      %332 = vector.shape_cast %331 : vector<1x2x128xf32> to vector<2x128xf32>
      %333 = arith.truncf %332 : vector<2x128xf32> to vector<2x128xbf16>
      %cst_150 = arith.constant dense<0.000000e+00> : vector<2x512xf32>
      %334 = tpu.matmul %333, %328, %cst_150 {dimension_numbers = #tpu.dot_dimension_numbers<[1], [0], [0], [1], [0, 0, 1, 1], [], []>} : vector<2x128xbf16>, vector<128x512xbf16>, vector<2x512xf32> -> vector<2x512xf32>
      %335 = vector.broadcast %330 : vector<1x512xf32> to vector<2x512xf32>
      %336 = arith.addf %334, %335 : vector<2x512xf32>
      %c0_151 = arith.constant 0 : index
      %c0_152 = arith.constant 0 : index
      %c0_153 = arith.constant 0 : index
      %337 = vector.load %arg9[%c0_151, %c0_152, %c0_153] : memref<8x2x512xf32, #tpu.memory_space<vmem>>, vector<1x2x512xf32>
      %338 = vector.shape_cast %337 : vector<1x2x512xf32> to vector<2x512xf32>
      %339 = vector.shape_cast %336 : vector<2x512xf32> to vector<1x2x512xf32>
      tpu.vector_store %arg9[%c0_151, %c0_152, %c0_153], %339 {strides = array<i32>} : memref<8x2x512xf32, #tpu.memory_space<vmem>>, vector<1x2x512xf32>,
      %c1 = arith.constant 1 : index
      %c0_154 = arith.constant 0 : index
      %c0_155 = arith.constant 0 : index
      %340 = vector.load %arg1[%c1, %c0_154, %c0_155] : memref<8x2x128xf32, #tpu.memory_space<vmem>>, vector<1x2x128xf32>
      %341 = vector.shape_cast %340 : vector<1x2x128xf32> to vector<2x128xf32>
      %342 = arith.truncf %341 : vector<2x128xf32> to vector<2x128xbf16>
      %cst_156 = arith.constant dense<0.000000e+00> : vector<2x512xf32>
      %343 = tpu.matmul %342, %328, %cst_156 {dimension_numbers = #tpu.dot_dimension_numbers<[1], [0], [0], [1], [0, 0, 1, 1], [], []>} : vector<2x128xbf16>, vector<128x512xbf16>, vector<2x512xf32> -> vector<2x512xf32>
      %344 = vector.broadcast %330 : vector<1x512xf32> to vector<2x512xf32>
      %345 = arith.addf %343, %344 : vector<2x512xf32>
      %c1_157 = arith.constant 1 : index
      %c0_158 = arith.constant 0 : index
      %c0_159 = arith.constant 0 : index
      %346 = vector.load %arg9[%c1_157, %c0_158, %c0_159] : memref<8x2x512xf32, #tpu.memory_space<vmem>>, vector<1x2x512xf32>
      %347 = vector.shape_cast %346 : vector<1x2x512xf32> to vector<2x512xf32>
      %348 = vector.shape_cast %345 : vector<2x512xf32> to vector<1x2x512xf32>
      tpu.vector_store %arg9[%c1_157, %c0_158, %c0_159], %348 {strides = array<i32>} : memref<8x2x512xf32, #tpu.memory_space<vmem>>, vector<1x2x512xf32>,
      %c2 = arith.constant 2 : index
      %c0_160 = arith.constant 0 : index
      %c0_161 = arith.constant 0 : index
      %349 = vector.load %arg1[%c2, %c0_160, %c0_161] : memref<8x2x128xf32, #tpu.memory_space<vmem>>, vector<1x2x128xf32>
      %350 = vector.shape_cast %349 : vector<1x2x128xf32> to vector<2x128xf32>
      %351 = arith.truncf %350 : vector<2x128xf32> to vector<2x128xbf16>
      %cst_162 = arith.constant dense<0.000000e+00> : vector<2x512xf32>
      %352 = tpu.matmul %351, %328, %cst_162 {dimension_numbers = #tpu.dot_dimension_numbers<[1], [0], [0], [1], [0, 0, 1, 1], [], []>} : vector<2x128xbf16>, vector<128x512xbf16>, vector<2x512xf32> -> vector<2x512xf32>
      %353 = vector.broadcast %330 : vector<1x512xf32> to vector<2x512xf32>
      %354 = arith.addf %352, %353 : vector<2x512xf32>
      %c2_163 = arith.constant 2 : index
      %c0_164 = arith.constant 0 : index
      %c0_165 = arith.constant 0 : index
      %355 = vector.load %arg9[%c2_163, %c0_164, %c0_165] : memref<8x2x512xf32, #tpu.memory_space<vmem>>, vector<1x2x512xf32>
      %356 = vector.shape_cast %355 : vector<1x2x512xf32> to vector<2x512xf32>
      %357 = vector.shape_cast %354 : vector<2x512xf32> to vector<1x2x512xf32>
      tpu.vector_store %arg9[%c2_163, %c0_164, %c0_165], %357 {strides = array<i32>} : memref<8x2x512xf32, #tpu.memory_space<vmem>>, vector<1x2x512xf32>,
      %c3 = arith.constant 3 : index
      %c0_166 = arith.constant 0 : index
      %c0_167 = arith.constant 0 : index
      %358 = vector.load %arg1[%c3, %c0_166, %c0_167] : memref<8x2x128xf32, #tpu.memory_space<vmem>>, vector<1x2x128xf32>
      %359 = vector.shape_cast %358 : vector<1x2x128xf32> to vector<2x128xf32>
      %360 = arith.truncf %359 : vector<2x128xf32> to vector<2x128xbf16>
      %cst_168 = arith.constant dense<0.000000e+00> : vector<2x512xf32>
      %361 = tpu.matmul %360, %328, %cst_168 {dimension_numbers = #tpu.dot_dimension_numbers<[1], [0], [0], [1], [0, 0, 1, 1], [], []>} : vector<2x128xbf16>, vector<128x512xbf16>, vector<2x512xf32> -> vector<2x512xf32>
      %362 = vector.broadcast %330 : vector<1x512xf32> to vector<2x512xf32>
      %363 = arith.addf %361, %362 : vector<2x512xf32>
      %c3_169 = arith.constant 3 : index
      %c0_170 = arith.constant 0 : index
      %c0_171 = arith.constant 0 : index
      %364 = vector.load %arg9[%c3_169, %c0_170, %c0_171] : memref<8x2x512xf32, #tpu.memory_space<vmem>>, vector<1x2x512xf32>
      %365 = vector.shape_cast %364 : vector<1x2x512xf32> to vector<2x512xf32>
      %366 = vector.shape_cast %363 : vector<2x512xf32> to vector<1x2x512xf32>
      tpu.vector_store %arg9[%c3_169, %c0_170, %c0_171], %366 {strides = array<i32>} : memref<8x2x512xf32, #tpu.memory_space<vmem>>, vector<1x2x512xf32>,
      %c4 = arith.constant 4 : index
      %c0_172 = arith.constant 0 : index
      %c0_173 = arith.constant 0 : index
      %367 = vector.load %arg1[%c4, %c0_172, %c0_173] : memref<8x2x128xf32, #tpu.memory_space<vmem>>, vector<1x2x128xf32>
      %368 = vector.shape_cast %367 : vector<1x2x128xf32> to vector<2x128xf32>
      %369 = arith.truncf %368 : vector<2x128xf32> to vector<2x128xbf16>
      %cst_174 = arith.constant dense<0.000000e+00> : vector<2x512xf32>
      %370 = tpu.matmul %369, %328, %cst_174 {dimension_numbers = #tpu.dot_dimension_numbers<[1], [0], [0], [1], [0, 0, 1, 1], [], []>} : vector<2x128xbf16>, vector<128x512xbf16>, vector<2x512xf32> -> vector<2x512xf32>
      %371 = vector.broadcast %330 : vector<1x512xf32> to vector<2x512xf32>
      %372 = arith.addf %370, %371 : vector<2x512xf32>
      %c4_175 = arith.constant 4 : index
      %c0_176 = arith.constant 0 : index
      %c0_177 = arith.constant 0 : index
      %373 = vector.load %arg9[%c4_175, %c0_176, %c0_177] : memref<8x2x512xf32, #tpu.memory_space<vmem>>, vector<1x2x512xf32>
      %374 = vector.shape_cast %373 : vector<1x2x512xf32> to vector<2x512xf32>
      %375 = vector.shape_cast %372 : vector<2x512xf32> to vector<1x2x512xf32>
      tpu.vector_store %arg9[%c4_175, %c0_176, %c0_177], %375 {strides = array<i32>} : memref<8x2x512xf32, #tpu.memory_space<vmem>>, vector<1x2x512xf32>,
      %c5 = arith.constant 5 : index
      %c0_178 = arith.constant 0 : index
      %c0_179 = arith.constant 0 : index
      %376 = vector.load %arg1[%c5, %c0_178, %c0_179] : memref<8x2x128xf32, #tpu.memory_space<vmem>>, vector<1x2x128xf32>
      %377 = vector.shape_cast %376 : vector<1x2x128xf32> to vector<2x128xf32>
      %378 = arith.truncf %377 : vector<2x128xf32> to vector<2x128xbf16>
      %cst_180 = arith.constant dense<0.000000e+00> : vector<2x512xf32>
      %379 = tpu.matmul %378, %328, %cst_180 {dimension_numbers = #tpu.dot_dimension_numbers<[1], [0], [0], [1], [0, 0, 1, 1], [], []>} : vector<2x128xbf16>, vector<128x512xbf16>, vector<2x512xf32> -> vector<2x512xf32>
      %380 = vector.broadcast %330 : vector<1x512xf32> to vector<2x512xf32>
      %381 = arith.addf %379, %380 : vector<2x512xf32>
      %c5_181 = arith.constant 5 : index
      %c0_182 = arith.constant 0 : index
      %c0_183 = arith.constant 0 : index
      %382 = vector.load %arg9[%c5_181, %c0_182, %c0_183] : memref<8x2x512xf32, #tpu.memory_space<vmem>>, vector<1x2x512xf32>
      %383 = vector.shape_cast %382 : vector<1x2x512xf32> to vector<2x512xf32>
      %384 = vector.shape_cast %381 : vector<2x512xf32> to vector<1x2x512xf32>
      tpu.vector_store %arg9[%c5_181, %c0_182, %c0_183], %384 {strides = array<i32>} : memref<8x2x512xf32, #tpu.memory_space<vmem>>, vector<1x2x512xf32>,
      %c6 = arith.constant 6 : index
      %c0_184 = arith.constant 0 : index
      %c0_185 = arith.constant 0 : index
      %385 = vector.load %arg1[%c6, %c0_184, %c0_185] : memref<8x2x128xf32, #tpu.memory_space<vmem>>, vector<1x2x128xf32>
      %386 = vector.shape_cast %385 : vector<1x2x128xf32> to vector<2x128xf32>
      %387 = arith.truncf %386 : vector<2x128xf32> to vector<2x128xbf16>
      %cst_186 = arith.constant dense<0.000000e+00> : vector<2x512xf32>
      %388 = tpu.matmul %387, %328, %cst_186 {dimension_numbers = #tpu.dot_dimension_numbers<[1], [0], [0], [1], [0, 0, 1, 1], [], []>} : vector<2x128xbf16>, vector<128x512xbf16>, vector<2x512xf32> -> vector<2x512xf32>
      %389 = vector.broadcast %330 : vector<1x512xf32> to vector<2x512xf32>
      %390 = arith.addf %388, %389 : vector<2x512xf32>
      %c6_187 = arith.constant 6 : index
      %c0_188 = arith.constant 0 : index
      %c0_189 = arith.constant 0 : index
      %391 = vector.load %arg9[%c6_187, %c0_188, %c0_189] : memref<8x2x512xf32, #tpu.memory_space<vmem>>, vector<1x2x512xf32>
      %392 = vector.shape_cast %391 : vector<1x2x512xf32> to vector<2x512xf32>
      %393 = vector.shape_cast %390 : vector<2x512xf32> to vector<1x2x512xf32>
      tpu.vector_store %arg9[%c6_187, %c0_188, %c0_189], %393 {strides = array<i32>} : memref<8x2x512xf32, #tpu.memory_space<vmem>>, vector<1x2x512xf32>,
      %c7 = arith.constant 7 : index
      %c0_190 = arith.constant 0 : index
      %c0_191 = arith.constant 0 : index
      %394 = vector.load %arg1[%c7, %c0_190, %c0_191] : memref<8x2x128xf32, #tpu.memory_space<vmem>>, vector<1x2x128xf32>
      %395 = vector.shape_cast %394 : vector<1x2x128xf32> to vector<2x128xf32>
      %396 = arith.truncf %395 : vector<2x128xf32> to vector<2x128xbf16>
      %cst_192 = arith.constant dense<0.000000e+00> : vector<2x512xf32>
      %397 = tpu.matmul %396, %328, %cst_192 {dimension_numbers = #tpu.dot_dimension_numbers<[1], [0], [0], [1], [0, 0, 1, 1], [], []>} : vector<2x128xbf16>, vector<128x512xbf16>, vector<2x512xf32> -> vector<2x512xf32>
      %398 = vector.broadcast %330 : vector<1x512xf32> to vector<2x512xf32>
      %399 = arith.addf %397, %398 : vector<2x512xf32>
      %c7_193 = arith.constant 7 : index
      %c0_194 = arith.constant 0 : index
      %c0_195 = arith.constant 0 : index
      %400 = vector.load %arg9[%c7_193, %c0_194, %c0_195] : memref<8x2x512xf32, #tpu.memory_space<vmem>>, vector<1x2x512xf32>
      %401 = vector.shape_cast %400 : vector<1x2x512xf32> to vector<2x512xf32>
      %402 = vector.shape_cast %399 : vector<2x512xf32> to vector<1x2x512xf32>
      tpu.vector_store %arg9[%c7_193, %c0_194, %c0_195], %402 {strides = array<i32>} : memref<8x2x512xf32, #tpu.memory_space<vmem>>, vector<1x2x512xf32>,
    } else {
    }
    %c0_i32_1 = arith.constant 0 : i32
    %3 = arith.cmpi sgt, %arg0, %c0_i32_1 : i32
    %4 = arith.extui %3 : i1 to i32
    %c0_i32_2 = arith.constant 0 : i32
    %5 = arith.cmpi ne, %4, %c0_i32_2 : i32
    scf.if %5 {
      %c0_141 = arith.constant 0 : index
      %c0_142 = arith.constant 0 : index
      %c0_143 = arith.constant 0 : index
      %327 = vector.load %arg2[%c0_141, %c0_142, %c0_143] : memref<1x128x512xbf16, #tpu.memory_space<vmem>>, vector<1x128x512xbf16>
      %328 = vector.shape_cast %327 : vector<1x128x512xbf16> to vector<128x512xbf16>
      %c0_144 = arith.constant 0 : index
      %c0_145 = arith.constant 0 : index
      %c0_146 = arith.constant 0 : index
      %329 = vector.load %arg4[%c0_144, %c0_145, %c0_146] : memref<1x1x512xf32, #tpu.memory_space<vmem>>, vector<1x1x512xf32>
      %330 = vector.shape_cast %329 : vector<1x1x512xf32> to vector<1x512xf32>
      %c0_147 = arith.constant 0 : index
      %c0_148 = arith.constant 0 : index
      %c0_149 = arith.constant 0 : index
      %331 = vector.load %arg8[%c0_147, %c0_148, %c0_149] : memref<8x2x128xf32, #tpu.memory_space<vmem>>, vector<1x2x128xf32>
      %332 = vector.shape_cast %331 : vector<1x2x128xf32> to vector<2x128xf32>
      %333 = arith.truncf %332 : vector<2x128xf32> to vector<2x128xbf16>
      %cst_150 = arith.constant dense<0.000000e+00> : vector<2x512xf32>
      %334 = tpu.matmul %333, %328, %cst_150 {dimension_numbers = #tpu.dot_dimension_numbers<[1], [0], [0], [1], [0, 0, 1, 1], [], []>} : vector<2x128xbf16>, vector<128x512xbf16>, vector<2x512xf32> -> vector<2x512xf32>
      %335 = vector.broadcast %330 : vector<1x512xf32> to vector<2x512xf32>
      %336 = arith.addf %334, %335 : vector<2x512xf32>
      %c0_151 = arith.constant 0 : index
      %c0_152 = arith.constant 0 : index
      %c0_153 = arith.constant 0 : index
      %337 = vector.load %arg9[%c0_151, %c0_152, %c0_153] : memref<8x2x512xf32, #tpu.memory_space<vmem>>, vector<1x2x512xf32>
      %338 = vector.shape_cast %337 : vector<1x2x512xf32> to vector<2x512xf32>
      %339 = vector.shape_cast %336 : vector<2x512xf32> to vector<1x2x512xf32>
      tpu.vector_store %arg9[%c0_151, %c0_152, %c0_153], %339 {strides = array<i32>} : memref<8x2x512xf32, #tpu.memory_space<vmem>>, vector<1x2x512xf32>,
      %c1 = arith.constant 1 : index
      %c0_154 = arith.constant 0 : index
      %c0_155 = arith.constant 0 : index
      %340 = vector.load %arg8[%c1, %c0_154, %c0_155] : memref<8x2x128xf32, #tpu.memory_space<vmem>>, vector<1x2x128xf32>
      %341 = vector.shape_cast %340 : vector<1x2x128xf32> to vector<2x128xf32>
      %342 = arith.truncf %341 : vector<2x128xf32> to vector<2x128xbf16>
      %cst_156 = arith.constant dense<0.000000e+00> : vector<2x512xf32>
      %343 = tpu.matmul %342, %328, %cst_156 {dimension_numbers = #tpu.dot_dimension_numbers<[1], [0], [0], [1], [0, 0, 1, 1], [], []>} : vector<2x128xbf16>, vector<128x512xbf16>, vector<2x512xf32> -> vector<2x512xf32>
      %344 = vector.broadcast %330 : vector<1x512xf32> to vector<2x512xf32>
      %345 = arith.addf %343, %344 : vector<2x512xf32>
      %c1_157 = arith.constant 1 : index
      %c0_158 = arith.constant 0 : index
      %c0_159 = arith.constant 0 : index
      %346 = vector.load %arg9[%c1_157, %c0_158, %c0_159] : memref<8x2x512xf32, #tpu.memory_space<vmem>>, vector<1x2x512xf32>
      %347 = vector.shape_cast %346 : vector<1x2x512xf32> to vector<2x512xf32>
      %348 = vector.shape_cast %345 : vector<2x512xf32> to vector<1x2x512xf32>
      tpu.vector_store %arg9[%c1_157, %c0_158, %c0_159], %348 {strides = array<i32>} : memref<8x2x512xf32, #tpu.memory_space<vmem>>, vector<1x2x512xf32>,
      %c2 = arith.constant 2 : index
      %c0_160 = arith.constant 0 : index
      %c0_161 = arith.constant 0 : index
      %349 = vector.load %arg8[%c2, %c0_160, %c0_161] : memref<8x2x128xf32, #tpu.memory_space<vmem>>, vector<1x2x128xf32>
      %350 = vector.shape_cast %349 : vector<1x2x128xf32> to vector<2x128xf32>
      %351 = arith.truncf %350 : vector<2x128xf32> to vector<2x128xbf16>
      %cst_162 = arith.constant dense<0.000000e+00> : vector<2x512xf32>
      %352 = tpu.matmul %351, %328, %cst_162 {dimension_numbers = #tpu.dot_dimension_numbers<[1], [0], [0], [1], [0, 0, 1, 1], [], []>} : vector<2x128xbf16>, vector<128x512xbf16>, vector<2x512xf32> -> vector<2x512xf32>
      %353 = vector.broadcast %330 : vector<1x512xf32> to vector<2x512xf32>
      %354 = arith.addf %352, %353 : vector<2x512xf32>
      %c2_163 = arith.constant 2 : index
      %c0_164 = arith.constant 0 : index
      %c0_165 = arith.constant 0 : index
      %355 = vector.load %arg9[%c2_163, %c0_164, %c0_165] : memref<8x2x512xf32, #tpu.memory_space<vmem>>, vector<1x2x512xf32>
      %356 = vector.shape_cast %355 : vector<1x2x512xf32> to vector<2x512xf32>
      %357 = vector.shape_cast %354 : vector<2x512xf32> to vector<1x2x512xf32>
      tpu.vector_store %arg9[%c2_163, %c0_164, %c0_165], %357 {strides = array<i32>} : memref<8x2x512xf32, #tpu.memory_space<vmem>>, vector<1x2x512xf32>,
      %c3 = arith.constant 3 : index
      %c0_166 = arith.constant 0 : index
      %c0_167 = arith.constant 0 : index
      %358 = vector.load %arg8[%c3, %c0_166, %c0_167] : memref<8x2x128xf32, #tpu.memory_space<vmem>>, vector<1x2x128xf32>
      %359 = vector.shape_cast %358 : vector<1x2x128xf32> to vector<2x128xf32>
      %360 = arith.truncf %359 : vector<2x128xf32> to vector<2x128xbf16>
      %cst_168 = arith.constant dense<0.000000e+00> : vector<2x512xf32>
      %361 = tpu.matmul %360, %328, %cst_168 {dimension_numbers = #tpu.dot_dimension_numbers<[1], [0], [0], [1], [0, 0, 1, 1], [], []>} : vector<2x128xbf16>, vector<128x512xbf16>, vector<2x512xf32> -> vector<2x512xf32>
      %362 = vector.broadcast %330 : vector<1x512xf32> to vector<2x512xf32>
      %363 = arith.addf %361, %362 : vector<2x512xf32>
      %c3_169 = arith.constant 3 : index
      %c0_170 = arith.constant 0 : index
      %c0_171 = arith.constant 0 : index
      %364 = vector.load %arg9[%c3_169, %c0_170, %c0_171] : memref<8x2x512xf32, #tpu.memory_space<vmem>>, vector<1x2x512xf32>
      %365 = vector.shape_cast %364 : vector<1x2x512xf32> to vector<2x512xf32>
      %366 = vector.shape_cast %363 : vector<2x512xf32> to vector<1x2x512xf32>
      tpu.vector_store %arg9[%c3_169, %c0_170, %c0_171], %366 {strides = array<i32>} : memref<8x2x512xf32, #tpu.memory_space<vmem>>, vector<1x2x512xf32>,
      %c4 = arith.constant 4 : index
      %c0_172 = arith.constant 0 : index
      %c0_173 = arith.constant 0 : index
      %367 = vector.load %arg8[%c4, %c0_172, %c0_173] : memref<8x2x128xf32, #tpu.memory_space<vmem>>, vector<1x2x128xf32>
      %368 = vector.shape_cast %367 : vector<1x2x128xf32> to vector<2x128xf32>
      %369 = arith.truncf %368 : vector<2x128xf32> to vector<2x128xbf16>
      %cst_174 = arith.constant dense<0.000000e+00> : vector<2x512xf32>
      %370 = tpu.matmul %369, %328, %cst_174 {dimension_numbers = #tpu.dot_dimension_numbers<[1], [0], [0], [1], [0, 0, 1, 1], [], []>} : vector<2x128xbf16>, vector<128x512xbf16>, vector<2x512xf32> -> vector<2x512xf32>
      %371 = vector.broadcast %330 : vector<1x512xf32> to vector<2x512xf32>
      %372 = arith.addf %370, %371 : vector<2x512xf32>
      %c4_175 = arith.constant 4 : index
      %c0_176 = arith.constant 0 : index
      %c0_177 = arith.constant 0 : index
      %373 = vector.load %arg9[%c4_175, %c0_176, %c0_177] : memref<8x2x512xf32, #tpu.memory_space<vmem>>, vector<1x2x512xf32>
      %374 = vector.shape_cast %373 : vector<1x2x512xf32> to vector<2x512xf32>
      %375 = vector.shape_cast %372 : vector<2x512xf32> to vector<1x2x512xf32>
      tpu.vector_store %arg9[%c4_175, %c0_176, %c0_177], %375 {strides = array<i32>} : memref<8x2x512xf32, #tpu.memory_space<vmem>>, vector<1x2x512xf32>,
      %c5 = arith.constant 5 : index
      %c0_178 = arith.constant 0 : index
      %c0_179 = arith.constant 0 : index
      %376 = vector.load %arg8[%c5, %c0_178, %c0_179] : memref<8x2x128xf32, #tpu.memory_space<vmem>>, vector<1x2x128xf32>
      %377 = vector.shape_cast %376 : vector<1x2x128xf32> to vector<2x128xf32>
      %378 = arith.truncf %377 : vector<2x128xf32> to vector<2x128xbf16>
      %cst_180 = arith.constant dense<0.000000e+00> : vector<2x512xf32>
      %379 = tpu.matmul %378, %328, %cst_180 {dimension_numbers = #tpu.dot_dimension_numbers<[1], [0], [0], [1], [0, 0, 1, 1], [], []>} : vector<2x128xbf16>, vector<128x512xbf16>, vector<2x512xf32> -> vector<2x512xf32>
      %380 = vector.broadcast %330 : vector<1x512xf32> to vector<2x512xf32>
      %381 = arith.addf %379, %380 : vector<2x512xf32>
      %c5_181 = arith.constant 5 : index
      %c0_182 = arith.constant 0 : index
      %c0_183 = arith.constant 0 : index
      %382 = vector.load %arg9[%c5_181, %c0_182, %c0_183] : memref<8x2x512xf32, #tpu.memory_space<vmem>>, vector<1x2x512xf32>
      %383 = vector.shape_cast %382 : vector<1x2x512xf32> to vector<2x512xf32>
      %384 = vector.shape_cast %381 : vector<2x512xf32> to vector<1x2x512xf32>
      tpu.vector_store %arg9[%c5_181, %c0_182, %c0_183], %384 {strides = array<i32>} : memref<8x2x512xf32, #tpu.memory_space<vmem>>, vector<1x2x512xf32>,
      %c6 = arith.constant 6 : index
      %c0_184 = arith.constant 0 : index
      %c0_185 = arith.constant 0 : index
      %385 = vector.load %arg8[%c6, %c0_184, %c0_185] : memref<8x2x128xf32, #tpu.memory_space<vmem>>, vector<1x2x128xf32>
      %386 = vector.shape_cast %385 : vector<1x2x128xf32> to vector<2x128xf32>
      %387 = arith.truncf %386 : vector<2x128xf32> to vector<2x128xbf16>
      %cst_186 = arith.constant dense<0.000000e+00> : vector<2x512xf32>
      %388 = tpu.matmul %387, %328, %cst_186 {dimension_numbers = #tpu.dot_dimension_numbers<[1], [0], [0], [1], [0, 0, 1, 1], [], []>} : vector<2x128xbf16>, vector<128x512xbf16>, vector<2x512xf32> -> vector<2x512xf32>
      %389 = vector.broadcast %330 : vector<1x512xf32> to vector<2x512xf32>
      %390 = arith.addf %388, %389 : vector<2x512xf32>
      %c6_187 = arith.constant 6 : index
      %c0_188 = arith.constant 0 : index
      %c0_189 = arith.constant 0 : index
      %391 = vector.load %arg9[%c6_187, %c0_188, %c0_189] : memref<8x2x512xf32, #tpu.memory_space<vmem>>, vector<1x2x512xf32>
      %392 = vector.shape_cast %391 : vector<1x2x512xf32> to vector<2x512xf32>
      %393 = vector.shape_cast %390 : vector<2x512xf32> to vector<1x2x512xf32>
      tpu.vector_store %arg9[%c6_187, %c0_188, %c0_189], %393 {strides = array<i32>} : memref<8x2x512xf32, #tpu.memory_space<vmem>>, vector<1x2x512xf32>,
      %c7 = arith.constant 7 : index
      %c0_190 = arith.constant 0 : index
      %c0_191 = arith.constant 0 : index
      %394 = vector.load %arg8[%c7, %c0_190, %c0_191] : memref<8x2x128xf32, #tpu.memory_space<vmem>>, vector<1x2x128xf32>
      %395 = vector.shape_cast %394 : vector<1x2x128xf32> to vector<2x128xf32>
      %396 = arith.truncf %395 : vector<2x128xf32> to vector<2x128xbf16>
      %cst_192 = arith.constant dense<0.000000e+00> : vector<2x512xf32>
      %397 = tpu.matmul %396, %328, %cst_192 {dimension_numbers = #tpu.dot_dimension_numbers<[1], [0], [0], [1], [0, 0, 1, 1], [], []>} : vector<2x128xbf16>, vector<128x512xbf16>, vector<2x512xf32> -> vector<2x512xf32>
      %398 = vector.broadcast %330 : vector<1x512xf32> to vector<2x512xf32>
      %399 = arith.addf %397, %398 : vector<2x512xf32>
      %c7_193 = arith.constant 7 : index
      %c0_194 = arith.constant 0 : index
      %c0_195 = arith.constant 0 : index
      %400 = vector.load %arg9[%c7_193, %c0_194, %c0_195] : memref<8x2x512xf32, #tpu.memory_space<vmem>>, vector<1x2x512xf32>
      %401 = vector.shape_cast %400 : vector<1x2x512xf32> to vector<2x512xf32>
      %402 = vector.shape_cast %399 : vector<2x512xf32> to vector<1x2x512xf32>
      tpu.vector_store %arg9[%c7_193, %c0_194, %c0_195], %402 {strides = array<i32>} : memref<8x2x512xf32, #tpu.memory_space<vmem>>, vector<1x2x512xf32>,
    } else {
    }
    %cst = arith.constant 0.000000e+00 : f32
    %6 = vector.broadcast %cst : f32 to vector<2x128xf32>
    %c0 = arith.constant 0 : index
    %c0_3 = arith.constant 0 : index
    %7 = vector.load %arg10[%c0, %c0_3] : memref<2x128xf32, #tpu.memory_space<vmem>>, vector<2x128xf32>
    tpu.vector_store %arg10[%c0, %c0_3], %6 {strides = array<i32>} : memref<2x128xf32, #tpu.memory_space<vmem>>, vector<2x128xf32>,
    %cst_4 = arith.constant 0.000000e+00 : f32
    %8 = vector.broadcast %cst_4 : f32 to vector<2x128xf32>
    %c0_5 = arith.constant 0 : index
    %c0_6 = arith.constant 0 : index
    %9 = vector.load %arg11[%c0_5, %c0_6] : memref<2x128xf32, #tpu.memory_space<vmem>>, vector<2x128xf32>
    tpu.vector_store %arg11[%c0_5, %c0_6], %8 {strides = array<i32>} : memref<2x128xf32, #tpu.memory_space<vmem>>, vector<2x128xf32>,
    %c0_7 = arith.constant 0 : index
    %c0_8 = arith.constant 0 : index
    %c0_9 = arith.constant 0 : index
    %10 = vector.load %arg3[%c0_7, %c0_8, %c0_9] : memref<1x128x512xbf16, #tpu.memory_space<vmem>>, vector<1x128x512xbf16>
    %11 = vector.shape_cast %10 : vector<1x128x512xbf16> to vector<128x512xbf16>
    %c0_i32_10 = arith.constant 0 : i32
    %c0_11 = arith.constant 0 : index
    %c0_12 = arith.constant 0 : index
    %12 = vector.load %arg10[%c0_11, %c0_12] : memref<2x128xf32, #tpu.memory_space<vmem>>, vector<2x128xf32>
    %13 = arith.index_cast %c0_i32_10 : i32 to index
    %c0_13 = arith.constant 0 : index
    %c0_14 = arith.constant 0 : index
    %14 = vector.load %arg9[%13, %c0_13, %c0_14] : memref<8x2x512xf32, #tpu.memory_space<vmem>>, vector<1x2x512xf32>
    %15 = vector.shape_cast %14 : vector<1x2x512xf32> to vector<2x512xf32>
    %16 = arith.truncf %12 : vector<2x128xf32> to vector<2x128xbf16>
    %cst_15 = arith.constant dense<0.000000e+00> : vector<2x512xf32>
    %17 = tpu.matmul %16, %11, %cst_15 {dimension_numbers = #tpu.dot_dimension_numbers<[1], [0], [0], [1], [0, 0, 1, 1], [], []>} : vector<2x128xbf16>, vector<128x512xbf16>, vector<2x512xf32> -> vector<2x512xf32>
    %18 = arith.addf %15, %17 : vector<2x512xf32>
    %19 = vector.extract_strided_slice %18 {offsets = [0, 0], sizes = [2, 128], strides = [1, 1]} : vector<2x512xf32> to vector<2x128xf32>
    %20 = arith.negf %19 : vector<2x128xf32>
    %21 = math.exp %20 : vector<2x128xf32>
    %cst_16 = arith.constant 1.000000e+00 : f32
    %22 = vector.broadcast %cst_16 : f32 to vector<2x128xf32>
    %23 = arith.addf %22, %21 : vector<2x128xf32>
    %24 = arith.divf %22, %23 : vector<2x128xf32>
    %25 = vector.extract_strided_slice %18 {offsets = [0, 128], sizes = [2, 128], strides = [1, 1]} : vector<2x512xf32> to vector<2x128xf32>
    %26 = arith.negf %25 : vector<2x128xf32>
    %27 = math.exp %26 : vector<2x128xf32>
    %cst_17 = arith.constant 1.000000e+00 : f32
    %28 = vector.broadcast %cst_17 : f32 to vector<2x128xf32>
    %29 = arith.addf %28, %27 : vector<2x128xf32>
    %30 = arith.divf %28, %29 : vector<2x128xf32>
    %31 = vector.extract_strided_slice %18 {offsets = [0, 256], sizes = [2, 128], strides = [1, 1]} : vector<2x512xf32> to vector<2x128xf32>
    %32 = math.tanh %31 : vector<2x128xf32>
    %33 = vector.extract_strided_slice %18 {offsets = [0, 384], sizes = [2, 128], strides = [1, 1]} : vector<2x512xf32> to vector<2x128xf32>
    %34 = arith.negf %33 : vector<2x128xf32>
    %35 = math.exp %34 : vector<2x128xf32>
    %cst_18 = arith.constant 1.000000e+00 : f32
    %36 = vector.broadcast %cst_18 : f32 to vector<2x128xf32>
    %37 = arith.addf %36, %35 : vector<2x128xf32>
    %38 = arith.divf %36, %37 : vector<2x128xf32>
    %c0_19 = arith.constant 0 : index
    %c0_20 = arith.constant 0 : index
    %39 = vector.load %arg11[%c0_19, %c0_20] : memref<2x128xf32, #tpu.memory_space<vmem>>, vector<2x128xf32>
    %40 = arith.mulf %30, %39 : vector<2x128xf32>
    %41 = arith.mulf %24, %32 : vector<2x128xf32>
    %42 = arith.addf %40, %41 : vector<2x128xf32>
    %43 = math.tanh %42 : vector<2x128xf32>
    %44 = arith.mulf %38, %43 : vector<2x128xf32>
    %c0_21 = arith.constant 0 : index
    %c0_22 = arith.constant 0 : index
    %45 = vector.load %arg11[%c0_21, %c0_22] : memref<2x128xf32, #tpu.memory_space<vmem>>, vector<2x128xf32>
    tpu.vector_store %arg11[%c0_21, %c0_22], %42 {strides = array<i32>} : memref<2x128xf32, #tpu.memory_space<vmem>>, vector<2x128xf32>,
    %c0_23 = arith.constant 0 : index
    %c0_24 = arith.constant 0 : index
    %46 = vector.load %arg10[%c0_23, %c0_24] : memref<2x128xf32, #tpu.memory_space<vmem>>, vector<2x128xf32>
    tpu.vector_store %arg10[%c0_23, %c0_24], %44 {strides = array<i32>} : memref<2x128xf32, #tpu.memory_space<vmem>>, vector<2x128xf32>,
    %47 = arith.index_cast %c0_i32_10 : i32 to index
    %c0_25 = arith.constant 0 : index
    %c0_26 = arith.constant 0 : index
    %48 = vector.load %arg8[%47, %c0_25, %c0_26] : memref<8x2x128xf32, #tpu.memory_space<vmem>>, vector<1x2x128xf32>
    %49 = vector.shape_cast %48 : vector<1x2x128xf32> to vector<2x128xf32>
    %50 = vector.shape_cast %44 : vector<2x128xf32> to vector<1x2x128xf32>
    tpu.vector_store %arg8[%47, %c0_25, %c0_26], %50 {strides = array<i32>} : memref<8x2x128xf32, #tpu.memory_space<vmem>>, vector<1x2x128xf32>,
    %c1_i32 = arith.constant 1 : i32
    %c0_27 = arith.constant 0 : index
    %c0_28 = arith.constant 0 : index
    %51 = vector.load %arg10[%c0_27, %c0_28] : memref<2x128xf32, #tpu.memory_space<vmem>>, vector<2x128xf32>
    %52 = arith.index_cast %c1_i32 : i32 to index
    %c0_29 = arith.constant 0 : index
    %c0_30 = arith.constant 0 : index
    %53 = vector.load %arg9[%52, %c0_29, %c0_30] : memref<8x2x512xf32, #tpu.memory_space<vmem>>, vector<1x2x512xf32>
    %54 = vector.shape_cast %53 : vector<1x2x512xf32> to vector<2x512xf32>
    %55 = arith.truncf %51 : vector<2x128xf32> to vector<2x128xbf16>
    %cst_31 = arith.constant dense<0.000000e+00> : vector<2x512xf32>
    %56 = tpu.matmul %55, %11, %cst_31 {dimension_numbers = #tpu.dot_dimension_numbers<[1], [0], [0], [1], [0, 0, 1, 1], [], []>} : vector<2x128xbf16>, vector<128x512xbf16>, vector<2x512xf32> -> vector<2x512xf32>
    %57 = arith.addf %54, %56 : vector<2x512xf32>
    %58 = vector.extract_strided_slice %57 {offsets = [0, 0], sizes = [2, 128], strides = [1, 1]} : vector<2x512xf32> to vector<2x128xf32>
    %59 = arith.negf %58 : vector<2x128xf32>
    %60 = math.exp %59 : vector<2x128xf32>
    %cst_32 = arith.constant 1.000000e+00 : f32
    %61 = vector.broadcast %cst_32 : f32 to vector<2x128xf32>
    %62 = arith.addf %61, %60 : vector<2x128xf32>
    %63 = arith.divf %61, %62 : vector<2x128xf32>
    %64 = vector.extract_strided_slice %57 {offsets = [0, 128], sizes = [2, 128], strides = [1, 1]} : vector<2x512xf32> to vector<2x128xf32>
    %65 = arith.negf %64 : vector<2x128xf32>
    %66 = math.exp %65 : vector<2x128xf32>
    %cst_33 = arith.constant 1.000000e+00 : f32
    %67 = vector.broadcast %cst_33 : f32 to vector<2x128xf32>
    %68 = arith.addf %67, %66 : vector<2x128xf32>
    %69 = arith.divf %67, %68 : vector<2x128xf32>
    %70 = vector.extract_strided_slice %57 {offsets = [0, 256], sizes = [2, 128], strides = [1, 1]} : vector<2x512xf32> to vector<2x128xf32>
    %71 = math.tanh %70 : vector<2x128xf32>
    %72 = vector.extract_strided_slice %57 {offsets = [0, 384], sizes = [2, 128], strides = [1, 1]} : vector<2x512xf32> to vector<2x128xf32>
    %73 = arith.negf %72 : vector<2x128xf32>
    %74 = math.exp %73 : vector<2x128xf32>
    %cst_34 = arith.constant 1.000000e+00 : f32
    %75 = vector.broadcast %cst_34 : f32 to vector<2x128xf32>
    %76 = arith.addf %75, %74 : vector<2x128xf32>
    %77 = arith.divf %75, %76 : vector<2x128xf32>
    %c0_35 = arith.constant 0 : index
    %c0_36 = arith.constant 0 : index
    %78 = vector.load %arg11[%c0_35, %c0_36] : memref<2x128xf32, #tpu.memory_space<vmem>>, vector<2x128xf32>
    %79 = arith.mulf %69, %78 : vector<2x128xf32>
    %80 = arith.mulf %63, %71 : vector<2x128xf32>
    %81 = arith.addf %79, %80 : vector<2x128xf32>
    %82 = math.tanh %81 : vector<2x128xf32>
    %83 = arith.mulf %77, %82 : vector<2x128xf32>
    %c0_37 = arith.constant 0 : index
    %c0_38 = arith.constant 0 : index
    %84 = vector.load %arg11[%c0_37, %c0_38] : memref<2x128xf32, #tpu.memory_space<vmem>>, vector<2x128xf32>
    tpu.vector_store %arg11[%c0_37, %c0_38], %81 {strides = array<i32>} : memref<2x128xf32, #tpu.memory_space<vmem>>, vector<2x128xf32>,
    %c0_39 = arith.constant 0 : index
    %c0_40 = arith.constant 0 : index
    %85 = vector.load %arg10[%c0_39, %c0_40] : memref<2x128xf32, #tpu.memory_space<vmem>>, vector<2x128xf32>
    tpu.vector_store %arg10[%c0_39, %c0_40], %83 {strides = array<i32>} : memref<2x128xf32, #tpu.memory_space<vmem>>, vector<2x128xf32>,
    %86 = arith.index_cast %c1_i32 : i32 to index
    %c0_41 = arith.constant 0 : index
    %c0_42 = arith.constant 0 : index
    %87 = vector.load %arg8[%86, %c0_41, %c0_42] : memref<8x2x128xf32, #tpu.memory_space<vmem>>, vector<1x2x128xf32>
    %88 = vector.shape_cast %87 : vector<1x2x128xf32> to vector<2x128xf32>
    %89 = vector.shape_cast %83 : vector<2x128xf32> to vector<1x2x128xf32>
    tpu.vector_store %arg8[%86, %c0_41, %c0_42], %89 {strides = array<i32>} : memref<8x2x128xf32, #tpu.memory_space<vmem>>, vector<1x2x128xf32>,
    %c2_i32 = arith.constant 2 : i32
    %c0_43 = arith.constant 0 : index
    %c0_44 = arith.constant 0 : index
    %90 = vector.load %arg10[%c0_43, %c0_44] : memref<2x128xf32, #tpu.memory_space<vmem>>, vector<2x128xf32>
    %91 = arith.index_cast %c2_i32 : i32 to index
    %c0_45 = arith.constant 0 : index
    %c0_46 = arith.constant 0 : index
    %92 = vector.load %arg9[%91, %c0_45, %c0_46] : memref<8x2x512xf32, #tpu.memory_space<vmem>>, vector<1x2x512xf32>
    %93 = vector.shape_cast %92 : vector<1x2x512xf32> to vector<2x512xf32>
    %94 = arith.truncf %90 : vector<2x128xf32> to vector<2x128xbf16>
    %cst_47 = arith.constant dense<0.000000e+00> : vector<2x512xf32>
    %95 = tpu.matmul %94, %11, %cst_47 {dimension_numbers = #tpu.dot_dimension_numbers<[1], [0], [0], [1], [0, 0, 1, 1], [], []>} : vector<2x128xbf16>, vector<128x512xbf16>, vector<2x512xf32> -> vector<2x512xf32>
    %96 = arith.addf %93, %95 : vector<2x512xf32>
    %97 = vector.extract_strided_slice %96 {offsets = [0, 0], sizes = [2, 128], strides = [1, 1]} : vector<2x512xf32> to vector<2x128xf32>
    %98 = arith.negf %97 : vector<2x128xf32>
    %99 = math.exp %98 : vector<2x128xf32>
    %cst_48 = arith.constant 1.000000e+00 : f32
    %100 = vector.broadcast %cst_48 : f32 to vector<2x128xf32>
    %101 = arith.addf %100, %99 : vector<2x128xf32>
    %102 = arith.divf %100, %101 : vector<2x128xf32>
    %103 = vector.extract_strided_slice %96 {offsets = [0, 128], sizes = [2, 128], strides = [1, 1]} : vector<2x512xf32> to vector<2x128xf32>
    %104 = arith.negf %103 : vector<2x128xf32>
    %105 = math.exp %104 : vector<2x128xf32>
    %cst_49 = arith.constant 1.000000e+00 : f32
    %106 = vector.broadcast %cst_49 : f32 to vector<2x128xf32>
    %107 = arith.addf %106, %105 : vector<2x128xf32>
    %108 = arith.divf %106, %107 : vector<2x128xf32>
    %109 = vector.extract_strided_slice %96 {offsets = [0, 256], sizes = [2, 128], strides = [1, 1]} : vector<2x512xf32> to vector<2x128xf32>
    %110 = math.tanh %109 : vector<2x128xf32>
    %111 = vector.extract_strided_slice %96 {offsets = [0, 384], sizes = [2, 128], strides = [1, 1]} : vector<2x512xf32> to vector<2x128xf32>
    %112 = arith.negf %111 : vector<2x128xf32>
    %113 = math.exp %112 : vector<2x128xf32>
    %cst_50 = arith.constant 1.000000e+00 : f32
    %114 = vector.broadcast %cst_50 : f32 to vector<2x128xf32>
    %115 = arith.addf %114, %113 : vector<2x128xf32>
    %116 = arith.divf %114, %115 : vector<2x128xf32>
    %c0_51 = arith.constant 0 : index
    %c0_52 = arith.constant 0 : index
    %117 = vector.load %arg11[%c0_51, %c0_52] : memref<2x128xf32, #tpu.memory_space<vmem>>, vector<2x128xf32>
    %118 = arith.mulf %108, %117 : vector<2x128xf32>
    %119 = arith.mulf %102, %110 : vector<2x128xf32>
    %120 = arith.addf %118, %119 : vector<2x128xf32>
    %121 = math.tanh %120 : vector<2x128xf32>
    %122 = arith.mulf %116, %121 : vector<2x128xf32>
    %c0_53 = arith.constant 0 : index
    %c0_54 = arith.constant 0 : index
    %123 = vector.load %arg11[%c0_53, %c0_54] : memref<2x128xf32, #tpu.memory_space<vmem>>, vector<2x128xf32>
    tpu.vector_store %arg11[%c0_53, %c0_54], %120 {strides = array<i32>} : memref<2x128xf32, #tpu.memory_space<vmem>>, vector<2x128xf32>,
    %c0_55 = arith.constant 0 : index
    %c0_56 = arith.constant 0 : index
    %124 = vector.load %arg10[%c0_55, %c0_56] : memref<2x128xf32, #tpu.memory_space<vmem>>, vector<2x128xf32>
    tpu.vector_store %arg10[%c0_55, %c0_56], %122 {strides = array<i32>} : memref<2x128xf32, #tpu.memory_space<vmem>>, vector<2x128xf32>,
    %125 = arith.index_cast %c2_i32 : i32 to index
    %c0_57 = arith.constant 0 : index
    %c0_58 = arith.constant 0 : index
    %126 = vector.load %arg8[%125, %c0_57, %c0_58] : memref<8x2x128xf32, #tpu.memory_space<vmem>>, vector<1x2x128xf32>
    %127 = vector.shape_cast %126 : vector<1x2x128xf32> to vector<2x128xf32>
    %128 = vector.shape_cast %122 : vector<2x128xf32> to vector<1x2x128xf32>
    tpu.vector_store %arg8[%125, %c0_57, %c0_58], %128 {strides = array<i32>} : memref<8x2x128xf32, #tpu.memory_space<vmem>>, vector<1x2x128xf32>,
    %c3_i32 = arith.constant 3 : i32
    %c0_59 = arith.constant 0 : index
    %c0_60 = arith.constant 0 : index
    %129 = vector.load %arg10[%c0_59, %c0_60] : memref<2x128xf32, #tpu.memory_space<vmem>>, vector<2x128xf32>
    %130 = arith.index_cast %c3_i32 : i32 to index
    %c0_61 = arith.constant 0 : index
    %c0_62 = arith.constant 0 : index
    %131 = vector.load %arg9[%130, %c0_61, %c0_62] : memref<8x2x512xf32, #tpu.memory_space<vmem>>, vector<1x2x512xf32>
    %132 = vector.shape_cast %131 : vector<1x2x512xf32> to vector<2x512xf32>
    %133 = arith.truncf %129 : vector<2x128xf32> to vector<2x128xbf16>
    %cst_63 = arith.constant dense<0.000000e+00> : vector<2x512xf32>
    %134 = tpu.matmul %133, %11, %cst_63 {dimension_numbers = #tpu.dot_dimension_numbers<[1], [0], [0], [1], [0, 0, 1, 1], [], []>} : vector<2x128xbf16>, vector<128x512xbf16>, vector<2x512xf32> -> vector<2x512xf32>
    %135 = arith.addf %132, %134 : vector<2x512xf32>
    %136 = vector.extract_strided_slice %135 {offsets = [0, 0], sizes = [2, 128], strides = [1, 1]} : vector<2x512xf32> to vector<2x128xf32>
    %137 = arith.negf %136 : vector<2x128xf32>
    %138 = math.exp %137 : vector<2x128xf32>
    %cst_64 = arith.constant 1.000000e+00 : f32
    %139 = vector.broadcast %cst_64 : f32 to vector<2x128xf32>
    %140 = arith.addf %139, %138 : vector<2x128xf32>
    %141 = arith.divf %139, %140 : vector<2x128xf32>
    %142 = vector.extract_strided_slice %135 {offsets = [0, 128], sizes = [2, 128], strides = [1, 1]} : vector<2x512xf32> to vector<2x128xf32>
    %143 = arith.negf %142 : vector<2x128xf32>
    %144 = math.exp %143 : vector<2x128xf32>
    %cst_65 = arith.constant 1.000000e+00 : f32
    %145 = vector.broadcast %cst_65 : f32 to vector<2x128xf32>
    %146 = arith.addf %145, %144 : vector<2x128xf32>
    %147 = arith.divf %145, %146 : vector<2x128xf32>
    %148 = vector.extract_strided_slice %135 {offsets = [0, 256], sizes = [2, 128], strides = [1, 1]} : vector<2x512xf32> to vector<2x128xf32>
    %149 = math.tanh %148 : vector<2x128xf32>
    %150 = vector.extract_strided_slice %135 {offsets = [0, 384], sizes = [2, 128], strides = [1, 1]} : vector<2x512xf32> to vector<2x128xf32>
    %151 = arith.negf %150 : vector<2x128xf32>
    %152 = math.exp %151 : vector<2x128xf32>
    %cst_66 = arith.constant 1.000000e+00 : f32
    %153 = vector.broadcast %cst_66 : f32 to vector<2x128xf32>
    %154 = arith.addf %153, %152 : vector<2x128xf32>
    %155 = arith.divf %153, %154 : vector<2x128xf32>
    %c0_67 = arith.constant 0 : index
    %c0_68 = arith.constant 0 : index
    %156 = vector.load %arg11[%c0_67, %c0_68] : memref<2x128xf32, #tpu.memory_space<vmem>>, vector<2x128xf32>
    %157 = arith.mulf %147, %156 : vector<2x128xf32>
    %158 = arith.mulf %141, %149 : vector<2x128xf32>
    %159 = arith.addf %157, %158 : vector<2x128xf32>
    %160 = math.tanh %159 : vector<2x128xf32>
    %161 = arith.mulf %155, %160 : vector<2x128xf32>
    %c0_69 = arith.constant 0 : index
    %c0_70 = arith.constant 0 : index
    %162 = vector.load %arg11[%c0_69, %c0_70] : memref<2x128xf32, #tpu.memory_space<vmem>>, vector<2x128xf32>
    tpu.vector_store %arg11[%c0_69, %c0_70], %159 {strides = array<i32>} : memref<2x128xf32, #tpu.memory_space<vmem>>, vector<2x128xf32>,
    %c0_71 = arith.constant 0 : index
    %c0_72 = arith.constant 0 : index
    %163 = vector.load %arg10[%c0_71, %c0_72] : memref<2x128xf32, #tpu.memory_space<vmem>>, vector<2x128xf32>
    tpu.vector_store %arg10[%c0_71, %c0_72], %161 {strides = array<i32>} : memref<2x128xf32, #tpu.memory_space<vmem>>, vector<2x128xf32>,
    %164 = arith.index_cast %c3_i32 : i32 to index
    %c0_73 = arith.constant 0 : index
    %c0_74 = arith.constant 0 : index
    %165 = vector.load %arg8[%164, %c0_73, %c0_74] : memref<8x2x128xf32, #tpu.memory_space<vmem>>, vector<1x2x128xf32>
    %166 = vector.shape_cast %165 : vector<1x2x128xf32> to vector<2x128xf32>
    %167 = vector.shape_cast %161 : vector<2x128xf32> to vector<1x2x128xf32>
    tpu.vector_store %arg8[%164, %c0_73, %c0_74], %167 {strides = array<i32>} : memref<8x2x128xf32, #tpu.memory_space<vmem>>, vector<1x2x128xf32>,
    %c4_i32 = arith.constant 4 : i32
    %c0_75 = arith.constant 0 : index
    %c0_76 = arith.constant 0 : index
    %168 = vector.load %arg10[%c0_75, %c0_76] : memref<2x128xf32, #tpu.memory_space<vmem>>, vector<2x128xf32>
    %169 = arith.index_cast %c4_i32 : i32 to index
    %c0_77 = arith.constant 0 : index
    %c0_78 = arith.constant 0 : index
    %170 = vector.load %arg9[%169, %c0_77, %c0_78] : memref<8x2x512xf32, #tpu.memory_space<vmem>>, vector<1x2x512xf32>
    %171 = vector.shape_cast %170 : vector<1x2x512xf32> to vector<2x512xf32>
    %172 = arith.truncf %168 : vector<2x128xf32> to vector<2x128xbf16>
    %cst_79 = arith.constant dense<0.000000e+00> : vector<2x512xf32>
    %173 = tpu.matmul %172, %11, %cst_79 {dimension_numbers = #tpu.dot_dimension_numbers<[1], [0], [0], [1], [0, 0, 1, 1], [], []>} : vector<2x128xbf16>, vector<128x512xbf16>, vector<2x512xf32> -> vector<2x512xf32>
    %174 = arith.addf %171, %173 : vector<2x512xf32>
    %175 = vector.extract_strided_slice %174 {offsets = [0, 0], sizes = [2, 128], strides = [1, 1]} : vector<2x512xf32> to vector<2x128xf32>
    %176 = arith.negf %175 : vector<2x128xf32>
    %177 = math.exp %176 : vector<2x128xf32>
    %cst_80 = arith.constant 1.000000e+00 : f32
    %178 = vector.broadcast %cst_80 : f32 to vector<2x128xf32>
    %179 = arith.addf %178, %177 : vector<2x128xf32>
    %180 = arith.divf %178, %179 : vector<2x128xf32>
    %181 = vector.extract_strided_slice %174 {offsets = [0, 128], sizes = [2, 128], strides = [1, 1]} : vector<2x512xf32> to vector<2x128xf32>
    %182 = arith.negf %181 : vector<2x128xf32>
    %183 = math.exp %182 : vector<2x128xf32>
    %cst_81 = arith.constant 1.000000e+00 : f32
    %184 = vector.broadcast %cst_81 : f32 to vector<2x128xf32>
    %185 = arith.addf %184, %183 : vector<2x128xf32>
    %186 = arith.divf %184, %185 : vector<2x128xf32>
    %187 = vector.extract_strided_slice %174 {offsets = [0, 256], sizes = [2, 128], strides = [1, 1]} : vector<2x512xf32> to vector<2x128xf32>
    %188 = math.tanh %187 : vector<2x128xf32>
    %189 = vector.extract_strided_slice %174 {offsets = [0, 384], sizes = [2, 128], strides = [1, 1]} : vector<2x512xf32> to vector<2x128xf32>
    %190 = arith.negf %189 : vector<2x128xf32>
    %191 = math.exp %190 : vector<2x128xf32>
    %cst_82 = arith.constant 1.000000e+00 : f32
    %192 = vector.broadcast %cst_82 : f32 to vector<2x128xf32>
    %193 = arith.addf %192, %191 : vector<2x128xf32>
    %194 = arith.divf %192, %193 : vector<2x128xf32>
    %c0_83 = arith.constant 0 : index
    %c0_84 = arith.constant 0 : index
    %195 = vector.load %arg11[%c0_83, %c0_84] : memref<2x128xf32, #tpu.memory_space<vmem>>, vector<2x128xf32>
    %196 = arith.mulf %186, %195 : vector<2x128xf32>
    %197 = arith.mulf %180, %188 : vector<2x128xf32>
    %198 = arith.addf %196, %197 : vector<2x128xf32>
    %199 = math.tanh %198 : vector<2x128xf32>
    %200 = arith.mulf %194, %199 : vector<2x128xf32>
    %c0_85 = arith.constant 0 : index
    %c0_86 = arith.constant 0 : index
    %201 = vector.load %arg11[%c0_85, %c0_86] : memref<2x128xf32, #tpu.memory_space<vmem>>, vector<2x128xf32>
    tpu.vector_store %arg11[%c0_85, %c0_86], %198 {strides = array<i32>} : memref<2x128xf32, #tpu.memory_space<vmem>>, vector<2x128xf32>,
    %c0_87 = arith.constant 0 : index
    %c0_88 = arith.constant 0 : index
    %202 = vector.load %arg10[%c0_87, %c0_88] : memref<2x128xf32, #tpu.memory_space<vmem>>, vector<2x128xf32>
    tpu.vector_store %arg10[%c0_87, %c0_88], %200 {strides = array<i32>} : memref<2x128xf32, #tpu.memory_space<vmem>>, vector<2x128xf32>,
    %203 = arith.index_cast %c4_i32 : i32 to index
    %c0_89 = arith.constant 0 : index
    %c0_90 = arith.constant 0 : index
    %204 = vector.load %arg8[%203, %c0_89, %c0_90] : memref<8x2x128xf32, #tpu.memory_space<vmem>>, vector<1x2x128xf32>
    %205 = vector.shape_cast %204 : vector<1x2x128xf32> to vector<2x128xf32>
    %206 = vector.shape_cast %200 : vector<2x128xf32> to vector<1x2x128xf32>
    tpu.vector_store %arg8[%203, %c0_89, %c0_90], %206 {strides = array<i32>} : memref<8x2x128xf32, #tpu.memory_space<vmem>>, vector<1x2x128xf32>,
    %c5_i32 = arith.constant 5 : i32
    %c0_91 = arith.constant 0 : index
    %c0_92 = arith.constant 0 : index
    %207 = vector.load %arg10[%c0_91, %c0_92] : memref<2x128xf32, #tpu.memory_space<vmem>>, vector<2x128xf32>
    %208 = arith.index_cast %c5_i32 : i32 to index
    %c0_93 = arith.constant 0 : index
    %c0_94 = arith.constant 0 : index
    %209 = vector.load %arg9[%208, %c0_93, %c0_94] : memref<8x2x512xf32, #tpu.memory_space<vmem>>, vector<1x2x512xf32>
    %210 = vector.shape_cast %209 : vector<1x2x512xf32> to vector<2x512xf32>
    %211 = arith.truncf %207 : vector<2x128xf32> to vector<2x128xbf16>
    %cst_95 = arith.constant dense<0.000000e+00> : vector<2x512xf32>
    %212 = tpu.matmul %211, %11, %cst_95 {dimension_numbers = #tpu.dot_dimension_numbers<[1], [0], [0], [1], [0, 0, 1, 1], [], []>} : vector<2x128xbf16>, vector<128x512xbf16>, vector<2x512xf32> -> vector<2x512xf32>
    %213 = arith.addf %210, %212 : vector<2x512xf32>
    %214 = vector.extract_strided_slice %213 {offsets = [0, 0], sizes = [2, 128], strides = [1, 1]} : vector<2x512xf32> to vector<2x128xf32>
    %215 = arith.negf %214 : vector<2x128xf32>
    %216 = math.exp %215 : vector<2x128xf32>
    %cst_96 = arith.constant 1.000000e+00 : f32
    %217 = vector.broadcast %cst_96 : f32 to vector<2x128xf32>
    %218 = arith.addf %217, %216 : vector<2x128xf32>
    %219 = arith.divf %217, %218 : vector<2x128xf32>
    %220 = vector.extract_strided_slice %213 {offsets = [0, 128], sizes = [2, 128], strides = [1, 1]} : vector<2x512xf32> to vector<2x128xf32>
    %221 = arith.negf %220 : vector<2x128xf32>
    %222 = math.exp %221 : vector<2x128xf32>
    %cst_97 = arith.constant 1.000000e+00 : f32
    %223 = vector.broadcast %cst_97 : f32 to vector<2x128xf32>
    %224 = arith.addf %223, %222 : vector<2x128xf32>
    %225 = arith.divf %223, %224 : vector<2x128xf32>
    %226 = vector.extract_strided_slice %213 {offsets = [0, 256], sizes = [2, 128], strides = [1, 1]} : vector<2x512xf32> to vector<2x128xf32>
    %227 = math.tanh %226 : vector<2x128xf32>
    %228 = vector.extract_strided_slice %213 {offsets = [0, 384], sizes = [2, 128], strides = [1, 1]} : vector<2x512xf32> to vector<2x128xf32>
    %229 = arith.negf %228 : vector<2x128xf32>
    %230 = math.exp %229 : vector<2x128xf32>
    %cst_98 = arith.constant 1.000000e+00 : f32
    %231 = vector.broadcast %cst_98 : f32 to vector<2x128xf32>
    %232 = arith.addf %231, %230 : vector<2x128xf32>
    %233 = arith.divf %231, %232 : vector<2x128xf32>
    %c0_99 = arith.constant 0 : index
    %c0_100 = arith.constant 0 : index
    %234 = vector.load %arg11[%c0_99, %c0_100] : memref<2x128xf32, #tpu.memory_space<vmem>>, vector<2x128xf32>
    %235 = arith.mulf %225, %234 : vector<2x128xf32>
    %236 = arith.mulf %219, %227 : vector<2x128xf32>
    %237 = arith.addf %235, %236 : vector<2x128xf32>
    %238 = math.tanh %237 : vector<2x128xf32>
    %239 = arith.mulf %233, %238 : vector<2x128xf32>
    %c0_101 = arith.constant 0 : index
    %c0_102 = arith.constant 0 : index
    %240 = vector.load %arg11[%c0_101, %c0_102] : memref<2x128xf32, #tpu.memory_space<vmem>>, vector<2x128xf32>
    tpu.vector_store %arg11[%c0_101, %c0_102], %237 {strides = array<i32>} : memref<2x128xf32, #tpu.memory_space<vmem>>, vector<2x128xf32>,
    %c0_103 = arith.constant 0 : index
    %c0_104 = arith.constant 0 : index
    %241 = vector.load %arg10[%c0_103, %c0_104] : memref<2x128xf32, #tpu.memory_space<vmem>>, vector<2x128xf32>
    tpu.vector_store %arg10[%c0_103, %c0_104], %239 {strides = array<i32>} : memref<2x128xf32, #tpu.memory_space<vmem>>, vector<2x128xf32>,
    %242 = arith.index_cast %c5_i32 : i32 to index
    %c0_105 = arith.constant 0 : index
    %c0_106 = arith.constant 0 : index
    %243 = vector.load %arg8[%242, %c0_105, %c0_106] : memref<8x2x128xf32, #tpu.memory_space<vmem>>, vector<1x2x128xf32>
    %244 = vector.shape_cast %243 : vector<1x2x128xf32> to vector<2x128xf32>
    %245 = vector.shape_cast %239 : vector<2x128xf32> to vector<1x2x128xf32>
    tpu.vector_store %arg8[%242, %c0_105, %c0_106], %245 {strides = array<i32>} : memref<8x2x128xf32, #tpu.memory_space<vmem>>, vector<1x2x128xf32>,
    %c6_i32 = arith.constant 6 : i32
    %c0_107 = arith.constant 0 : index
    %c0_108 = arith.constant 0 : index
    %246 = vector.load %arg10[%c0_107, %c0_108] : memref<2x128xf32, #tpu.memory_space<vmem>>, vector<2x128xf32>
    %247 = arith.index_cast %c6_i32 : i32 to index
    %c0_109 = arith.constant 0 : index
    %c0_110 = arith.constant 0 : index
    %248 = vector.load %arg9[%247, %c0_109, %c0_110] : memref<8x2x512xf32, #tpu.memory_space<vmem>>, vector<1x2x512xf32>
    %249 = vector.shape_cast %248 : vector<1x2x512xf32> to vector<2x512xf32>
    %250 = arith.truncf %246 : vector<2x128xf32> to vector<2x128xbf16>
    %cst_111 = arith.constant dense<0.000000e+00> : vector<2x512xf32>
    %251 = tpu.matmul %250, %11, %cst_111 {dimension_numbers = #tpu.dot_dimension_numbers<[1], [0], [0], [1], [0, 0, 1, 1], [], []>} : vector<2x128xbf16>, vector<128x512xbf16>, vector<2x512xf32> -> vector<2x512xf32>
    %252 = arith.addf %249, %251 : vector<2x512xf32>
    %253 = vector.extract_strided_slice %252 {offsets = [0, 0], sizes = [2, 128], strides = [1, 1]} : vector<2x512xf32> to vector<2x128xf32>
    %254 = arith.negf %253 : vector<2x128xf32>
    %255 = math.exp %254 : vector<2x128xf32>
    %cst_112 = arith.constant 1.000000e+00 : f32
    %256 = vector.broadcast %cst_112 : f32 to vector<2x128xf32>
    %257 = arith.addf %256, %255 : vector<2x128xf32>
    %258 = arith.divf %256, %257 : vector<2x128xf32>
    %259 = vector.extract_strided_slice %252 {offsets = [0, 128], sizes = [2, 128], strides = [1, 1]} : vector<2x512xf32> to vector<2x128xf32>
    %260 = arith.negf %259 : vector<2x128xf32>
    %261 = math.exp %260 : vector<2x128xf32>
    %cst_113 = arith.constant 1.000000e+00 : f32
    %262 = vector.broadcast %cst_113 : f32 to vector<2x128xf32>
    %263 = arith.addf %262, %261 : vector<2x128xf32>
    %264 = arith.divf %262, %263 : vector<2x128xf32>
    %265 = vector.extract_strided_slice %252 {offsets = [0, 256], sizes = [2, 128], strides = [1, 1]} : vector<2x512xf32> to vector<2x128xf32>
    %266 = math.tanh %265 : vector<2x128xf32>
    %267 = vector.extract_strided_slice %252 {offsets = [0, 384], sizes = [2, 128], strides = [1, 1]} : vector<2x512xf32> to vector<2x128xf32>
    %268 = arith.negf %267 : vector<2x128xf32>
    %269 = math.exp %268 : vector<2x128xf32>
    %cst_114 = arith.constant 1.000000e+00 : f32
    %270 = vector.broadcast %cst_114 : f32 to vector<2x128xf32>
    %271 = arith.addf %270, %269 : vector<2x128xf32>
    %272 = arith.divf %270, %271 : vector<2x128xf32>
    %c0_115 = arith.constant 0 : index
    %c0_116 = arith.constant 0 : index
    %273 = vector.load %arg11[%c0_115, %c0_116] : memref<2x128xf32, #tpu.memory_space<vmem>>, vector<2x128xf32>
    %274 = arith.mulf %264, %273 : vector<2x128xf32>
    %275 = arith.mulf %258, %266 : vector<2x128xf32>
    %276 = arith.addf %274, %275 : vector<2x128xf32>
    %277 = math.tanh %276 : vector<2x128xf32>
    %278 = arith.mulf %272, %277 : vector<2x128xf32>
    %c0_117 = arith.constant 0 : index
    %c0_118 = arith.constant 0 : index
    %279 = vector.load %arg11[%c0_117, %c0_118] : memref<2x128xf32, #tpu.memory_space<vmem>>, vector<2x128xf32>
    tpu.vector_store %arg11[%c0_117, %c0_118], %276 {strides = array<i32>} : memref<2x128xf32, #tpu.memory_space<vmem>>, vector<2x128xf32>,
    %c0_119 = arith.constant 0 : index
    %c0_120 = arith.constant 0 : index
    %280 = vector.load %arg10[%c0_119, %c0_120] : memref<2x128xf32, #tpu.memory_space<vmem>>, vector<2x128xf32>
    tpu.vector_store %arg10[%c0_119, %c0_120], %278 {strides = array<i32>} : memref<2x128xf32, #tpu.memory_space<vmem>>, vector<2x128xf32>,
    %281 = arith.index_cast %c6_i32 : i32 to index
    %c0_121 = arith.constant 0 : index
    %c0_122 = arith.constant 0 : index
    %282 = vector.load %arg8[%281, %c0_121, %c0_122] : memref<8x2x128xf32, #tpu.memory_space<vmem>>, vector<1x2x128xf32>
    %283 = vector.shape_cast %282 : vector<1x2x128xf32> to vector<2x128xf32>
    %284 = vector.shape_cast %278 : vector<2x128xf32> to vector<1x2x128xf32>
    tpu.vector_store %arg8[%281, %c0_121, %c0_122], %284 {strides = array<i32>} : memref<8x2x128xf32, #tpu.memory_space<vmem>>, vector<1x2x128xf32>,
    %c7_i32 = arith.constant 7 : i32
    %c0_123 = arith.constant 0 : index
    %c0_124 = arith.constant 0 : index
    %285 = vector.load %arg10[%c0_123, %c0_124] : memref<2x128xf32, #tpu.memory_space<vmem>>, vector<2x128xf32>
    %286 = arith.index_cast %c7_i32 : i32 to index
    %c0_125 = arith.constant 0 : index
    %c0_126 = arith.constant 0 : index
    %287 = vector.load %arg9[%286, %c0_125, %c0_126] : memref<8x2x512xf32, #tpu.memory_space<vmem>>, vector<1x2x512xf32>
    %288 = vector.shape_cast %287 : vector<1x2x512xf32> to vector<2x512xf32>
    %289 = arith.truncf %285 : vector<2x128xf32> to vector<2x128xbf16>
    %cst_127 = arith.constant dense<0.000000e+00> : vector<2x512xf32>
    %290 = tpu.matmul %289, %11, %cst_127 {dimension_numbers = #tpu.dot_dimension_numbers<[1], [0], [0], [1], [0, 0, 1, 1], [], []>} : vector<2x128xbf16>, vector<128x512xbf16>, vector<2x512xf32> -> vector<2x512xf32>
    %291 = arith.addf %288, %290 : vector<2x512xf32>
    %292 = vector.extract_strided_slice %291 {offsets = [0, 0], sizes = [2, 128], strides = [1, 1]} : vector<2x512xf32> to vector<2x128xf32>
    %293 = arith.negf %292 : vector<2x128xf32>
    %294 = math.exp %293 : vector<2x128xf32>
    %cst_128 = arith.constant 1.000000e+00 : f32
    %295 = vector.broadcast %cst_128 : f32 to vector<2x128xf32>
    %296 = arith.addf %295, %294 : vector<2x128xf32>
    %297 = arith.divf %295, %296 : vector<2x128xf32>
    %298 = vector.extract_strided_slice %291 {offsets = [0, 128], sizes = [2, 128], strides = [1, 1]} : vector<2x512xf32> to vector<2x128xf32>
    %299 = arith.negf %298 : vector<2x128xf32>
    %300 = math.exp %299 : vector<2x128xf32>
    %cst_129 = arith.constant 1.000000e+00 : f32
    %301 = vector.broadcast %cst_129 : f32 to vector<2x128xf32>
    %302 = arith.addf %301, %300 : vector<2x128xf32>
    %303 = arith.divf %301, %302 : vector<2x128xf32>
    %304 = vector.extract_strided_slice %291 {offsets = [0, 256], sizes = [2, 128], strides = [1, 1]} : vector<2x512xf32> to vector<2x128xf32>
    %305 = math.tanh %304 : vector<2x128xf32>
    %306 = vector.extract_strided_slice %291 {offsets = [0, 384], sizes = [2, 128], strides = [1, 1]} : vector<2x512xf32> to vector<2x128xf32>
    %307 = arith.negf %306 : vector<2x128xf32>
    %308 = math.exp %307 : vector<2x128xf32>
    %cst_130 = arith.constant 1.000000e+00 : f32
    %309 = vector.broadcast %cst_130 : f32 to vector<2x128xf32>
    %310 = arith.addf %309, %308 : vector<2x128xf32>
    %311 = arith.divf %309, %310 : vector<2x128xf32>
    %c0_131 = arith.constant 0 : index
    %c0_132 = arith.constant 0 : index
    %312 = vector.load %arg11[%c0_131, %c0_132] : memref<2x128xf32, #tpu.memory_space<vmem>>, vector<2x128xf32>
    %313 = arith.mulf %303, %312 : vector<2x128xf32>
    %314 = arith.mulf %297, %305 : vector<2x128xf32>
    %315 = arith.addf %313, %314 : vector<2x128xf32>
    %316 = math.tanh %315 : vector<2x128xf32>
    %317 = arith.mulf %311, %316 : vector<2x128xf32>
    %c0_133 = arith.constant 0 : index
    %c0_134 = arith.constant 0 : index
    %318 = vector.load %arg11[%c0_133, %c0_134] : memref<2x128xf32, #tpu.memory_space<vmem>>, vector<2x128xf32>
    tpu.vector_store %arg11[%c0_133, %c0_134], %315 {strides = array<i32>} : memref<2x128xf32, #tpu.memory_space<vmem>>, vector<2x128xf32>,
    %c0_135 = arith.constant 0 : index
    %c0_136 = arith.constant 0 : index
    %319 = vector.load %arg10[%c0_135, %c0_136] : memref<2x128xf32, #tpu.memory_space<vmem>>, vector<2x128xf32>
    tpu.vector_store %arg10[%c0_135, %c0_136], %317 {strides = array<i32>} : memref<2x128xf32, #tpu.memory_space<vmem>>, vector<2x128xf32>,
    %320 = arith.index_cast %c7_i32 : i32 to index
    %c0_137 = arith.constant 0 : index
    %c0_138 = arith.constant 0 : index
    %321 = vector.load %arg8[%320, %c0_137, %c0_138] : memref<8x2x128xf32, #tpu.memory_space<vmem>>, vector<1x2x128xf32>
    %322 = vector.shape_cast %321 : vector<1x2x128xf32> to vector<2x128xf32>
    %323 = vector.shape_cast %317 : vector<2x128xf32> to vector<1x2x128xf32>
    tpu.vector_store %arg8[%320, %c0_137, %c0_138], %323 {strides = array<i32>} : memref<8x2x128xf32, #tpu.memory_space<vmem>>, vector<1x2x128xf32>,
    %c8_i32 = arith.constant 8 : i32
    %c2_i32_139 = arith.constant 2 : i32
    %324 = arith.cmpi eq, %arg0, %c2_i32_139 : i32
    %325 = arith.extui %324 : i1 to i32
    %c0_i32_140 = arith.constant 0 : i32
    %326 = arith.cmpi ne, %325, %c0_i32_140 : i32
    scf.if %326 {
      %c0_141 = arith.constant 0 : index
      %c0_142 = arith.constant 0 : index
      %327 = vector.load %arg10[%c0_141, %c0_142] : memref<2x128xf32, #tpu.memory_space<vmem>>, vector<2x128xf32>
      %328 = arith.truncf %327 : vector<2x128xf32> to vector<2x128xbf16>
      %c0_143 = arith.constant 0 : index
      %c0_144 = arith.constant 0 : index
      %329 = vector.load %arg5[%c0_143, %c0_144] : memref<128x128xbf16, #tpu.memory_space<vmem>>, vector<128x128xbf16>
      %cst_145 = arith.constant dense<0.000000e+00> : vector<2x128xf32>
      %330 = tpu.matmul %328, %329, %cst_145 {dimension_numbers = #tpu.dot_dimension_numbers<[1], [0], [0], [1], [0, 0, 1, 1], [], []>} : vector<2x128xbf16>, vector<128x128xbf16>, vector<2x128xf32> -> vector<2x128xf32>
      %c0_146 = arith.constant 0 : index
      %c0_147 = arith.constant 0 : index
      %331 = vector.load %arg6[%c0_146, %c0_147] : memref<1x128xf32, #tpu.memory_space<vmem>>, vector<1x128xf32>
      %332 = vector.broadcast %331 : vector<1x128xf32> to vector<2x128xf32>
      %333 = arith.addf %330, %332 : vector<2x128xf32>
      %c0_148 = arith.constant 0 : index
      %c0_149 = arith.constant 0 : index
      %334 = vector.load %arg7[%c0_148, %c0_149] : memref<2x128xf32, #tpu.memory_space<vmem>>, vector<2x128xf32>
      tpu.vector_store %arg7[%c0_148, %c0_149], %333 {strides = array<i32>} : memref<2x128xf32, #tpu.memory_space<vmem>>, vector<2x128xf32>,
    } else {
    }
    return
  }
  func.func @transform_0(%arg0: i32) -> (i32, i32, i32) {
    %c0_i32 = arith.constant 0 : i32
    %c0_i32_0 = arith.constant 0 : i32
    %c0_i32_1 = arith.constant 0 : i32
    %c0_i32_2 = arith.constant 0 : i32
    return %c0_i32, %c0_i32_0, %c0_i32_1 : i32, i32, i32
  }
  func.func @transform_1(%arg0: i32) -> (i32, i32, i32) {
    %c0_i32 = arith.constant 0 : i32
    %c0_i32_0 = arith.constant 0 : i32
    %c0_i32_1 = arith.constant 0 : i32
    return %arg0, %c0_i32, %c0_i32_0 : i32, i32, i32
  }
  func.func @transform_2(%arg0: i32) -> (i32, i32, i32) {
    %c0_i32 = arith.constant 0 : i32
    %c0_i32_0 = arith.constant 0 : i32
    %c0_i32_1 = arith.constant 0 : i32
    return %arg0, %c0_i32, %c0_i32_0 : i32, i32, i32
  }
  func.func @transform_3(%arg0: i32) -> (i32, i32, i32) {
    %c0_i32 = arith.constant 0 : i32
    %c0_i32_0 = arith.constant 0 : i32
    %c0_i32_1 = arith.constant 0 : i32
    return %arg0, %c0_i32, %c0_i32_0 : i32, i32, i32
  }
  func.func @transform_4(%arg0: i32) -> (i32, i32) {
    %c0_i32 = arith.constant 0 : i32
    %c0_i32_0 = arith.constant 0 : i32
    %c0_i32_1 = arith.constant 0 : i32
    return %c0_i32, %c0_i32_0 : i32, i32
  }
  func.func @transform_5(%arg0: i32) -> (i32, i32) {
    %c0_i32 = arith.constant 0 : i32
    %c0_i32_0 = arith.constant 0 : i32
    %c0_i32_1 = arith.constant 0 : i32
    return %c0_i32, %c0_i32_0 : i32, i32
  }
  func.func @transform_6(%arg0: i32) -> (i32, i32) {
    %c0_i32 = arith.constant 0 : i32
    %c0_i32_0 = arith.constant 0 : i32
    %c0_i32_1 = arith.constant 0 : i32
    return %c0_i32, %c0_i32_0 : i32, i32
  }
}

</mosaic_0001>

<bundles_post_ra>
// kernel: lstm_move_predictor.1
= control target key start
LH: loop header
LB: loop body
LE: loop exit
PB: predicated region body
PF: predicated region fallthrough
CT: control target
= control target key end

     0   :  { %11 = vsyncpa [#allocation7], 0  ;;  %s6300_s0 = inlined_call_operand.vmem [shape: f32[8,2,128], index: 0, kind: input, shape index: {}]   ;;  %s6301_s1 = inlined_call_operand.hbm [shape: bf16[3,128,512], index: 1, kind: input, shape index: {}]   ;;  %s6302_s2 = inlined_call_operand.hbm [shape: bf16[3,128,512], index: 2, kind: input, shape index: {}]   ;;  %s6303_s3 = inlined_call_operand.vmem [shape: f32[3,1,512], index: 3, kind: input, shape index: {}]   ;;  %s6304_s4 = inlined_call_operand.vmem [shape: bf16[128,128], index: 4, kind: input, shape index: {}]   ;;  %s6305_s5 = inlined_call_operand.vmem [shape: f32[1,128], index: 5, kind: input, shape index: {}]   ;;  %s6306_s6 = inlined_call_operand.hbm [shape: f32[2,128], index: 6, kind: output, shape index: {}]  }
   0x1   :  { %13 = vsyncpa [#allocation7 + $0x1], 0 }
   0x2   :  { %14 = vsyncpa [#allocation10], 0 }
   0x3   :  { %16 = vsyncpa [#allocation10 + $0x1], 0 }
   0x4   :  { %17 = vsyncpa [#allocation8], 0  ;;  %s4788_s21 = smov 0   ;;  %s4790_s22 = smov 0  }
   0x5   :  { %s4792_s23 = smov 0   ;;  %s4794_s24 = smov 0  }
   0x6 LB: > { %s4807_s25 = sadd.s32 4294967295, %s4737_s24   ;;  %s4810_s26 = sadd.s32 1, %s4737_s24   ;;  %s4737_s24 = sphi %s4794_s24, %s6316_s24   ;;  %s4733_s23 = sphi %s4792_s23, %s6315_s23   ;;  %s4729_s22 = sphi %s4790_s22, %s6314_s22   ;;  %s4725_s21 = sphi %s4788_s21, %s6313_s21  }
   0x7   : > { %s48_s27 = ssub.s32 %s4737_s24, %s4810_s26  ;;  %s51_s28 = sadd.s32 1, %s4733_s23 }
   0x8   : > { %p49_p0 = scmp.eq.s32.totalorder %s48_s27, 0  ;;  %p58_p1 = scmp.ne.s32.totalorder %s4733_s23, %s4729_s22 }
   0x9   : > { %p59_p2 = scmp.eq.s32.totalorder %s4737_s24, 0  ;;  %p64_p3 = scmp.ne.s32.totalorder %s4729_s22, %s4725_s21 }
   0xa   : > { %s4820_s29 = scalar_select %p49_p0, %s4733_s23, %s51_s28  }
   0xb   : > { %p60_p4 = por %p59_p2, %p58_p1  ;;  %p65_p5 = scmp.eq.s32.totalorder %s4807_s25, 0 }
   0xc   : > { %p4256_p6 = scmp.lt.s32.totalorder %s4737_s24, 3  ;;  %s4829_s7 = sand.u32 1, %s4733_s23  }
   0xd   : > { %p4824_p7 = por %p65_p5, %p64_p3  ;;  %s4057_s8 = sshll.u32 %s4829_s7, 8 }
   0xe   : > { %s4210_s9 = sshll.u32 %s4737_s24, 12  ;;  %s216_s13 = scalar_lea.vmem [#allocation6], %s4057_s8 }
   0xf   : > { %s6308_s30 = scalar_select %p4824_p7, 1, 0 }
  0x10   : > { %s4838_s12 = scalar_lea.hbm %s6301_s1, %s4210_s9  ;;  %s223_s14 = sshll.u32 %s216_s13, 4  ;;  %s4842_s14 = int_to_ptr.vmem [resolvable:$true] %s223_s14 }
  0x11   : > { %p4844_p8 = pnand %p4256_p6, %p60_p4  ;;  %s213_s16 = scalar_lea.sflag [#allocation7], %s4829_s7 }
  0x12   : > { %s4615_s17 = scalar_lea.hbm %s4838_s12, 4096  ;;  %s4620_s20 = scalar_lea.hbm %s6301_s1, 12288 }
  0x13   : > { %p4616_p10 = scmp.ne.s32.totalorder %s4838_s12, %s4615_s17  ;;  %p4617_p11 = pneg %p4844_p8 }
  0x14   : > { %p4621_p0 = scmp.lt.s32.totalorder %s4838_s12, %s6301_s1  ;;  %p4622_p1 = scmp.lt.s32.totalorder %s4620_s20, %s4615_s17 }
  0x15   : > { %p4618_p12 = pnand %p4617_p11, %p4616_p10 }
  0x16   : > { %p4623_p2 = por %p4622_p1, %p4621_p0 }
  0x17   : > { %p4619_p13 = pneg %p4618_p12 }
  0x19   : > { %p4624_p3 = pnand %p4623_p2, %p4619_p13 }
  0x1b   : > { %4627 = shalt.err (!%p4624_p3)
}
  0x1c   : > { %s4628_s28 = scalar_lea.vmem %s4842_s14, 4096  ;;  %s4739_s10 = smov [#allocation6]  }
  0x1d   : > { %p4629_p4 = scmp.ne.s32.totalorder %s4842_s14, %s4628_s28  ;;  %s4633_s11 = sshll.u32 %s4739_s10, 4  ;;  %s4634_s11 = int_to_ptr.vmem [resolvable:$false] %s4633_s11 }
  0x1e   : > { %s4635_s13 = scalar_lea.vmem %s4634_s11, 8192  ;;  %p4636_p10 = scmp.lt.s32.totalorder %s4842_s14, %s4634_s11 }
  0x1f   : > { %p4631_p5 = pnand %p4629_p4, %p4617_p11  ;;  %p4637_p12 = scmp.lt.s32.totalorder %s4635_s13, %s4628_s28 }
  0x21   : > { %p4632_p6 = pneg %p4631_p5  ;;  %p4638_p9 = por %p4637_p12, %p4636_p10 }
  0x23   : > { %p4639_p0 = pnand %p4638_p9, %p4632_p6 }
  0x25   : > { %4642 = shalt.err (!%p4639_p0)
}
  0x26   : > { %s4740_s17 = smov 256   ;;  %s4741_s18 = smov 16  }
  0x27   : > { %4252 = dma.hbm_to_vmem [thread:$0]  (!%p4844_p8), %s4838_s12, 4096, %s4842_s14, %s213_s16, %s4740_s17, %s4740_s17, %s4741_s18  }
  0x28   : > { %p259_p9 = scmp.lt.s32.totalorder %s4737_s24, 4  ;;  %s4885_s21 = scalar_lea.hbm %s6302_s2, %s4210_s9 }
  0x29   : > { %p6310_p13 = scmp.ge.s32.totalorder %s4737_s24, 1  ;;  %s237_s28 = scalar_lea.vmem [#allocation9], %s4057_s8 }
  0x2a   : > { %s244_s10 = sshll.u32 %s237_s28, 4  ;;  %s234_s12 = scalar_lea.sflag [#allocation10], %s4829_s7  ;;  %s4895_s10 = int_to_ptr.vmem [resolvable:$true] %s244_s10 }
  0x2b   : > { %p4889_p1 = pnand %p6310_p13, %p259_p9  ;;  %s4643_s14 = scalar_lea.hbm %s4885_s21, 4096 }
  0x2c   : > { %p4644_p2 = scmp.ne.s32.totalorder %s4885_s21, %s4643_s14  ;;  %s4648_s16 = scalar_lea.hbm %s6302_s2, 12288 }
  0x2d   : > { %p4649_p5 = scmp.lt.s32.totalorder %s4885_s21, %s6302_s2  ;;  %p4650_p6 = scmp.lt.s32.totalorder %s4648_s16, %s4643_s14 }
  0x2e   : > { %p4646_p3 = pnand %p4644_p2, %p4617_p11 }
  0x2f   : > { %p4651_p10 = por %p4650_p6, %p4649_p5 }
  0x30   : > { %p4647_p4 = pneg %p4646_p3 }
  0x32   : > { %p4652_p12 = pnand %p4651_p10, %p4647_p4 }
  0x34   : > { %4655 = shalt.err (!%p4652_p12)
}
  0x35   : > { %s4656_s7 = scalar_lea.vmem %s4895_s10, 4096  ;;  %s4742_s8 = smov [#allocation9]  }
  0x36   : > { %p4657_p0 = scmp.ne.s32.totalorder %s4895_s10, %s4656_s7  ;;  %s4661_s19 = sshll.u32 %s4742_s8, 4  ;;  %s4662_s19 = int_to_ptr.vmem [resolvable:$false] %s4661_s19 }
  0x37   : > { %s4663_s20 = scalar_lea.vmem %s4662_s19, 8192  ;;  %p4664_p2 = scmp.lt.s32.totalorder %s4895_s10, %s4662_s19 }
  0x38   : > { %p4659_p9 = pnand %p4657_p0, %p4617_p11  ;;  %p4665_p3 = scmp.lt.s32.totalorder %s4663_s20, %s4656_s7 }
  0x3a   : > { %p4660_p13 = pneg %p4659_p9  ;;  %p4666_p7 = por %p4665_p3, %p4664_p2 }
  0x3c   : > { %p4667_p5 = pnand %p4666_p7, %p4660_p13 }
  0x3e   : > { %4670 = shalt.err (!%p4667_p5)
}
  0x3f   : > { %4255 = dma.hbm_to_vmem [thread:$0]  (!%p4844_p8), %s4885_s21, 4096, %s4895_s10, %s234_s12, %s4740_s17, %s4740_s17, %s4741_s18  }
  0x40   : > { %263 = sbr.rel (%p4889_p1) target bundleno = 3419 (0xd5b), region = 44  ;;  %s265_s28 = sand.u32 (!%p4889_p1), 1, %s4729_s22  }
  0x41   : > { %s4064_s14 = sshll.u32 (!%p4889_p1), %s265_s28, 8  ;;  %s266_s24 = scalar_lea.sflag (!%p4889_p1), [#allocation7], %s265_s28 }
  0x42   : > { %s4926_s9 = scalar_lea.vmem (!%p4889_p1), [#allocation6], %s4064_s14  ;;  %p6312_p7 = scmp.ne.s32.totalorder (!%p4889_p1), %s6308_s30, 0 }
  0x45   : > { %4712 = dma.done.wait (%p6312_p7), %s266_s24, 4096  }
  0x46   : > { %4714 = vsyncadd (%p6312_p7), %s266_s24, 4294963200  ;;  %s275_s15 = scalar_lea.sflag [#allocation10], %s265_s28  ;;  %s4932_s16 = scalar_lea.vmem [#allocation9], %s4064_s14 }
  0x47   : > { %4716 = dma.done.wait (%p6312_p7), %s275_s15, 4096  }
  0x48   : > { %4718 = vsyncadd (%p6312_p7), %s275_s15, 4294963200  ;;  %p311_p8 = scmp.lt.s32.totalorder %s4807_s25, 2  ;;  %p4067_p11 = scmp.ne.s32.totalorder %s4807_s25, 0 }
  0x4a   : > { %s312_s17 = scalar_select %p311_p8, %s4807_s25, 2 }
  0x4b   : > { %319 = sbr.rel (%p4067_p11) target bundleno = 542 (0x21e), region = 56 }
  0x4c   : > { %s4066_s18 = sshll.u32 %s312_s17, 2 }
  0x4d   : > { %s4943_s10 = scalar_lea.vmem %s6303_s3, %s4066_s18 }
  0x50   : > { %v4947_v0 = vld [vmem:[%s4926_s9 + $0xe4] ss:$16 sps:$4 sm:$0xff]   ;;  %v4950_v1 = vld [vmem:[%s4926_s9 + $0xec] ss:$16 sps:$4 sm:$0xff]   ;;  %v4743_v2 = vmov 0   ;;  %v356_v45 = vlaneseq }
  0x51   : > { %568 = vmatprep.mubr.bf16.mxu0 %v4743_v2  ;;  %609 = vmatprep.mubr.bf16.mxu1 %v4743_v2  ;;  %v4956_v3 = vld [vmem:[%s4926_s9 + $0xe0] ss:$16 sps:$4 sm:$0xff]   ;;  %v4959_v4 = vld [vmem:[%s4926_s9 + $0xe8] ss:$16 sps:$4 sm:$0xff]   ;;  %v4963_v5 = vld [vmem:[%s4926_s9 + $0xc4] ss:$16 sps:$4 sm:$0xff]  }
  0x52   : > { %536 = vmatprep.subr.bf16.mxu0 %v4947_v0  ;;  %577 = vmatprep.subr.bf16.mxu1 %v4950_v1  ;;  %v4968_v6 = vld [vmem:[%s4926_s9 + $0xcc] ss:$16 sps:$4 sm:$0xff]   ;;  %v4971_v7 = vld [vmem:[%s4926_s9 + $0xc0] ss:$16 sps:$4 sm:$0xff]   ;;  %v4975_v8 = vld [vmem:[%s4926_s9 + $0xc8] ss:$16 sps:$4 sm:$0xff]  }
  0x53   : > { %537 = vmatpush1.bf16.msra.mxu0 %v4956_v3  ;;  %578 = vmatpush1.bf16.msra.mxu1 %v4959_v4  ;;  %v4979_v9 = vld [vmem:[%s4926_s9 + $0xa4] ss:$16 sps:$4 sm:$0xff]   ;;  %v4982_v10 = vld [vmem:[%s4926_s9 + $0xac] ss:$16 sps:$4 sm:$0xff]   ;;  %v4985_v11 = vld [vmem:[%s4926_s9 + $0xa0] ss:$16 sps:$4 sm:$0xff]  }
  0x54   : > { %538 = vmatprep.subr.bf16.mxu0 %v4963_v5  ;;  %579 = vmatprep.subr.bf16.mxu1 %v4968_v6  ;;  %v4988_v12 = vld [vmem:[%s4926_s9 + $0xa8] ss:$16 sps:$4 sm:$0xff]   ;;  %v4993_v13 = vld [vmem:[%s4926_s9 + $0x84] ss:$16 sps:$4 sm:$0xff]   ;;  %v4998_v14 = vld [vmem:[%s4926_s9 + $0x8c] ss:$16 sps:$4 sm:$0xff]  }
  0x55   : > { %v5001_v15 = vld [vmem:[%s4926_s9 + $0x80] ss:$16 sps:$4 sm:$0xff]   ;;  %v5006_v16 = vld [vmem:[%s4926_s9 + $0x88] ss:$16 sps:$4 sm:$0xff]   ;;  %v5009_v17 = vld [vmem:[%s4926_s9 + $0x64] ss:$16 sps:$4 sm:$0xff]  }
  0x56   : > { %v5014_v18 = vld [vmem:[%s4926_s9 + $0x6c] ss:$16 sps:$4 sm:$0xff]   ;;  %v5017_v19 = vld [vmem:[%s4926_s9 + $0x60] ss:$16 sps:$4 sm:$0xff]   ;;  %v5020_v20 = vld [vmem:[%s4926_s9 + $0x68] ss:$16 sps:$4 sm:$0xff]  }
  0x57   : > { %539 = vmatpush1.bf16.msra.mxu0 %v4971_v7  ;;  %580 = vmatpush1.bf16.msra.mxu1 %v4975_v8  ;;  %v5025_v21 = vld [vmem:[%s4926_s9 + $0x44] ss:$16 sps:$4 sm:$0xff]   ;;  %v5030_v22 = vld [vmem:[%s4926_s9 + $0x4c] ss:$16 sps:$4 sm:$0xff]   ;;  %v5035_v23 = vld [vmem:[%s4926_s9 + $0x40] ss:$16 sps:$4 sm:$0xff]  }
  0x58   : > { %540 = vmatprep.subr.bf16.mxu0 %v4979_v9  ;;  %581 = vmatprep.subr.bf16.mxu1 %v4982_v10  ;;  %v5038_v24 = vld [vmem:[%s4926_s9 + $0x48] ss:$16 sps:$4 sm:$0xff]   ;;  %v5043_v25 = vld [vmem:[%s4926_s9 + $0x24] ss:$16 sps:$4 sm:$0xff]   ;;  %v5046_v26 = vld [vmem:[%s4926_s9 + $0x2c] ss:$16 sps:$4 sm:$0xff]  }
  0x59   : > { %v5051_v27 = vld [vmem:[%s4926_s9 + $0x20] ss:$16 sps:$4 sm:$0xff]   ;;  %v5054_v28 = vld [vmem:[%s4926_s9 + $0x28] ss:$16 sps:$4 sm:$0xff]   ;;  %v5059_v29 = vld [vmem:[%s4926_s9 + $0x4] ss:$16 sps:$4 sm:$0xff]  }
  0x5a   : > { %v5062_v30 = vld [vmem:[%s4926_s9 + $0xc] ss:$16 sps:$4 sm:$0xff]   ;;  %v5067_v31 = vld [vmem:[%s4926_s9] ss:$16 sps:$4 sm:$0xff]   ;;  %v5070_v32 = vld [vmem:[%s4926_s9 + $0x8] ss:$16 sps:$4 sm:$0xff]  }
  0x5b   : > { %541 = vmatpush1.bf16.msra.mxu0 %v4985_v11  ;;  %582 = vmatpush1.bf16.msra.mxu1 %v4988_v12  ;;  %v353_v33 = vld [vmem:[%s6300_s0] sm:$0x3]  ;;  %v4100_v35 = vld [vmem:[%s6300_s0 + $0x2] sm:$0x3]  ;;  %v4101_v37 = vld [vmem:[%s6300_s0 + $0x4] sm:$0x3] }
  0x5c   : > { %542 = vmatprep.subr.bf16.mxu0 %v4993_v13  ;;  %583 = vmatprep.subr.bf16.mxu1 %v4998_v14  ;;  %v354_v34 = vpack.c.bf16 %v353_v33, %v353_v33  ;;  %v643_v36 = vpack.c.bf16 %v4100_v35, %v4100_v35  ;;  %v752_v38 = vpack.c.bf16 %v4101_v37, %v4101_v37  ;;  %v4102_v39 = vld [vmem:[%s6300_s0 + $0x6] sm:$0x3]  ;;  %v4103_v41 = vld [vmem:[%s6300_s0 + $0x8] sm:$0x3]  ;;  %v4104_v43 = vld [vmem:[%s6300_s0 + $0xa] sm:$0x3] }
  0x5d   : > { %v861_v40 = vpack.c.bf16 %v4102_v39, %v4102_v39  ;;  %v970_v42 = vpack.c.bf16 %v4103_v41, %v4103_v41  ;;  %v1079_v44 = vpack.c.bf16 %v4104_v43, %v4104_v43  ;;  %v357_v46 = vshrl.u32 %v356_v45, 7  ;;  %v4105_v49 = vld [vmem:[%s6300_s0 + $0xc] sm:$0x3]  ;;  %v352_v50 = vld [vmem:[%s4943_s10] sm:$0xf] }
  0x5e   : > { %v4744_v52 = vmov 1983009808   ;;  %v1188_v55 = vpack.c.bf16 %v4105_v49, %v4105_v49 }
  0x5f   : > { %543 = vmatpush1.bf16.msra.mxu0 %v5001_v15  ;;  %584 = vmatpush1.bf16.msra.mxu1 %v5006_v16  ;;  %v358_v47 = vsub.s32 0, %v357_v46  ;;  %v366_v48 = vsub.s32 2, %v357_v46  ;;  %v362_v51 = vsub.s32 1, %v357_v46  ;;  %v625_v53 = vunpack.c.l.s4 %v4744_v52 }
  0x60   : > { %544 = vmatprep.subr.bf16.mxu0 %v5009_v17  ;;  %585 = vmatprep.subr.bf16.mxu1 %v5014_v18  ;;  %v370_v54 = vsub.s32 3, %v357_v46 }
  0x61   : > { %v5302_v56 = vrot.slane %v352_v50, %v358_v47  ;;  %v5304_v57 = vrot.slane %v352_v50, %v366_v48  ;;  %v5308_v58 = vrot.slane %v352_v50, %v362_v51  ;;  %v626_v59 = vunpack.c.0.s8 %v625_v53 }
  0x62   : > { %v5310_v60 = vrot.slane %v352_v50, %v370_v54 }
  0x63   : > { %545 = vmatpush1.bf16.msra.mxu0 %v5017_v19  ;;  %586 = vmatpush1.bf16.msra.mxu1 %v5020_v20  ;;  %v5319_v35 = vsub.s32 %v626_v59, %v357_v46 }
  0x64   : > { %546 = vmatprep.subr.bf16.mxu0 %v5025_v21  ;;  %587 = vmatprep.subr.bf16.mxu1 %v5030_v22 }
  0x67   : > { %547 = vmatpush1.bf16.msra.mxu0 %v5035_v23  ;;  %588 = vmatpush1.bf16.msra.mxu1 %v5038_v24 }
  0x68   : > { %548 = vmatprep.subr.bf16.mxu0 %v5043_v25  ;;  %589 = vmatprep.subr.bf16.mxu1 %v5046_v26 }
  0x6b   : > { %549 = vmatpush1.bf16.msra.mxu0 %v5051_v27  ;;  %590 = vmatpush1.bf16.msra.mxu1 %v5054_v28 }
  0x6c   : > { %550 = vmatprep.subr.bf16.mxu0 %v5059_v29  ;;  %591 = vmatprep.subr.bf16.mxu1 %v5062_v30 }
  0x6f   : > { %551 = vmatpush1.bf16.msra.mxu0 %v5067_v31  ;;  %592 = vmatpush1.bf16.msra.mxu1 %v5070_v32 }
  0x70   : > { %644 = vmatprep.subr.bf16.mxu0 %v4947_v0  ;;  %685 = vmatprep.subr.bf16.mxu1 %v4950_v1 }
  0x72   : > { %569 = vmatmul.mubr.bf16.vlgmr.msra.gmra.mxu0 %v354_v34  ;;  %610 = vmatmul.mubr.bf16.vlgmr.msra.gmra.mxu1 %v354_v34 }
  0x73   : > { %645 = vmatpush1.bf16.msra.mxu0 %v4956_v3  ;;  %686 = vmatpush1.bf16.msra.mxu1 %v4959_v4 }
  0x74   : > { %646 = vmatprep.subr.bf16.mxu0 %v4963_v5  ;;  %687 = vmatprep.subr.bf16.mxu1 %v4968_v6 }
  0x75   : > { %676 = vmatprep.mubr.bf16.mxu0 %v4743_v2  ;;  %717 = vmatprep.mubr.bf16.mxu1 %v4743_v2 }
  0x77   : > { %647 = vmatpush1.bf16.msra.mxu0 %v4971_v7  ;;  %688 = vmatpush1.bf16.msra.mxu1 %v4975_v8 }
  0x78   : > { %648 = vmatprep.subr.bf16.mxu0 %v4979_v9  ;;  %689 = vmatprep.subr.bf16.mxu1 %v4982_v10 }
  0x7b   : > { %649 = vmatpush1.bf16.msra.mxu0 %v4985_v11  ;;  %690 = vmatpush1.bf16.msra.mxu1 %v4988_v12 }
  0x7c   : > { %650 = vmatprep.subr.bf16.mxu0 %v4993_v13  ;;  %691 = vmatprep.subr.bf16.mxu1 %v4998_v14 }
  0x7f   : > { %651 = vmatpush1.bf16.msra.mxu0 %v5001_v15  ;;  %692 = vmatpush1.bf16.msra.mxu1 %v5006_v16 }
  0x80   : > { %652 = vmatprep.subr.bf16.mxu0 %v5009_v17  ;;  %693 = vmatprep.subr.bf16.mxu1 %v5014_v18 }
  0x83   : > { %653 = vmatpush1.bf16.msra.mxu0 %v5017_v19  ;;  %694 = vmatpush1.bf16.msra.mxu1 %v5020_v20 }
  0x84   : > { %654 = vmatprep.subr.bf16.mxu0 %v5025_v21  ;;  %695 = vmatprep.subr.bf16.mxu1 %v5030_v22 }
  0x87   : > { %655 = vmatpush1.bf16.msra.mxu0 %v5035_v23  ;;  %696 = vmatpush1.bf16.msra.mxu1 %v5038_v24 }
  0x88   : > { %656 = vmatprep.subr.bf16.mxu0 %v5043_v25  ;;  %697 = vmatprep.subr.bf16.mxu1 %v5046_v26 }
  0x8b   : > { %657 = vmatpush1.bf16.msra.mxu0 %v5051_v27  ;;  %698 = vmatpush1.bf16.msra.mxu1 %v5054_v28 }
  0x8c   : > { %658 = vmatprep.subr.bf16.mxu0 %v5059_v29  ;;  %699 = vmatprep.subr.bf16.mxu1 %v5062_v30 }
  0x8f   : > { %659 = vmatpush1.bf16.msra.mxu0 %v5067_v31  ;;  %700 = vmatpush1.bf16.msra.mxu1 %v5070_v32 }
  0x90   : > { %753 = vmatprep.subr.bf16.mxu0 %v4947_v0  ;;  %794 = vmatprep.subr.bf16.mxu1 %v4950_v1 }
  0x92   : > { %677 = vmatmul.mubr.bf16.vlgmr.msra.gmra.mxu0 %v643_v36  ;;  %718 = vmatmul.mubr.bf16.vlgmr.msra.gmra.mxu1 %v643_v36 }
  0x93   : > { %754 = vmatpush1.bf16.msra.mxu0 %v4956_v3  ;;  %795 = vmatpush1.bf16.msra.mxu1 %v4959_v4 }
  0x94   : > { %755 = vmatprep.subr.bf16.mxu0 %v4963_v5  ;;  %796 = vmatprep.subr.bf16.mxu1 %v4968_v6 }
  0x95   : > { %785 = vmatprep.mubr.bf16.mxu0 %v4743_v2  ;;  %826 = vmatprep.mubr.bf16.mxu1 %v4743_v2 }
  0x97   : > { %756 = vmatpush1.bf16.msra.mxu0 %v4971_v7  ;;  %797 = vmatpush1.bf16.msra.mxu1 %v4975_v8 }
  0x98   : > { %757 = vmatprep.subr.bf16.mxu0 %v4979_v9  ;;  %798 = vmatprep.subr.bf16.mxu1 %v4982_v10 }
  0x9b   : > { %758 = vmatpush1.bf16.msra.mxu0 %v4985_v11  ;;  %799 = vmatpush1.bf16.msra.mxu1 %v4988_v12 }
  0x9c   : > { %759 = vmatprep.subr.bf16.mxu0 %v4993_v13  ;;  %800 = vmatprep.subr.bf16.mxu1 %v4998_v14 }
  0x9f   : > { %760 = vmatpush1.bf16.msra.mxu0 %v5001_v15  ;;  %801 = vmatpush1.bf16.msra.mxu1 %v5006_v16 }
  0xa0   : > { %761 = vmatprep.subr.bf16.mxu0 %v5009_v17  ;;  %802 = vmatprep.subr.bf16.mxu1 %v5014_v18 }
  0xa3   : > { %762 = vmatpush1.bf16.msra.mxu0 %v5017_v19  ;;  %803 = vmatpush1.bf16.msra.mxu1 %v5020_v20 }
  0xa4   : > { %763 = vmatprep.subr.bf16.mxu0 %v5025_v21  ;;  %804 = vmatprep.subr.bf16.mxu1 %v5030_v22 }
  0xa7   : > { %764 = vmatpush1.bf16.msra.mxu0 %v5035_v23  ;;  %805 = vmatpush1.bf16.msra.mxu1 %v5038_v24 }
  0xa8   : > { %765 = vmatprep.subr.bf16.mxu0 %v5043_v25  ;;  %806 = vmatprep.subr.bf16.mxu1 %v5046_v26 }
  0xab   : > { %766 = vmatpush1.bf16.msra.mxu0 %v5051_v27  ;;  %807 = vmatpush1.bf16.msra.mxu1 %v5054_v28 }
  0xac   : > { %767 = vmatprep.subr.bf16.mxu0 %v5059_v29  ;;  %808 = vmatprep.subr.bf16.mxu1 %v5062_v30 }
  0xaf   : > { %768 = vmatpush1.bf16.msra.mxu0 %v5067_v31  ;;  %809 = vmatpush1.bf16.msra.mxu1 %v5070_v32 }
  0xb0   : > { %862 = vmatprep.subr.bf16.mxu0 %v4947_v0  ;;  %903 = vmatprep.subr.bf16.mxu1 %v4950_v1 }
  0xb2   : > { %786 = vmatmul.mubr.bf16.vlgmr.msra.gmra.mxu0 %v752_v38  ;;  %827 = vmatmul.mubr.bf16.vlgmr.msra.gmra.mxu1 %v752_v38 }
  0xb3   : > { %863 = vmatpush1.bf16.msra.mxu0 %v4956_v3  ;;  %904 = vmatpush1.bf16.msra.mxu1 %v4959_v4 }
  0xb4   : > { %864 = vmatprep.subr.bf16.mxu0 %v4963_v5  ;;  %905 = vmatprep.subr.bf16.mxu1 %v4968_v6 }
  0xb5   : > { %894 = vmatprep.mubr.bf16.mxu0 %v4743_v2  ;;  %935 = vmatprep.mubr.bf16.mxu1 %v4743_v2 }
  0xb7   : > { %865 = vmatpush1.bf16.msra.mxu0 %v4971_v7  ;;  %906 = vmatpush1.bf16.msra.mxu1 %v4975_v8 }
  0xb8   : > { %866 = vmatprep.subr.bf16.mxu0 %v4979_v9  ;;  %907 = vmatprep.subr.bf16.mxu1 %v4982_v10 }
  0xbb   : > { %867 = vmatpush1.bf16.msra.mxu0 %v4985_v11  ;;  %908 = vmatpush1.bf16.msra.mxu1 %v4988_v12 }
  0xbc   : > { %868 = vmatprep.subr.bf16.mxu0 %v4993_v13  ;;  %909 = vmatprep.subr.bf16.mxu1 %v4998_v14 }
  0xbf   : > { %869 = vmatpush1.bf16.msra.mxu0 %v5001_v15  ;;  %910 = vmatpush1.bf16.msra.mxu1 %v5006_v16 }
  0xc0   : > { %870 = vmatprep.subr.bf16.mxu0 %v5009_v17  ;;  %911 = vmatprep.subr.bf16.mxu1 %v5014_v18 }
  0xc3   : > { %871 = vmatpush1.bf16.msra.mxu0 %v5017_v19  ;;  %912 = vmatpush1.bf16.msra.mxu1 %v5020_v20 }
  0xc4   : > { %872 = vmatprep.subr.bf16.mxu0 %v5025_v21  ;;  %913 = vmatprep.subr.bf16.mxu1 %v5030_v22 }
  0xc7   : > { %873 = vmatpush1.bf16.msra.mxu0 %v5035_v23  ;;  %914 = vmatpush1.bf16.msra.mxu1 %v5038_v24 }
  0xc8   : > { %874 = vmatprep.subr.bf16.mxu0 %v5043_v25  ;;  %915 = vmatprep.subr.bf16.mxu1 %v5046_v26 }
  0xcb   : > { %875 = vmatpush1.bf16.msra.mxu0 %v5051_v27  ;;  %916 = vmatpush1.bf16.msra.mxu1 %v5054_v28 }
  0xcc   : > { %876 = vmatprep.subr.bf16.mxu0 %v5059_v29  ;;  %917 = vmatprep.subr.bf16.mxu1 %v5062_v30 }
  0xcf   : > { %877 = vmatpush1.bf16.msra.mxu0 %v5067_v31  ;;  %918 = vmatpush1.bf16.msra.mxu1 %v5070_v32 }
  0xd0   : > { %971 = vmatprep.subr.bf16.mxu0 %v4947_v0  ;;  %1012 = vmatprep.subr.bf16.mxu1 %v4950_v1 }
  0xd2   : > { %895 = vmatmul.mubr.bf16.vlgmr.msra.gmra.mxu0 %v861_v40  ;;  %936 = vmatmul.mubr.bf16.vlgmr.msra.gmra.mxu1 %v861_v40 }
  0xd3   : > { %972 = vmatpush1.bf16.msra.mxu0 %v4956_v3  ;;  %1013 = vmatpush1.bf16.msra.mxu1 %v4959_v4 }
  0xd4   : > { %973 = vmatprep.subr.bf16.mxu0 %v4963_v5  ;;  %1014 = vmatprep.subr.bf16.mxu1 %v4968_v6 }
  0xd5   : > { %1003 = vmatprep.mubr.bf16.mxu0 %v4743_v2  ;;  %1044 = vmatprep.mubr.bf16.mxu1 %v4743_v2 }
  0xd7   : > { %974 = vmatpush1.bf16.msra.mxu0 %v4971_v7  ;;  %1015 = vmatpush1.bf16.msra.mxu1 %v4975_v8 }
  0xd8   : > { %975 = vmatprep.subr.bf16.mxu0 %v4979_v9  ;;  %1016 = vmatprep.subr.bf16.mxu1 %v4982_v10 }
  0xdb   : > { %976 = vmatpush1.bf16.msra.mxu0 %v4985_v11  ;;  %1017 = vmatpush1.bf16.msra.mxu1 %v4988_v12 }
  0xdc   : > { %977 = vmatprep.subr.bf16.mxu0 %v4993_v13  ;;  %1018 = vmatprep.subr.bf16.mxu1 %v4998_v14 }
  0xdf   : > { %978 = vmatpush1.bf16.msra.mxu0 %v5001_v15  ;;  %1019 = vmatpush1.bf16.msra.mxu1 %v5006_v16 }
  0xe0   : > { %979 = vmatprep.subr.bf16.mxu0 %v5009_v17  ;;  %1020 = vmatprep.subr.bf16.mxu1 %v5014_v18 }
  0xe3   : > { %980 = vmatpush1.bf16.msra.mxu0 %v5017_v19  ;;  %1021 = vmatpush1.bf16.msra.mxu1 %v5020_v20 }
  0xe4   : > { %981 = vmatprep.subr.bf16.mxu0 %v5025_v21  ;;  %1022 = vmatprep.subr.bf16.mxu1 %v5030_v22 }
  0xe7   : > { %982 = vmatpush1.bf16.msra.mxu0 %v5035_v23  ;;  %1023 = vmatpush1.bf16.msra.mxu1 %v5038_v24 }
  0xe8   : > { %983 = vmatprep.subr.bf16.mxu0 %v5043_v25  ;;  %1024 = vmatprep.subr.bf16.mxu1 %v5046_v26 }
  0xeb   : > { %984 = vmatpush1.bf16.msra.mxu0 %v5051_v27  ;;  %1025 = vmatpush1.bf16.msra.mxu1 %v5054_v28 }
  0xec   : > { %985 = vmatprep.subr.bf16.mxu0 %v5059_v29  ;;  %1026 = vmatprep.subr.bf16.mxu1 %v5062_v30 }
  0xef   : > { %986 = vmatpush1.bf16.msra.mxu0 %v5067_v31  ;;  %1027 = vmatpush1.bf16.msra.mxu1 %v5070_v32 }
  0xf0   : > { %1080 = vmatprep.subr.bf16.mxu0 %v4947_v0  ;;  %1121 = vmatprep.subr.bf16.mxu1 %v4950_v1 }
  0xf2   : > { %1004 = vmatmul.mubr.bf16.vlgmr.msra.gmra.mxu0 %v970_v42  ;;  %1045 = vmatmul.mubr.bf16.vlgmr.msra.gmra.mxu1 %v970_v42 }
  0xf3   : > { %1081 = vmatpush1.bf16.msra.mxu0 %v4956_v3  ;;  %1122 = vmatpush1.bf16.msra.mxu1 %v4959_v4 }
  0xf4   : > { %1082 = vmatprep.subr.bf16.mxu0 %v4963_v5  ;;  %1123 = vmatprep.subr.bf16.mxu1 %v4968_v6 }
  0xf5   : > { %1112 = vmatprep.mubr.bf16.mxu0 %v4743_v2  ;;  %1153 = vmatprep.mubr.bf16.mxu1 %v4743_v2 }
  0xf7   : > { %1083 = vmatpush1.bf16.msra.mxu0 %v4971_v7  ;;  %1124 = vmatpush1.bf16.msra.mxu1 %v4975_v8 }
  0xf8   : > { %1084 = vmatprep.subr.bf16.mxu0 %v4979_v9  ;;  %1125 = vmatprep.subr.bf16.mxu1 %v4982_v10 }
  0xfb   : > { %1085 = vmatpush1.bf16.msra.mxu0 %v4985_v11  ;;  %1126 = vmatpush1.bf16.msra.mxu1 %v4988_v12 }
  0xfc   : > { %1086 = vmatprep.subr.bf16.mxu0 %v4993_v13  ;;  %1127 = vmatprep.subr.bf16.mxu1 %v4998_v14 }
  0xff   : > { %1087 = vmatpush1.bf16.msra.mxu0 %v5001_v15  ;;  %1128 = vmatpush1.bf16.msra.mxu1 %v5006_v16 }
 0x100   : > { %1088 = vmatprep.subr.bf16.mxu0 %v5009_v17  ;;  %1129 = vmatprep.subr.bf16.mxu1 %v5014_v18 }
 0x103   : > { %1089 = vmatpush1.bf16.msra.mxu0 %v5017_v19  ;;  %1130 = vmatpush1.bf16.msra.mxu1 %v5020_v20 }
 0x104   : > { %1090 = vmatprep.subr.bf16.mxu0 %v5025_v21  ;;  %1131 = vmatprep.subr.bf16.mxu1 %v5030_v22 }
 0x107   : > { %1091 = vmatpush1.bf16.msra.mxu0 %v5035_v23  ;;  %1132 = vmatpush1.bf16.msra.mxu1 %v5038_v24 }
 0x108   : > { %1092 = vmatprep.subr.bf16.mxu0 %v5043_v25  ;;  %1133 = vmatprep.subr.bf16.mxu1 %v5046_v26 }
 0x10b   : > { %1093 = vmatpush1.bf16.msra.mxu0 %v5051_v27  ;;  %1134 = vmatpush1.bf16.msra.mxu1 %v5054_v28 }
 0x10c   : > { %1094 = vmatprep.subr.bf16.mxu0 %v5059_v29  ;;  %1135 = vmatprep.subr.bf16.mxu1 %v5062_v30 }
 0x10f   : > { %1095 = vmatpush1.bf16.msra.mxu0 %v5067_v31  ;;  %1136 = vmatpush1.bf16.msra.mxu1 %v5070_v32 }
 0x110   : > { %1189 = vmatprep.subr.bf16.mxu0 %v4947_v0  ;;  %1230 = vmatprep.subr.bf16.mxu1 %v4950_v1 }
 0x112   : > { %1113 = vmatmul.mubr.bf16.vlgmr.msra.gmra.mxu0 %v1079_v44  ;;  %1154 = vmatmul.mubr.bf16.vlgmr.msra.gmra.mxu1 %v1079_v44 }
 0x113   : > { %1190 = vmatpush1.bf16.msra.mxu0 %v4956_v3  ;;  %1231 = vmatpush1.bf16.msra.mxu1 %v4959_v4 }
 0x114   : > { %1191 = vmatprep.subr.bf16.mxu0 %v4963_v5  ;;  %1232 = vmatprep.subr.bf16.mxu1 %v4968_v6 }
 0x115   : > { %1221 = vmatprep.mubr.bf16.mxu0 %v4743_v2  ;;  %1262 = vmatprep.mubr.bf16.mxu1 %v4743_v2 }
 0x117   : > { %1192 = vmatpush1.bf16.msra.mxu0 %v4971_v7  ;;  %1233 = vmatpush1.bf16.msra.mxu1 %v4975_v8 }
 0x118   : > { %1193 = vmatprep.subr.bf16.mxu0 %v4979_v9  ;;  %1234 = vmatprep.subr.bf16.mxu1 %v4982_v10 }
 0x11b   : > { %1194 = vmatpush1.bf16.msra.mxu0 %v4985_v11  ;;  %1235 = vmatpush1.bf16.msra.mxu1 %v4988_v12 }
 0x11c   : > { %1195 = vmatprep.subr.bf16.mxu0 %v4993_v13  ;;  %1236 = vmatprep.subr.bf16.mxu1 %v4998_v14 }
 0x11f   : > { %1196 = vmatpush1.bf16.msra.mxu0 %v5001_v15  ;;  %1237 = vmatpush1.bf16.msra.mxu1 %v5006_v16 }
 0x120   : > { %1197 = vmatprep.subr.bf16.mxu0 %v5009_v17  ;;  %1238 = vmatprep.subr.bf16.mxu1 %v5014_v18 }
 0x123   : > { %1198 = vmatpush1.bf16.msra.mxu0 %v5017_v19  ;;  %1239 = vmatpush1.bf16.msra.mxu1 %v5020_v20 }
 0x124   : > { %1199 = vmatprep.subr.bf16.mxu0 %v5025_v21  ;;  %1240 = vmatprep.subr.bf16.mxu1 %v5030_v22 }
 0x127   : > { %1200 = vmatpush1.bf16.msra.mxu0 %v5035_v23  ;;  %1241 = vmatpush1.bf16.msra.mxu1 %v5038_v24 }
 0x128   : > { %1201 = vmatprep.subr.bf16.mxu0 %v5043_v25  ;;  %1242 = vmatprep.subr.bf16.mxu1 %v5046_v26 }
 0x12b   : > { %1202 = vmatpush1.bf16.msra.mxu0 %v5051_v27  ;;  %1243 = vmatpush1.bf16.msra.mxu1 %v5054_v28 }
 0x12c   : > { %1203 = vmatprep.subr.bf16.mxu0 %v5059_v29  ;;  %1244 = vmatprep.subr.bf16.mxu1 %v5062_v30 }
 0x12f   : > { %1204 = vmatpush1.bf16.msra.mxu0 %v5067_v31  ;;  %1245 = vmatpush1.bf16.msra.mxu1 %v5070_v32 }
 0x130   : > { %1298 = vmatprep.subr.bf16.mxu0 %v4947_v0  ;;  %1339 = vmatprep.subr.bf16.mxu1 %v4950_v1 }
 0x132   : > { %v570_v61 = vpop.f32.mrf.mxu0  ;;  %v611_v62 = vpop.f32.mrf.mxu1  ;;  %1222 = vmatmul.mubr.bf16.vlgmr.msra.gmra.mxu0 %v1188_v55  ;;  %1263 = vmatmul.mubr.bf16.vlgmr.msra.gmra.mxu1 %v1188_v55 }
 0x133   : > { %v571_v63 = vadd.f32 %v570_v61, %v5302_v56  ;;  %v612_v33 = vadd.f32 %v611_v62, %v5304_v57  ;;  %1299 = vmatpush1.bf16.msra.mxu0 %v4956_v3  ;;  %1340 = vmatpush1.bf16.msra.mxu1 %v4959_v4 }
 0x134   : > { %v572_v0 = vpop.f32.mrf.mxu0  ;;  %v613_v34 = vpop.f32.mrf.mxu1  ;;  %1300 = vmatprep.subr.bf16.mxu0 %v4963_v5  ;;  %1341 = vmatprep.subr.bf16.mxu1 %v4968_v6 }
 0x135   : > { %v573_v1 = vadd.f32 %v572_v0, %v5308_v58  ;;  %v614_v36 = vadd.f32 %v613_v34, %v5310_v60  ;;  %1330 = vmatprep.mubr.bf16.mxu0 %v4743_v2  ;;  %1371 = vmatprep.mubr.bf16.mxu1 %v4743_v2  ;;  %v4106_v2 = vld [vmem:[%s6300_s0 + $0xe] sm:$0x3] }
 0x136   : > { %v574_v37 = vpop.f32.mrf.mxu0  ;;  %v615_v3 = vpop.f32.mrf.mxu1 }
 0x137   : > { %v622_v38 = vcombine.low %v571_v63, %v573_v1  ;;  %v623_v4 = vcombine.low %v612_v33, %v614_v36  ;;  %1301 = vmatpush1.bf16.msra.mxu0 %v4971_v7  ;;  %1342 = vmatpush1.bf16.msra.mxu1 %v4975_v8  ;;  %v1297_v7 = vpack.c.bf16 %v4106_v2, %v4106_v2 }
 0x138   : > { %v575_v5 = vpop.f32.mrf.mxu0  ;;  %v616_v6 = vpop.f32.mrf.mxu1  ;;  %1302 = vmatprep.subr.bf16.mxu0 %v4979_v9  ;;  %1343 = vmatprep.subr.bf16.mxu1 %v4982_v10 }
 0x139   : > { %v630_v39 = vrot.slane %v622_v38, %v5319_v35  ;;  %v637_v40 = vrot.slane %v623_v4, %v5319_v35 }
 0x13b   : > { %v638_v41 = vcombine.low %v630_v39, %v637_v40  ;;  %1303 = vmatpush1.bf16.msra.mxu0 %v4985_v11  ;;  %1344 = vmatpush1.bf16.msra.mxu1 %v4988_v12 }
 0x13c   : > { %1304 = vmatprep.subr.bf16.mxu0 %v4993_v13  ;;  %1345 = vmatprep.subr.bf16.mxu1 %v4998_v14 }
 0x13d   : > { %640 = vst [vmem:[#allocation3 + $0x30] sm:$0xff] %v638_v41 }
 0x13f   : > { %1305 = vmatpush1.bf16.msra.mxu0 %v5001_v15  ;;  %1346 = vmatpush1.bf16.msra.mxu1 %v5006_v16 }
 0x140   : > { %1306 = vmatprep.subr.bf16.mxu0 %v5009_v17  ;;  %1347 = vmatprep.subr.bf16.mxu1 %v5014_v18 }
 0x143   : > { %1307 = vmatpush1.bf16.msra.mxu0 %v5017_v19  ;;  %1348 = vmatpush1.bf16.msra.mxu1 %v5020_v20 }
 0x144   : > { %1308 = vmatprep.subr.bf16.mxu0 %v5025_v21  ;;  %1349 = vmatprep.subr.bf16.mxu1 %v5030_v22 }
 0x147   : > { %1309 = vmatpush1.bf16.msra.mxu0 %v5035_v23  ;;  %1350 = vmatpush1.bf16.msra.mxu1 %v5038_v24 }
 0x148   : > { %1310 = vmatprep.subr.bf16.mxu0 %v5043_v25  ;;  %1351 = vmatprep.subr.bf16.mxu1 %v5046_v26 }
 0x14b   : > { %1311 = vmatpush1.bf16.msra.mxu0 %v5051_v27  ;;  %1352 = vmatpush1.bf16.msra.mxu1 %v5054_v28 }
 0x14c   : > { %1312 = vmatprep.subr.bf16.mxu0 %v5059_v29  ;;  %1353 = vmatprep.subr.bf16.mxu1 %v5062_v30 }
 0x14f   : > { %1313 = vmatpush1.bf16.msra.mxu0 %v5067_v31  ;;  %1354 = vmatpush1.bf16.msra.mxu1 %v5070_v32 }
 0x152   : > { %v678_v8 = vpop.f32.mrf.mxu0  ;;  %v719_v9 = vpop.f32.mrf.mxu1  ;;  %1331 = vmatmul.mubr.bf16.vlgmr.msra.gmra.mxu0 %v1297_v7  ;;  %1372 = vmatmul.mubr.bf16.vlgmr.msra.gmra.mxu1 %v1297_v7 }
 0x153   : > { %v679_v10 = vadd.f32 %v678_v8, %v5302_v56  ;;  %v720_v11 = vadd.f32 %v719_v9, %v5304_v57 }
 0x154   : > { %v680_v12 = vpop.f32.mrf.mxu0  ;;  %v721_v13 = vpop.f32.mrf.mxu1 }
 0x155   : > { %v681_v14 = vadd.f32 %v680_v12, %v5308_v58  ;;  %v722_v15 = vadd.f32 %v721_v13, %v5310_v60 }
 0x156   : > { %v682_v16 = vpop.f32.mrf.mxu0  ;;  %v723_v17 = vpop.f32.mrf.mxu1 }
 0x157   : > { %v730_v18 = vcombine.low %v679_v10, %v681_v14  ;;  %v731_v19 = vcombine.low %v720_v11, %v722_v15 }
 0x158   : > { %v683_v20 = vpop.f32.mrf.mxu0  ;;  %v724_v21 = vpop.f32.mrf.mxu1 }
 0x159   : > { %v738_v22 = vrot.slane %v730_v18, %v5319_v35  ;;  %v745_v23 = vrot.slane %v731_v19, %v5319_v35 }
 0x15b   : > { %v746_v24 = vcombine.low %v738_v22, %v745_v23 }
 0x15d   : > { %749 = vst [vmem:[#allocation3] sm:$0xff] %v746_v24 }
 0x172   : > { %v787_v25 = vpop.f32.mrf.mxu0  ;;  %v828_v26 = vpop.f32.mrf.mxu1 }
 0x173   : > { %v788_v27 = vadd.f32 %v787_v25, %v5302_v56  ;;  %v829_v28 = vadd.f32 %v828_v26, %v5304_v57 }
 0x174   : > { %v789_v29 = vpop.f32.mrf.mxu0  ;;  %v830_v30 = vpop.f32.mrf.mxu1 }
 0x175   : > { %v790_v31 = vadd.f32 %v789_v29, %v5308_v58  ;;  %v831_v32 = vadd.f32 %v830_v30, %v5310_v60 }
 0x176   : > { %v791_v42 = vpop.f32.mrf.mxu0  ;;  %v832_v43 = vpop.f32.mrf.mxu1 }
 0x177   : > { %v839_v44 = vcombine.low %v788_v27, %v790_v31  ;;  %v840_v45 = vcombine.low %v829_v28, %v831_v32 }
 0x178   : > { %v792_v46 = vpop.f32.mrf.mxu0  ;;  %v833_v47 = vpop.f32.mrf.mxu1 }
 0x179   : > { %v847_v48 = vrot.slane %v839_v44, %v5319_v35  ;;  %v854_v49 = vrot.slane %v840_v45, %v5319_v35 }
 0x17b   : > { %v855_v50 = vcombine.low %v847_v48, %v854_v49 }
 0x17d   : > { %858 = vst [vmem:[#allocation3 + $0x18] sm:$0xff] %v855_v50 }
 0x192   : > { %v896_v51 = vpop.f32.mrf.mxu0  ;;  %v937_v52 = vpop.f32.mrf.mxu1 }
 0x193   : > { %v897_v53 = vadd.f32 %v896_v51, %v5302_v56  ;;  %v938_v54 = vadd.f32 %v937_v52, %v5304_v57 }
 0x194   : > { %v898_v55 = vpop.f32.mrf.mxu0  ;;  %v939_v59 = vpop.f32.mrf.mxu1 }
 0x195   : > { %v899_v61 = vadd.f32 %v898_v55, %v5308_v58  ;;  %v940_v62 = vadd.f32 %v939_v59, %v5310_v60 }
 0x196   : > { %v900_v63 = vpop.f32.mrf.mxu0  ;;  %v941_v33 = vpop.f32.mrf.mxu1 }
 0x197   : > { %v948_v0 = vcombine.low %v897_v53, %v899_v61  ;;  %v949_v34 = vcombine.low %v938_v54, %v940_v62 }
 0x198   : > { %v901_v1 = vpop.f32.mrf.mxu0  ;;  %v942_v36 = vpop.f32.mrf.mxu1 }
 0x199   : > { %v956_v37 = vrot.slane %v948_v0, %v5319_v35  ;;  %v963_v3 = vrot.slane %v949_v34, %v5319_v35 }
 0x19b   : > { %v964_v38 = vcombine.low %v956_v37, %v963_v3 }
 0x19d   : > { %967 = vst [vmem:[#allocation3 + $0x10] sm:$0xff] %v964_v38 }
 0x1b2   : > { %v1005_v4 = vpop.f32.mrf.mxu0  ;;  %v1046_v5 = vpop.f32.mrf.mxu1 }
 0x1b3   : > { %v1006_v6 = vadd.f32 %v1005_v4, %v5302_v56  ;;  %v1047_v39 = vadd.f32 %v1046_v5, %v5304_v57 }
 0x1b4   : > { %v1007_v40 = vpop.f32.mrf.mxu0  ;;  %v1048_v41 = vpop.f32.mrf.mxu1 }
 0x1b5   : > { %v1008_v2 = vadd.f32 %v1007_v40, %v5308_v58  ;;  %v1049_v7 = vadd.f32 %v1048_v41, %v5310_v60 }
 0x1b6   : > { %v1009_v8 = vpop.f32.mrf.mxu0  ;;  %v1050_v9 = vpop.f32.mrf.mxu1 }
 0x1b7   : > { %v1057_v10 = vcombine.low %v1006_v6, %v1008_v2  ;;  %v1058_v11 = vcombine.low %v1047_v39, %v1049_v7 }
 0x1b8   : > { %v1010_v12 = vpop.f32.mrf.mxu0  ;;  %v1051_v13 = vpop.f32.mrf.mxu1 }
 0x1b9   : > { %v1065_v14 = vrot.slane %v1057_v10, %v5319_v35  ;;  %v1072_v15 = vrot.slane %v1058_v11, %v5319_v35 }
 0x1bb   : > { %v1073_v16 = vcombine.low %v1065_v14, %v1072_v15 }
 0x1bd   : > { %1076 = vst [vmem:[#allocation3 + $0x8] sm:$0xff] %v1073_v16 }
 0x1d2   : > { %v1114_v17 = vpop.f32.mrf.mxu0  ;;  %v1155_v18 = vpop.f32.mrf.mxu1 }
 0x1d3   : > { %v1115_v19 = vadd.f32 %v1114_v17, %v5302_v56  ;;  %v1156_v20 = vadd.f32 %v1155_v18, %v5304_v57 }
 0x1d4   : > { %v1116_v21 = vpop.f32.mrf.mxu0  ;;  %v1157_v22 = vpop.f32.mrf.mxu1 }
 0x1d5   : > { %v1117_v23 = vadd.f32 %v1116_v21, %v5308_v58  ;;  %v1158_v24 = vadd.f32 %v1157_v22, %v5310_v60 }
 0x1d6   : > { %v1118_v25 = vpop.f32.mrf.mxu0  ;;  %v1159_v26 = vpop.f32.mrf.mxu1 }
 0x1d7   : > { %v1166_v27 = vcombine.low %v1115_v19, %v1117_v23  ;;  %v1167_v28 = vcombine.low %v1156_v20, %v1158_v24 }
 0x1d8   : > { %v1119_v29 = vpop.f32.mrf.mxu0  ;;  %v1160_v30 = vpop.f32.mrf.mxu1 }
 0x1d9   : > { %v1174_v31 = vrot.slane %v1166_v27, %v5319_v35  ;;  %v1181_v32 = vrot.slane %v1167_v28, %v5319_v35 }
 0x1db   : > { %v1182_v42 = vcombine.low %v1174_v31, %v1181_v32 }
 0x1dd   : > { %1185 = vst [vmem:[#allocation3 + $0x20] sm:$0xff] %v1182_v42 }
 0x1f2   : > { %v1223_v43 = vpop.f32.mrf.mxu0  ;;  %v1264_v44 = vpop.f32.mrf.mxu1 }
 0x1f3   : > { %v1224_v45 = vadd.f32 %v1223_v43, %v5302_v56  ;;  %v1265_v46 = vadd.f32 %v1264_v44, %v5304_v57 }
 0x1f4   : > { %v1225_v47 = vpop.f32.mrf.mxu0  ;;  %v1266_v48 = vpop.f32.mrf.mxu1 }
 0x1f5   : > { %v1226_v49 = vadd.f32 %v1225_v47, %v5308_v58  ;;  %v1267_v50 = vadd.f32 %v1266_v48, %v5310_v60 }
 0x1f6   : > { %v1227_v51 = vpop.f32.mrf.mxu0  ;;  %v1268_v52 = vpop.f32.mrf.mxu1 }
 0x1f7   : > { %v1275_v53 = vcombine.low %v1224_v45, %v1226_v49  ;;  %v1276_v54 = vcombine.low %v1265_v46, %v1267_v50 }
 0x1f8   : > { %v1228_v55 = vpop.f32.mrf.mxu0  ;;  %v1269_v59 = vpop.f32.mrf.mxu1 }
 0x1f9   : > { %v1283_v61 = vrot.slane %v1275_v53, %v5319_v35  ;;  %v1290_v62 = vrot.slane %v1276_v54, %v5319_v35 }
 0x1fb   : > { %v1291_v63 = vcombine.low %v1283_v61, %v1290_v62 }
 0x1fd   : > { %1294 = vst [vmem:[#allocation3 + $0x28] sm:$0xff] %v1291_v63 }
 0x212   : > { %v1332_v33 = vpop.f32.mrf.mxu0  ;;  %v1373_v0 = vpop.f32.mrf.mxu1 }
 0x213   : > { %v1333_v36 = vadd.f32 %v1332_v33, %v5302_v56  ;;  %v1374_v37 = vadd.f32 %v1373_v0, %v5304_v57 }
 0x214   : > { %v1334_v34 = vpop.f32.mrf.mxu0  ;;  %v1375_v1 = vpop.f32.mrf.mxu1 }
 0x215   : > { %v1335_v3 = vadd.f32 %v1334_v34, %v5308_v58  ;;  %v1376_v38 = vadd.f32 %v1375_v1, %v5310_v60 }
 0x216   : > { %v1336_v4 = vpop.f32.mrf.mxu0  ;;  %v1377_v5 = vpop.f32.mrf.mxu1 }
 0x217   : > { %v1384_v6 = vcombine.low %v1333_v36, %v1335_v3  ;;  %v1385_v39 = vcombine.low %v1374_v37, %v1376_v38 }
 0x218   : > { %v1337_v40 = vpop.f32.mrf.mxu0  ;;  %v1378_v41 = vpop.f32.mrf.mxu1 }
 0x219   : > { %v1392_v2 = vrot.slane %v1384_v6, %v5319_v35  ;;  %v1399_v7 = vrot.slane %v1385_v39, %v5319_v35 }
 0x21b   : > { %v1400_v8 = vcombine.low %v1392_v2, %v1399_v7 }
 0x21d   : > { %1403 = vst [vmem:[#allocation3 + $0x38] sm:$0xff] %v1400_v8 }
 0x21e PF: > { %p4107_p1 = scmp.le.s32.totalorder %s4807_s25, 0 }
 0x220   : > { %1407 = sbr.rel (%p4107_p1) target bundleno = 1011 (0x3f3), region = 60 }
 0x225   : > { %v5399_v56 = vld [vmem:[%s4926_s9 + $0xe4] ss:$16 sps:$4 sm:$0xff]   ;;  %v5402_v57 = vld [vmem:[%s4926_s9 + $0xec] ss:$16 sps:$4 sm:$0xff]   ;;  %v4745_v58 = vmov 0   ;;  %v1444_v62 = vlaneseq }
 0x226   : > { %1656 = vmatprep.mubr.bf16.mxu0 %v4745_v58  ;;  %1697 = vmatprep.mubr.bf16.mxu1 %v4745_v58  ;;  %v5408_v60 = vld [vmem:[%s4926_s9 + $0xe0] ss:$16 sps:$4 sm:$0xff]   ;;  %v5411_v35 = vld [vmem:[%s4926_s9 + $0xe8] ss:$16 sps:$4 sm:$0xff]   ;;  %v5415_v9 = vld [vmem:[%s4926_s9 + $0xc4] ss:$16 sps:$4 sm:$0xff]  }
 0x227   : > { %1624 = vmatprep.subr.bf16.mxu0 %v5399_v56  ;;  %1665 = vmatprep.subr.bf16.mxu1 %v5402_v57  ;;  %v5420_v10 = vld [vmem:[%s4926_s9 + $0xcc] ss:$16 sps:$4 sm:$0xff]   ;;  %v5423_v11 = vld [vmem:[%s4926_s9 + $0xc0] ss:$16 sps:$4 sm:$0xff]   ;;  %v5427_v12 = vld [vmem:[%s4926_s9 + $0xc8] ss:$16 sps:$4 sm:$0xff]  }
 0x228   : > { %1625 = vmatpush1.bf16.msra.mxu0 %v5408_v60  ;;  %1666 = vmatpush1.bf16.msra.mxu1 %v5411_v35  ;;  %v5431_v13 = vld [vmem:[%s4926_s9 + $0xa4] ss:$16 sps:$4 sm:$0xff]   ;;  %v5434_v14 = vld [vmem:[%s4926_s9 + $0xac] ss:$16 sps:$4 sm:$0xff]   ;;  %v5437_v15 = vld [vmem:[%s4926_s9 + $0xa0] ss:$16 sps:$4 sm:$0xff]  }
 0x229   : > { %1626 = vmatprep.subr.bf16.mxu0 %v5415_v9  ;;  %1667 = vmatprep.subr.bf16.mxu1 %v5420_v10  ;;  %v5440_v16 = vld [vmem:[%s4926_s9 + $0xa8] ss:$16 sps:$4 sm:$0xff]   ;;  %v5445_v17 = vld [vmem:[%s4926_s9 + $0x84] ss:$16 sps:$4 sm:$0xff]   ;;  %v5450_v18 = vld [vmem:[%s4926_s9 + $0x8c] ss:$16 sps:$4 sm:$0xff]  }
 0x22a   : > { %v5453_v19 = vld [vmem:[%s4926_s9 + $0x80] ss:$16 sps:$4 sm:$0xff]   ;;  %v5458_v20 = vld [vmem:[%s4926_s9 + $0x88] ss:$16 sps:$4 sm:$0xff]   ;;  %v5461_v21 = vld [vmem:[%s4926_s9 + $0x64] ss:$16 sps:$4 sm:$0xff]  }
 0x22b   : > { %v5466_v22 = vld [vmem:[%s4926_s9 + $0x6c] ss:$16 sps:$4 sm:$0xff]   ;;  %v5469_v23 = vld [vmem:[%s4926_s9 + $0x60] ss:$16 sps:$4 sm:$0xff]   ;;  %v5472_v24 = vld [vmem:[%s4926_s9 + $0x68] ss:$16 sps:$4 sm:$0xff]  }
 0x22c   : > { %1627 = vmatpush1.bf16.msra.mxu0 %v5423_v11  ;;  %1668 = vmatpush1.bf16.msra.mxu1 %v5427_v12  ;;  %v5477_v25 = vld [vmem:[%s4926_s9 + $0x44] ss:$16 sps:$4 sm:$0xff]   ;;  %v5482_v26 = vld [vmem:[%s4926_s9 + $0x4c] ss:$16 sps:$4 sm:$0xff]   ;;  %v5487_v27 = vld [vmem:[%s4926_s9 + $0x40] ss:$16 sps:$4 sm:$0xff]  }
 0x22d   : > { %1628 = vmatprep.subr.bf16.mxu0 %v5431_v13  ;;  %1669 = vmatprep.subr.bf16.mxu1 %v5434_v14  ;;  %v5490_v28 = vld [vmem:[%s4926_s9 + $0x48] ss:$16 sps:$4 sm:$0xff]   ;;  %v5495_v29 = vld [vmem:[%s4926_s9 + $0x24] ss:$16 sps:$4 sm:$0xff]   ;;  %v5498_v30 = vld [vmem:[%s4926_s9 + $0x2c] ss:$16 sps:$4 sm:$0xff]  }
 0x22e   : > { %v5503_v31 = vld [vmem:[%s4926_s9 + $0x20] ss:$16 sps:$4 sm:$0xff]   ;;  %v5506_v32 = vld [vmem:[%s4926_s9 + $0x28] ss:$16 sps:$4 sm:$0xff]   ;;  %v5511_v42 = vld [vmem:[%s4926_s9 + $0x4] ss:$16 sps:$4 sm:$0xff]  }
 0x22f   : > { %v5514_v43 = vld [vmem:[%s4926_s9 + $0xc] ss:$16 sps:$4 sm:$0xff]   ;;  %v5519_v44 = vld [vmem:[%s4926_s9] ss:$16 sps:$4 sm:$0xff]   ;;  %v5522_v45 = vld [vmem:[%s4926_s9 + $0x8] ss:$16 sps:$4 sm:$0xff]  }
 0x230   : > { %1629 = vmatpush1.bf16.msra.mxu0 %v5437_v15  ;;  %1670 = vmatpush1.bf16.msra.mxu1 %v5440_v16  ;;  %v1441_v46 = vld [vmem:[#allocation2] sm:$0x3]  ;;  %v1730_v48 = vld [vmem:[#allocation2 + $0x2] sm:$0x3]  ;;  %v1839_v50 = vld [vmem:[#allocation2 + $0x4] sm:$0x3] }
 0x231   : > { %1630 = vmatprep.subr.bf16.mxu0 %v5445_v17  ;;  %1671 = vmatprep.subr.bf16.mxu1 %v5450_v18  ;;  %v1442_v47 = vpack.c.bf16 %v1441_v46, %v1441_v46  ;;  %v1731_v49 = vpack.c.bf16 %v1730_v48, %v1730_v48  ;;  %v1840_v51 = vpack.c.bf16 %v1839_v50, %v1839_v50  ;;  %v1948_v52 = vld [vmem:[#allocation2 + $0x6] sm:$0x3]  ;;  %v2057_v54 = vld [vmem:[#allocation2 + $0x8] sm:$0x3]  ;;  %v2166_v59 = vld [vmem:[#allocation2 + $0xa] sm:$0x3] }
 0x232   : > { %v1949_v53 = vpack.c.bf16 %v1948_v52, %v1948_v52  ;;  %v2058_v55 = vpack.c.bf16 %v2057_v54, %v2057_v54  ;;  %v2167_v61 = vpack.c.bf16 %v2166_v59, %v2166_v59  ;;  %v1445_v63 = vshrl.u32 %v1444_v62, 7  ;;  %v2275_v34 = vld [vmem:[#allocation2 + $0xc] sm:$0x3]  ;;  %v1440_v1 = vld [vmem:[%s4943_s10] sm:$0xf] }
 0x233   : > { %v4746_v37 = vmov 1983009808   ;;  %v2276_v4 = vpack.c.bf16 %v2275_v34, %v2275_v34 }
 0x234   : > { %1631 = vmatpush1.bf16.msra.mxu0 %v5453_v19  ;;  %1672 = vmatpush1.bf16.msra.mxu1 %v5458_v20  ;;  %v1446_v33 = vsub.s32 0, %v1445_v63  ;;  %v1454_v0 = vsub.s32 2, %v1445_v63  ;;  %v1450_v36 = vsub.s32 1, %v1445_v63  ;;  %v1713_v3 = vunpack.c.l.s4 %v4746_v37 }
 0x235   : > { %1632 = vmatprep.subr.bf16.mxu0 %v5461_v21  ;;  %1673 = vmatprep.subr.bf16.mxu1 %v5466_v22  ;;  %v1458_v38 = vsub.s32 3, %v1445_v63 }
 0x236   : > { %v5733_v5 = vrot.slane %v1440_v1, %v1446_v33  ;;  %v5735_v6 = vrot.slane %v1440_v1, %v1454_v0  ;;  %v5739_v39 = vrot.slane %v1440_v1, %v1450_v36  ;;  %v1714_v40 = vunpack.c.0.s8 %v1713_v3 }
 0x237   : > { %v5741_v41 = vrot.slane %v1440_v1, %v1458_v38 }
 0x238   : > { %1633 = vmatpush1.bf16.msra.mxu0 %v5469_v23  ;;  %1674 = vmatpush1.bf16.msra.mxu1 %v5472_v24  ;;  %v5750_v48 = vsub.s32 %v1714_v40, %v1445_v63 }
 0x239   : > { %1634 = vmatprep.subr.bf16.mxu0 %v5477_v25  ;;  %1675 = vmatprep.subr.bf16.mxu1 %v5482_v26 }
 0x23c   : > { %1635 = vmatpush1.bf16.msra.mxu0 %v5487_v27  ;;  %1676 = vmatpush1.bf16.msra.mxu1 %v5490_v28 }
 0x23d   : > { %1636 = vmatprep.subr.bf16.mxu0 %v5495_v29  ;;  %1677 = vmatprep.subr.bf16.mxu1 %v5498_v30 }
 0x240   : > { %1637 = vmatpush1.bf16.msra.mxu0 %v5503_v31  ;;  %1678 = vmatpush1.bf16.msra.mxu1 %v5506_v32 }
 0x241   : > { %1638 = vmatprep.subr.bf16.mxu0 %v5511_v42  ;;  %1679 = vmatprep.subr.bf16.mxu1 %v5514_v43 }
 0x244   : > { %1639 = vmatpush1.bf16.msra.mxu0 %v5519_v44  ;;  %1680 = vmatpush1.bf16.msra.mxu1 %v5522_v45 }
 0x245   : > { %1732 = vmatprep.subr.bf16.mxu0 %v5399_v56  ;;  %1773 = vmatprep.subr.bf16.mxu1 %v5402_v57 }
 0x247   : > { %1657 = vmatmul.mubr.bf16.vlgmr.msra.gmra.mxu0 %v1442_v47  ;;  %1698 = vmatmul.mubr.bf16.vlgmr.msra.gmra.mxu1 %v1442_v47 }
 0x248   : > { %1733 = vmatpush1.bf16.msra.mxu0 %v5408_v60  ;;  %1774 = vmatpush1.bf16.msra.mxu1 %v5411_v35 }
 0x249   : > { %1734 = vmatprep.subr.bf16.mxu0 %v5415_v9  ;;  %1775 = vmatprep.subr.bf16.mxu1 %v5420_v10 }
 0x24a   : > { %1764 = vmatprep.mubr.bf16.mxu0 %v4745_v58  ;;  %1805 = vmatprep.mubr.bf16.mxu1 %v4745_v58 }
 0x24c   : > { %1735 = vmatpush1.bf16.msra.mxu0 %v5423_v11  ;;  %1776 = vmatpush1.bf16.msra.mxu1 %v5427_v12 }
 0x24d   : > { %1736 = vmatprep.subr.bf16.mxu0 %v5431_v13  ;;  %1777 = vmatprep.subr.bf16.mxu1 %v5434_v14 }
 0x250   : > { %1737 = vmatpush1.bf16.msra.mxu0 %v5437_v15  ;;  %1778 = vmatpush1.bf16.msra.mxu1 %v5440_v16 }
 0x251   : > { %1738 = vmatprep.subr.bf16.mxu0 %v5445_v17  ;;  %1779 = vmatprep.subr.bf16.mxu1 %v5450_v18 }
 0x254   : > { %1739 = vmatpush1.bf16.msra.mxu0 %v5453_v19  ;;  %1780 = vmatpush1.bf16.msra.mxu1 %v5458_v20 }
 0x255   : > { %1740 = vmatprep.subr.bf16.mxu0 %v5461_v21  ;;  %1781 = vmatprep.subr.bf16.mxu1 %v5466_v22 }
 0x258   : > { %1741 = vmatpush1.bf16.msra.mxu0 %v5469_v23  ;;  %1782 = vmatpush1.bf16.msra.mxu1 %v5472_v24 }
 0x259   : > { %1742 = vmatprep.subr.bf16.mxu0 %v5477_v25  ;;  %1783 = vmatprep.subr.bf16.mxu1 %v5482_v26 }
 0x25c   : > { %1743 = vmatpush1.bf16.msra.mxu0 %v5487_v27  ;;  %1784 = vmatpush1.bf16.msra.mxu1 %v5490_v28 }
 0x25d   : > { %1744 = vmatprep.subr.bf16.mxu0 %v5495_v29  ;;  %1785 = vmatprep.subr.bf16.mxu1 %v5498_v30 }
 0x260   : > { %1745 = vmatpush1.bf16.msra.mxu0 %v5503_v31  ;;  %1786 = vmatpush1.bf16.msra.mxu1 %v5506_v32 }
 0x261   : > { %1746 = vmatprep.subr.bf16.mxu0 %v5511_v42  ;;  %1787 = vmatprep.subr.bf16.mxu1 %v5514_v43 }
 0x264   : > { %1747 = vmatpush1.bf16.msra.mxu0 %v5519_v44  ;;  %1788 = vmatpush1.bf16.msra.mxu1 %v5522_v45 }
 0x265   : > { %1841 = vmatprep.subr.bf16.mxu0 %v5399_v56  ;;  %1882 = vmatprep.subr.bf16.mxu1 %v5402_v57 }
 0x267   : > { %1765 = vmatmul.mubr.bf16.vlgmr.msra.gmra.mxu0 %v1731_v49  ;;  %1806 = vmatmul.mubr.bf16.vlgmr.msra.gmra.mxu1 %v1731_v49 }
 0x268   : > { %1842 = vmatpush1.bf16.msra.mxu0 %v5408_v60  ;;  %1883 = vmatpush1.bf16.msra.mxu1 %v5411_v35 }
 0x269   : > { %1843 = vmatprep.subr.bf16.mxu0 %v5415_v9  ;;  %1884 = vmatprep.subr.bf16.mxu1 %v5420_v10 }
 0x26a   : > { %1873 = vmatprep.mubr.bf16.mxu0 %v4745_v58  ;;  %1914 = vmatprep.mubr.bf16.mxu1 %v4745_v58 }
 0x26c   : > { %1844 = vmatpush1.bf16.msra.mxu0 %v5423_v11  ;;  %1885 = vmatpush1.bf16.msra.mxu1 %v5427_v12 }
 0x26d   : > { %1845 = vmatprep.subr.bf16.mxu0 %v5431_v13  ;;  %1886 = vmatprep.subr.bf16.mxu1 %v5434_v14 }
 0x270   : > { %1846 = vmatpush1.bf16.msra.mxu0 %v5437_v15  ;;  %1887 = vmatpush1.bf16.msra.mxu1 %v5440_v16 }
 0x271   : > { %1847 = vmatprep.subr.bf16.mxu0 %v5445_v17  ;;  %1888 = vmatprep.subr.bf16.mxu1 %v5450_v18 }
 0x274   : > { %1848 = vmatpush1.bf16.msra.mxu0 %v5453_v19  ;;  %1889 = vmatpush1.bf16.msra.mxu1 %v5458_v20 }
 0x275   : > { %1849 = vmatprep.subr.bf16.mxu0 %v5461_v21  ;;  %1890 = vmatprep.subr.bf16.mxu1 %v5466_v22 }
 0x278   : > { %1850 = vmatpush1.bf16.msra.mxu0 %v5469_v23  ;;  %1891 = vmatpush1.bf16.msra.mxu1 %v5472_v24 }
 0x279   : > { %1851 = vmatprep.subr.bf16.mxu0 %v5477_v25  ;;  %1892 = vmatprep.subr.bf16.mxu1 %v5482_v26 }
 0x27c   : > { %1852 = vmatpush1.bf16.msra.mxu0 %v5487_v27  ;;  %1893 = vmatpush1.bf16.msra.mxu1 %v5490_v28 }
 0x27d   : > { %1853 = vmatprep.subr.bf16.mxu0 %v5495_v29  ;;  %1894 = vmatprep.subr.bf16.mxu1 %v5498_v30 }
 0x280   : > { %1854 = vmatpush1.bf16.msra.mxu0 %v5503_v31  ;;  %1895 = vmatpush1.bf16.msra.mxu1 %v5506_v32 }
 0x281   : > { %1855 = vmatprep.subr.bf16.mxu0 %v5511_v42  ;;  %1896 = vmatprep.subr.bf16.mxu1 %v5514_v43 }
 0x284   : > { %1856 = vmatpush1.bf16.msra.mxu0 %v5519_v44  ;;  %1897 = vmatpush1.bf16.msra.mxu1 %v5522_v45 }
 0x285   : > { %1950 = vmatprep.subr.bf16.mxu0 %v5399_v56  ;;  %1991 = vmatprep.subr.bf16.mxu1 %v5402_v57 }
 0x287   : > { %1874 = vmatmul.mubr.bf16.vlgmr.msra.gmra.mxu0 %v1840_v51  ;;  %1915 = vmatmul.mubr.bf16.vlgmr.msra.gmra.mxu1 %v1840_v51 }
 0x288   : > { %1951 = vmatpush1.bf16.msra.mxu0 %v5408_v60  ;;  %1992 = vmatpush1.bf16.msra.mxu1 %v5411_v35 }
 0x289   : > { %1952 = vmatprep.subr.bf16.mxu0 %v5415_v9  ;;  %1993 = vmatprep.subr.bf16.mxu1 %v5420_v10 }
 0x28a   : > { %1982 = vmatprep.mubr.bf16.mxu0 %v4745_v58  ;;  %2023 = vmatprep.mubr.bf16.mxu1 %v4745_v58 }
 0x28c   : > { %1953 = vmatpush1.bf16.msra.mxu0 %v5423_v11  ;;  %1994 = vmatpush1.bf16.msra.mxu1 %v5427_v12 }
 0x28d   : > { %1954 = vmatprep.subr.bf16.mxu0 %v5431_v13  ;;  %1995 = vmatprep.subr.bf16.mxu1 %v5434_v14 }
 0x290   : > { %1955 = vmatpush1.bf16.msra.mxu0 %v5437_v15  ;;  %1996 = vmatpush1.bf16.msra.mxu1 %v5440_v16 }
 0x291   : > { %1956 = vmatprep.subr.bf16.mxu0 %v5445_v17  ;;  %1997 = vmatprep.subr.bf16.mxu1 %v5450_v18 }
 0x294   : > { %1957 = vmatpush1.bf16.msra.mxu0 %v5453_v19  ;;  %1998 = vmatpush1.bf16.msra.mxu1 %v5458_v20 }
 0x295   : > { %1958 = vmatprep.subr.bf16.mxu0 %v5461_v21  ;;  %1999 = vmatprep.subr.bf16.mxu1 %v5466_v22 }
 0x298   : > { %1959 = vmatpush1.bf16.msra.mxu0 %v5469_v23  ;;  %2000 = vmatpush1.bf16.msra.mxu1 %v5472_v24 }
 0x299   : > { %1960 = vmatprep.subr.bf16.mxu0 %v5477_v25  ;;  %2001 = vmatprep.subr.bf16.mxu1 %v5482_v26 }
 0x29c   : > { %1961 = vmatpush1.bf16.msra.mxu0 %v5487_v27  ;;  %2002 = vmatpush1.bf16.msra.mxu1 %v5490_v28 }
 0x29d   : > { %1962 = vmatprep.subr.bf16.mxu0 %v5495_v29  ;;  %2003 = vmatprep.subr.bf16.mxu1 %v5498_v30 }
 0x2a0   : > { %1963 = vmatpush1.bf16.msra.mxu0 %v5503_v31  ;;  %2004 = vmatpush1.bf16.msra.mxu1 %v5506_v32 }
 0x2a1   : > { %1964 = vmatprep.subr.bf16.mxu0 %v5511_v42  ;;  %2005 = vmatprep.subr.bf16.mxu1 %v5514_v43 }
 0x2a4   : > { %1965 = vmatpush1.bf16.msra.mxu0 %v5519_v44  ;;  %2006 = vmatpush1.bf16.msra.mxu1 %v5522_v45 }
 0x2a5   : > { %2059 = vmatprep.subr.bf16.mxu0 %v5399_v56  ;;  %2100 = vmatprep.subr.bf16.mxu1 %v5402_v57 }
 0x2a7   : > { %1983 = vmatmul.mubr.bf16.vlgmr.msra.gmra.mxu0 %v1949_v53  ;;  %2024 = vmatmul.mubr.bf16.vlgmr.msra.gmra.mxu1 %v1949_v53 }
 0x2a8   : > { %2060 = vmatpush1.bf16.msra.mxu0 %v5408_v60  ;;  %2101 = vmatpush1.bf16.msra.mxu1 %v5411_v35 }
 0x2a9   : > { %2061 = vmatprep.subr.bf16.mxu0 %v5415_v9  ;;  %2102 = vmatprep.subr.bf16.mxu1 %v5420_v10 }
 0x2aa   : > { %2091 = vmatprep.mubr.bf16.mxu0 %v4745_v58  ;;  %2132 = vmatprep.mubr.bf16.mxu1 %v4745_v58 }
 0x2ac   : > { %2062 = vmatpush1.bf16.msra.mxu0 %v5423_v11  ;;  %2103 = vmatpush1.bf16.msra.mxu1 %v5427_v12 }
 0x2ad   : > { %2063 = vmatprep.subr.bf16.mxu0 %v5431_v13  ;;  %2104 = vmatprep.subr.bf16.mxu1 %v5434_v14 }
 0x2b0   : > { %2064 = vmatpush1.bf16.msra.mxu0 %v5437_v15  ;;  %2105 = vmatpush1.bf16.msra.mxu1 %v5440_v16 }
 0x2b1   : > { %2065 = vmatprep.subr.bf16.mxu0 %v5445_v17  ;;  %2106 = vmatprep.subr.bf16.mxu1 %v5450_v18 }
 0x2b4   : > { %2066 = vmatpush1.bf16.msra.mxu0 %v5453_v19  ;;  %2107 = vmatpush1.bf16.msra.mxu1 %v5458_v20 }
 0x2b5   : > { %2067 = vmatprep.subr.bf16.mxu0 %v5461_v21  ;;  %2108 = vmatprep.subr.bf16.mxu1 %v5466_v22 }
 0x2b8   : > { %2068 = vmatpush1.bf16.msra.mxu0 %v5469_v23  ;;  %2109 = vmatpush1.bf16.msra.mxu1 %v5472_v24 }
 0x2b9   : > { %2069 = vmatprep.subr.bf16.mxu0 %v5477_v25  ;;  %2110 = vmatprep.subr.bf16.mxu1 %v5482_v26 }
 0x2bc   : > { %2070 = vmatpush1.bf16.msra.mxu0 %v5487_v27  ;;  %2111 = vmatpush1.bf16.msra.mxu1 %v5490_v28 }
 0x2bd   : > { %2071 = vmatprep.subr.bf16.mxu0 %v5495_v29  ;;  %2112 = vmatprep.subr.bf16.mxu1 %v5498_v30 }
 0x2c0   : > { %2072 = vmatpush1.bf16.msra.mxu0 %v5503_v31  ;;  %2113 = vmatpush1.bf16.msra.mxu1 %v5506_v32 }
 0x2c1   : > { %2073 = vmatprep.subr.bf16.mxu0 %v5511_v42  ;;  %2114 = vmatprep.subr.bf16.mxu1 %v5514_v43 }
 0x2c4   : > { %2074 = vmatpush1.bf16.msra.mxu0 %v5519_v44  ;;  %2115 = vmatpush1.bf16.msra.mxu1 %v5522_v45 }
 0x2c5   : > { %2168 = vmatprep.subr.bf16.mxu0 %v5399_v56  ;;  %2209 = vmatprep.subr.bf16.mxu1 %v5402_v57 }
 0x2c7   : > { %2092 = vmatmul.mubr.bf16.vlgmr.msra.gmra.mxu0 %v2058_v55  ;;  %2133 = vmatmul.mubr.bf16.vlgmr.msra.gmra.mxu1 %v2058_v55 }
 0x2c8   : > { %2169 = vmatpush1.bf16.msra.mxu0 %v5408_v60  ;;  %2210 = vmatpush1.bf16.msra.mxu1 %v5411_v35 }
 0x2c9   : > { %2170 = vmatprep.subr.bf16.mxu0 %v5415_v9  ;;  %2211 = vmatprep.subr.bf16.mxu1 %v5420_v10 }
 0x2ca   : > { %2200 = vmatprep.mubr.bf16.mxu0 %v4745_v58  ;;  %2241 = vmatprep.mubr.bf16.mxu1 %v4745_v58 }
 0x2cc   : > { %2171 = vmatpush1.bf16.msra.mxu0 %v5423_v11  ;;  %2212 = vmatpush1.bf16.msra.mxu1 %v5427_v12 }
 0x2cd   : > { %2172 = vmatprep.subr.bf16.mxu0 %v5431_v13  ;;  %2213 = vmatprep.subr.bf16.mxu1 %v5434_v14 }
 0x2d0   : > { %2173 = vmatpush1.bf16.msra.mxu0 %v5437_v15  ;;  %2214 = vmatpush1.bf16.msra.mxu1 %v5440_v16 }
 0x2d1   : > { %2174 = vmatprep.subr.bf16.mxu0 %v5445_v17  ;;  %2215 = vmatprep.subr.bf16.mxu1 %v5450_v18 }
 0x2d4   : > { %2175 = vmatpush1.bf16.msra.mxu0 %v5453_v19  ;;  %2216 = vmatpush1.bf16.msra.mxu1 %v5458_v20 }
 0x2d5   : > { %2176 = vmatprep.subr.bf16.mxu0 %v5461_v21  ;;  %2217 = vmatprep.subr.bf16.mxu1 %v5466_v22 }
 0x2d8   : > { %2177 = vmatpush1.bf16.msra.mxu0 %v5469_v23  ;;  %2218 = vmatpush1.bf16.msra.mxu1 %v5472_v24 }
 0x2d9   : > { %2178 = vmatprep.subr.bf16.mxu0 %v5477_v25  ;;  %2219 = vmatprep.subr.bf16.mxu1 %v5482_v26 }
 0x2dc   : > { %2179 = vmatpush1.bf16.msra.mxu0 %v5487_v27  ;;  %2220 = vmatpush1.bf16.msra.mxu1 %v5490_v28 }
 0x2dd   : > { %2180 = vmatprep.subr.bf16.mxu0 %v5495_v29  ;;  %2221 = vmatprep.subr.bf16.mxu1 %v5498_v30 }
 0x2e0   : > { %2181 = vmatpush1.bf16.msra.mxu0 %v5503_v31  ;;  %2222 = vmatpush1.bf16.msra.mxu1 %v5506_v32 }
 0x2e1   : > { %2182 = vmatprep.subr.bf16.mxu0 %v5511_v42  ;;  %2223 = vmatprep.subr.bf16.mxu1 %v5514_v43 }
 0x2e4   : > { %2183 = vmatpush1.bf16.msra.mxu0 %v5519_v44  ;;  %2224 = vmatpush1.bf16.msra.mxu1 %v5522_v45 }
 0x2e5   : > { %2277 = vmatprep.subr.bf16.mxu0 %v5399_v56  ;;  %2318 = vmatprep.subr.bf16.mxu1 %v5402_v57 }
 0x2e7   : > { %2201 = vmatmul.mubr.bf16.vlgmr.msra.gmra.mxu0 %v2167_v61  ;;  %2242 = vmatmul.mubr.bf16.vlgmr.msra.gmra.mxu1 %v2167_v61 }
 0x2e8   : > { %2278 = vmatpush1.bf16.msra.mxu0 %v5408_v60  ;;  %2319 = vmatpush1.bf16.msra.mxu1 %v5411_v35 }
 0x2e9   : > { %2279 = vmatprep.subr.bf16.mxu0 %v5415_v9  ;;  %2320 = vmatprep.subr.bf16.mxu1 %v5420_v10 }
 0x2ea   : > { %2309 = vmatprep.mubr.bf16.mxu0 %v4745_v58  ;;  %2350 = vmatprep.mubr.bf16.mxu1 %v4745_v58 }
 0x2ec   : > { %2280 = vmatpush1.bf16.msra.mxu0 %v5423_v11  ;;  %2321 = vmatpush1.bf16.msra.mxu1 %v5427_v12 }
 0x2ed   : > { %2281 = vmatprep.subr.bf16.mxu0 %v5431_v13  ;;  %2322 = vmatprep.subr.bf16.mxu1 %v5434_v14 }
 0x2f0   : > { %2282 = vmatpush1.bf16.msra.mxu0 %v5437_v15  ;;  %2323 = vmatpush1.bf16.msra.mxu1 %v5440_v16 }
 0x2f1   : > { %2283 = vmatprep.subr.bf16.mxu0 %v5445_v17  ;;  %2324 = vmatprep.subr.bf16.mxu1 %v5450_v18 }
 0x2f4   : > { %2284 = vmatpush1.bf16.msra.mxu0 %v5453_v19  ;;  %2325 = vmatpush1.bf16.msra.mxu1 %v5458_v20 }
 0x2f5   : > { %2285 = vmatprep.subr.bf16.mxu0 %v5461_v21  ;;  %2326 = vmatprep.subr.bf16.mxu1 %v5466_v22 }
 0x2f8   : > { %2286 = vmatpush1.bf16.msra.mxu0 %v5469_v23  ;;  %2327 = vmatpush1.bf16.msra.mxu1 %v5472_v24 }
 0x2f9   : > { %2287 = vmatprep.subr.bf16.mxu0 %v5477_v25  ;;  %2328 = vmatprep.subr.bf16.mxu1 %v5482_v26 }
 0x2fc   : > { %2288 = vmatpush1.bf16.msra.mxu0 %v5487_v27  ;;  %2329 = vmatpush1.bf16.msra.mxu1 %v5490_v28 }
 0x2fd   : > { %2289 = vmatprep.subr.bf16.mxu0 %v5495_v29  ;;  %2330 = vmatprep.subr.bf16.mxu1 %v5498_v30 }
 0x300   : > { %2290 = vmatpush1.bf16.msra.mxu0 %v5503_v31  ;;  %2331 = vmatpush1.bf16.msra.mxu1 %v5506_v32 }
 0x301   : > { %2291 = vmatprep.subr.bf16.mxu0 %v5511_v42  ;;  %2332 = vmatprep.subr.bf16.mxu1 %v5514_v43 }
 0x304   : > { %2292 = vmatpush1.bf16.msra.mxu0 %v5519_v44  ;;  %2333 = vmatpush1.bf16.msra.mxu1 %v5522_v45 }
 0x305   : > { %2386 = vmatprep.subr.bf16.mxu0 %v5399_v56  ;;  %2427 = vmatprep.subr.bf16.mxu1 %v5402_v57 }
 0x307   : > { %v1658_v2 = vpop.f32.mrf.mxu0  ;;  %v1699_v7 = vpop.f32.mrf.mxu1  ;;  %2310 = vmatmul.mubr.bf16.vlgmr.msra.gmra.mxu0 %v2276_v4  ;;  %2351 = vmatmul.mubr.bf16.vlgmr.msra.gmra.mxu1 %v2276_v4 }
 0x308   : > { %v1659_v8 = vadd.f32 %v1658_v2, %v5733_v5  ;;  %v1700_v46 = vadd.f32 %v1699_v7, %v5735_v6  ;;  %2387 = vmatpush1.bf16.msra.mxu0 %v5408_v60  ;;  %2428 = vmatpush1.bf16.msra.mxu1 %v5411_v35 }
 0x309   : > { %v1660_v56 = vpop.f32.mrf.mxu0  ;;  %v1701_v47 = vpop.f32.mrf.mxu1  ;;  %2388 = vmatprep.subr.bf16.mxu0 %v5415_v9  ;;  %2429 = vmatprep.subr.bf16.mxu1 %v5420_v10 }
 0x30a   : > { %v1661_v57 = vadd.f32 %v1660_v56, %v5739_v39  ;;  %v1702_v49 = vadd.f32 %v1701_v47, %v5741_v41  ;;  %2418 = vmatprep.mubr.bf16.mxu0 %v4745_v58  ;;  %2459 = vmatprep.mubr.bf16.mxu1 %v4745_v58  ;;  %v2384_v58 = vld [vmem:[#allocation2 + $0xe] sm:$0x3] }
 0x30b   : > { %v1662_v50 = vpop.f32.mrf.mxu0  ;;  %v1703_v60 = vpop.f32.mrf.mxu1 }
 0x30c   : > { %v1710_v51 = vcombine.low %v1659_v8, %v1661_v57  ;;  %v1711_v35 = vcombine.low %v1700_v46, %v1702_v49  ;;  %2389 = vmatpush1.bf16.msra.mxu0 %v5423_v11  ;;  %2430 = vmatpush1.bf16.msra.mxu1 %v5427_v12  ;;  %v2385_v11 = vpack.c.bf16 %v2384_v58, %v2384_v58 }
 0x30d   : > { %v1663_v9 = vpop.f32.mrf.mxu0  ;;  %v1704_v10 = vpop.f32.mrf.mxu1  ;;  %2390 = vmatprep.subr.bf16.mxu0 %v5431_v13  ;;  %2431 = vmatprep.subr.bf16.mxu1 %v5434_v14 }
 0x30e   : > { %v1718_v52 = vrot.slane %v1710_v51, %v5750_v48  ;;  %v1725_v53 = vrot.slane %v1711_v35, %v5750_v48 }
 0x310   : > { %v1726_v54 = vcombine.low %v1718_v52, %v1725_v53  ;;  %2391 = vmatpush1.bf16.msra.mxu0 %v5437_v15  ;;  %2432 = vmatpush1.bf16.msra.mxu1 %v5440_v16 }
 0x311   : > { %2392 = vmatprep.subr.bf16.mxu0 %v5445_v17  ;;  %2433 = vmatprep.subr.bf16.mxu1 %v5450_v18 }
 0x312   : > { %1728 = vst [vmem:[#allocation3 + $0x30] sm:$0xff] %v1726_v54 }
 0x314   : > { %2393 = vmatpush1.bf16.msra.mxu0 %v5453_v19  ;;  %2434 = vmatpush1.bf16.msra.mxu1 %v5458_v20 }
 0x315   : > { %2394 = vmatprep.subr.bf16.mxu0 %v5461_v21  ;;  %2435 = vmatprep.subr.bf16.mxu1 %v5466_v22 }
 0x318   : > { %2395 = vmatpush1.bf16.msra.mxu0 %v5469_v23  ;;  %2436 = vmatpush1.bf16.msra.mxu1 %v5472_v24 }
 0x319   : > { %2396 = vmatprep.subr.bf16.mxu0 %v5477_v25  ;;  %2437 = vmatprep.subr.bf16.mxu1 %v5482_v26 }
 0x31c   : > { %2397 = vmatpush1.bf16.msra.mxu0 %v5487_v27  ;;  %2438 = vmatpush1.bf16.msra.mxu1 %v5490_v28 }
 0x31d   : > { %2398 = vmatprep.subr.bf16.mxu0 %v5495_v29  ;;  %2439 = vmatprep.subr.bf16.mxu1 %v5498_v30 }
 0x320   : > { %2399 = vmatpush1.bf16.msra.mxu0 %v5503_v31  ;;  %2440 = vmatpush1.bf16.msra.mxu1 %v5506_v32 }
 0x321   : > { %2400 = vmatprep.subr.bf16.mxu0 %v5511_v42  ;;  %2441 = vmatprep.subr.bf16.mxu1 %v5514_v43 }
 0x324   : > { %2401 = vmatpush1.bf16.msra.mxu0 %v5519_v44  ;;  %2442 = vmatpush1.bf16.msra.mxu1 %v5522_v45 }
 0x327   : > { %v1766_v12 = vpop.f32.mrf.mxu0  ;;  %v1807_v13 = vpop.f32.mrf.mxu1  ;;  %2419 = vmatmul.mubr.bf16.vlgmr.msra.gmra.mxu0 %v2385_v11  ;;  %2460 = vmatmul.mubr.bf16.vlgmr.msra.gmra.mxu1 %v2385_v11 }
 0x328   : > { %v1767_v14 = vadd.f32 %v1766_v12, %v5733_v5  ;;  %v1808_v15 = vadd.f32 %v1807_v13, %v5735_v6 }
 0x329   : > { %v1768_v16 = vpop.f32.mrf.mxu0  ;;  %v1809_v17 = vpop.f32.mrf.mxu1 }
 0x32a   : > { %v1769_v18 = vadd.f32 %v1768_v16, %v5739_v39  ;;  %v1810_v19 = vadd.f32 %v1809_v17, %v5741_v41 }
 0x32b   : > { %v1770_v20 = vpop.f32.mrf.mxu0  ;;  %v1811_v21 = vpop.f32.mrf.mxu1 }
 0x32c   : > { %v1818_v22 = vcombine.low %v1767_v14, %v1769_v18  ;;  %v1819_v23 = vcombine.low %v1808_v15, %v1810_v19 }
 0x32d   : > { %v1771_v24 = vpop.f32.mrf.mxu0  ;;  %v1812_v25 = vpop.f32.mrf.mxu1 }
 0x32e   : > { %v1826_v26 = vrot.slane %v1818_v22, %v5750_v48  ;;  %v1833_v27 = vrot.slane %v1819_v23, %v5750_v48 }
 0x330   : > { %v1834_v28 = vcombine.low %v1826_v26, %v1833_v27 }
 0x332   : > { %1837 = vst [vmem:[#allocation3] sm:$0xff] %v1834_v28 }
 0x347   : > { %v1875_v29 = vpop.f32.mrf.mxu0  ;;  %v1916_v30 = vpop.f32.mrf.mxu1 }
 0x348   : > { %v1876_v31 = vadd.f32 %v1875_v29, %v5733_v5  ;;  %v1917_v32 = vadd.f32 %v1916_v30, %v5735_v6 }
 0x349   : > { %v1877_v42 = vpop.f32.mrf.mxu0  ;;  %v1918_v43 = vpop.f32.mrf.mxu1 }
 0x34a   : > { %v1878_v44 = vadd.f32 %v1877_v42, %v5739_v39  ;;  %v1919_v45 = vadd.f32 %v1918_v43, %v5741_v41 }
 0x34b   : > { %v1879_v55 = vpop.f32.mrf.mxu0  ;;  %v1920_v59 = vpop.f32.mrf.mxu1 }
 0x34c   : > { %v1927_v61 = vcombine.low %v1876_v31, %v1878_v44  ;;  %v1928_v62 = vcombine.low %v1917_v32, %v1919_v45 }
 0x34d   : > { %v1880_v63 = vpop.f32.mrf.mxu0  ;;  %v1921_v33 = vpop.f32.mrf.mxu1 }
 0x34e   : > { %v1935_v0 = vrot.slane %v1927_v61, %v5750_v48  ;;  %v1942_v34 = vrot.slane %v1928_v62, %v5750_v48 }
 0x350   : > { %v1943_v1 = vcombine.low %v1935_v0, %v1942_v34 }
 0x352   : > { %1946 = vst [vmem:[#allocation3 + $0x18] sm:$0xff] %v1943_v1 }
 0x367   : > { %v1984_v36 = vpop.f32.mrf.mxu0  ;;  %v2025_v37 = vpop.f32.mrf.mxu1 }
 0x368   : > { %v1985_v3 = vadd.f32 %v1984_v36, %v5733_v5  ;;  %v2026_v38 = vadd.f32 %v2025_v37, %v5735_v6 }
 0x369   : > { %v1986_v4 = vpop.f32.mrf.mxu0  ;;  %v2027_v40 = vpop.f32.mrf.mxu1 }
 0x36a   : > { %v1987_v2 = vadd.f32 %v1986_v4, %v5739_v39  ;;  %v2028_v7 = vadd.f32 %v2027_v40, %v5741_v41 }
 0x36b   : > { %v1988_v8 = vpop.f32.mrf.mxu0  ;;  %v2029_v46 = vpop.f32.mrf.mxu1 }
 0x36c   : > { %v2036_v56 = vcombine.low %v1985_v3, %v1987_v2  ;;  %v2037_v47 = vcombine.low %v2026_v38, %v2028_v7 }
 0x36d   : > { %v1989_v57 = vpop.f32.mrf.mxu0  ;;  %v2030_v49 = vpop.f32.mrf.mxu1 }
 0x36e   : > { %v2044_v50 = vrot.slane %v2036_v56, %v5750_v48  ;;  %v2051_v60 = vrot.slane %v2037_v47, %v5750_v48 }
 0x370   : > { %v2052_v51 = vcombine.low %v2044_v50, %v2051_v60 }
 0x372   : > { %2055 = vst [vmem:[#allocation3 + $0x10] sm:$0xff] %v2052_v51 }
 0x387   : > { %v2093_v35 = vpop.f32.mrf.mxu0  ;;  %v2134_v9 = vpop.f32.mrf.mxu1 }
 0x388   : > { %v2094_v10 = vadd.f32 %v2093_v35, %v5733_v5  ;;  %v2135_v52 = vadd.f32 %v2134_v9, %v5735_v6 }
 0x389   : > { %v2095_v53 = vpop.f32.mrf.mxu0  ;;  %v2136_v54 = vpop.f32.mrf.mxu1 }
 0x38a   : > { %v2096_v58 = vadd.f32 %v2095_v53, %v5739_v39  ;;  %v2137_v11 = vadd.f32 %v2136_v54, %v5741_v41 }
 0x38b   : > { %v2097_v12 = vpop.f32.mrf.mxu0  ;;  %v2138_v13 = vpop.f32.mrf.mxu1 }
 0x38c   : > { %v2145_v14 = vcombine.low %v2094_v10, %v2096_v58  ;;  %v2146_v15 = vcombine.low %v2135_v52, %v2137_v11 }
 0x38d   : > { %v2098_v16 = vpop.f32.mrf.mxu0  ;;  %v2139_v17 = vpop.f32.mrf.mxu1 }
 0x38e   : > { %v2153_v18 = vrot.slane %v2145_v14, %v5750_v48  ;;  %v2160_v19 = vrot.slane %v2146_v15, %v5750_v48 }
 0x390   : > { %v2161_v20 = vcombine.low %v2153_v18, %v2160_v19 }
 0x392   : > { %2164 = vst [vmem:[#allocation3 + $0x8] sm:$0xff] %v2161_v20 }
 0x3a7   : > { %v2202_v21 = vpop.f32.mrf.mxu0  ;;  %v2243_v22 = vpop.f32.mrf.mxu1 }
 0x3a8   : > { %v2203_v23 = vadd.f32 %v2202_v21, %v5733_v5  ;;  %v2244_v24 = vadd.f32 %v2243_v22, %v5735_v6 }
 0x3a9   : > { %v2204_v25 = vpop.f32.mrf.mxu0  ;;  %v2245_v26 = vpop.f32.mrf.mxu1 }
 0x3aa   : > { %v2205_v27 = vadd.f32 %v2204_v25, %v5739_v39  ;;  %v2246_v28 = vadd.f32 %v2245_v26, %v5741_v41 }
 0x3ab   : > { %v2206_v29 = vpop.f32.mrf.mxu0  ;;  %v2247_v30 = vpop.f32.mrf.mxu1 }
 0x3ac   : > { %v2254_v31 = vcombine.low %v2203_v23, %v2205_v27  ;;  %v2255_v32 = vcombine.low %v2244_v24, %v2246_v28 }
 0x3ad   : > { %v2207_v42 = vpop.f32.mrf.mxu0  ;;  %v2248_v43 = vpop.f32.mrf.mxu1 }
 0x3ae   : > { %v2262_v44 = vrot.slane %v2254_v31, %v5750_v48  ;;  %v2269_v45 = vrot.slane %v2255_v32, %v5750_v48 }
 0x3b0   : > { %v2270_v55 = vcombine.low %v2262_v44, %v2269_v45 }
 0x3b2   : > { %2273 = vst [vmem:[#allocation3 + $0x20] sm:$0xff] %v2270_v55 }
 0x3c7   : > { %v2311_v59 = vpop.f32.mrf.mxu0  ;;  %v2352_v61 = vpop.f32.mrf.mxu1 }
 0x3c8   : > { %v2312_v62 = vadd.f32 %v2311_v59, %v5733_v5  ;;  %v2353_v63 = vadd.f32 %v2352_v61, %v5735_v6 }
 0x3c9   : > { %v2313_v33 = vpop.f32.mrf.mxu0  ;;  %v2354_v0 = vpop.f32.mrf.mxu1 }
 0x3ca   : > { %v2314_v34 = vadd.f32 %v2313_v33, %v5739_v39  ;;  %v2355_v1 = vadd.f32 %v2354_v0, %v5741_v41 }
 0x3cb   : > { %v2315_v36 = vpop.f32.mrf.mxu0  ;;  %v2356_v37 = vpop.f32.mrf.mxu1 }
 0x3cc   : > { %v2363_v3 = vcombine.low %v2312_v62, %v2314_v34  ;;  %v2364_v38 = vcombine.low %v2353_v63, %v2355_v1 }
 0x3cd   : > { %v2316_v4 = vpop.f32.mrf.mxu0  ;;  %v2357_v40 = vpop.f32.mrf.mxu1 }
 0x3ce   : > { %v2371_v2 = vrot.slane %v2363_v3, %v5750_v48  ;;  %v2378_v7 = vrot.slane %v2364_v38, %v5750_v48 }
 0x3d0   : > { %v2379_v8 = vcombine.low %v2371_v2, %v2378_v7 }
 0x3d2   : > { %2382 = vst [vmem:[#allocation3 + $0x28] sm:$0xff] %v2379_v8 }
 0x3e7   : > { %v2420_v46 = vpop.f32.mrf.mxu0  ;;  %v2461_v56 = vpop.f32.mrf.mxu1 }
 0x3e8   : > { %v2421_v49 = vadd.f32 %v2420_v46, %v5733_v5  ;;  %v2462_v50 = vadd.f32 %v2461_v56, %v5735_v6 }
 0x3e9   : > { %v2422_v47 = vpop.f32.mrf.mxu0  ;;  %v2463_v57 = vpop.f32.mrf.mxu1 }
 0x3ea   : > { %v2423_v60 = vadd.f32 %v2422_v47, %v5739_v39  ;;  %v2464_v51 = vadd.f32 %v2463_v57, %v5741_v41 }
 0x3eb   : > { %v2424_v35 = vpop.f32.mrf.mxu0  ;;  %v2465_v9 = vpop.f32.mrf.mxu1 }
 0x3ec   : > { %v2472_v10 = vcombine.low %v2421_v49, %v2423_v60  ;;  %v2473_v52 = vcombine.low %v2462_v50, %v2464_v51 }
 0x3ed   : > { %v2425_v53 = vpop.f32.mrf.mxu0  ;;  %v2466_v54 = vpop.f32.mrf.mxu1 }
 0x3ee   : > { %v2480_v58 = vrot.slane %v2472_v10, %v5750_v48  ;;  %v2487_v11 = vrot.slane %v2473_v52, %v5750_v48 }
 0x3f0   : > { %v2488_v12 = vcombine.low %v2480_v58, %v2487_v11 }
 0x3f2   : > { %2491 = vst [vmem:[#allocation3 + $0x38] sm:$0xff] %v2488_v12 }
 0x3f3 PF: > { %v5826_v5 = vld [vmem:[%s4932_s16 + $0xe4] ss:$16 sps:$4 sm:$0xff]   ;;  %v5829_v6 = vld [vmem:[%s4932_s16 + $0xec] ss:$16 sps:$4 sm:$0xff]   ;;  %v4747_v39 = vmov 0   ;;  %v4748_v41 = vmov 0.0   ;;  %v2780_v36 = vlaneseq }
 0x3f4   : > { %2721 = vmatprep.mubr.bf16.mxu0 %v4747_v39  ;;  %2762 = vmatprep.mubr.bf16.mxu1 %v4747_v39  ;;  %2492 = vst [vmem:[#allocation4] sm:$0x3] %v4748_v41  ;;  %2493 = vst [vmem:[#allocation5] sm:$0x3] %v4748_v41  ;;  %v5835_v48 = vld [vmem:[%s4932_s16 + $0xe0] ss:$16 sps:$4 sm:$0xff]  }
 0x3f5   : > { %2689 = vmatprep.subr.bf16.mxu0 %v5826_v5  ;;  %v5838_v13 = vld [vmem:[%s4932_s16 + $0xe8] ss:$16 sps:$4 sm:$0xff]   ;;  %2730 = vmatprep.subr.bf16.mxu1 %v5829_v6  ;;  %v5842_v14 = vld [vmem:[%s4932_s16 + $0xc4] ss:$16 sps:$4 sm:$0xff]   ;;  %v5847_v15 = vld [vmem:[%s4932_s16 + $0xcc] ss:$16 sps:$4 sm:$0xff]  }
 0x3f6   : > { %2690 = vmatpush1.bf16.msra.mxu0 %v5835_v48  ;;  %2731 = vmatpush1.bf16.msra.mxu1 %v5838_v13  ;;  %v5850_v16 = vld [vmem:[%s4932_s16 + $0xc0] ss:$16 sps:$4 sm:$0xff]   ;;  %v5854_v17 = vld [vmem:[%s4932_s16 + $0xc8] ss:$16 sps:$4 sm:$0xff]   ;;  %v5858_v18 = vld [vmem:[%s4932_s16 + $0xa4] ss:$16 sps:$4 sm:$0xff]  }
 0x3f7   : > { %2691 = vmatprep.subr.bf16.mxu0 %v5842_v14  ;;  %2732 = vmatprep.subr.bf16.mxu1 %v5847_v15  ;;  %v5861_v19 = vld [vmem:[%s4932_s16 + $0xac] ss:$16 sps:$4 sm:$0xff]   ;;  %v5864_v20 = vld [vmem:[%s4932_s16 + $0xa0] ss:$16 sps:$4 sm:$0xff]   ;;  %v5867_v21 = vld [vmem:[%s4932_s16 + $0xa8] ss:$16 sps:$4 sm:$0xff]  }
 0x3f8   : > { %v5872_v22 = vld [vmem:[%s4932_s16 + $0x84] ss:$16 sps:$4 sm:$0xff]   ;;  %v5877_v23 = vld [vmem:[%s4932_s16 + $0x8c] ss:$16 sps:$4 sm:$0xff]   ;;  %v5880_v24 = vld [vmem:[%s4932_s16 + $0x80] ss:$16 sps:$4 sm:$0xff]  }
 0x3f9   : > { %v5885_v25 = vld [vmem:[%s4932_s16 + $0x88] ss:$16 sps:$4 sm:$0xff]   ;;  %v5888_v26 = vld [vmem:[%s4932_s16 + $0x64] ss:$16 sps:$4 sm:$0xff]   ;;  %v5893_v27 = vld [vmem:[%s4932_s16 + $0x6c] ss:$16 sps:$4 sm:$0xff]  }
 0x3fa   : > { %2692 = vmatpush1.bf16.msra.mxu0 %v5850_v16  ;;  %2733 = vmatpush1.bf16.msra.mxu1 %v5854_v17  ;;  %v5896_v28 = vld [vmem:[%s4932_s16 + $0x60] ss:$16 sps:$4 sm:$0xff]   ;;  %v5899_v29 = vld [vmem:[%s4932_s16 + $0x68] ss:$16 sps:$4 sm:$0xff]   ;;  %v5904_v30 = vld [vmem:[%s4932_s16 + $0x44] ss:$16 sps:$4 sm:$0xff]  }
 0x3fb   : > { %2693 = vmatprep.subr.bf16.mxu0 %v5858_v18  ;;  %2734 = vmatprep.subr.bf16.mxu1 %v5861_v19  ;;  %v5909_v31 = vld [vmem:[%s4932_s16 + $0x4c] ss:$16 sps:$4 sm:$0xff]   ;;  %v5914_v32 = vld [vmem:[%s4932_s16 + $0x40] ss:$16 sps:$4 sm:$0xff]   ;;  %v5917_v42 = vld [vmem:[%s4932_s16 + $0x48] ss:$16 sps:$4 sm:$0xff]  }
 0x3fc   : > { %v5922_v43 = vld [vmem:[%s4932_s16 + $0x24] ss:$16 sps:$4 sm:$0xff]   ;;  %v5925_v44 = vld [vmem:[%s4932_s16 + $0x2c] ss:$16 sps:$4 sm:$0xff]   ;;  %v5930_v45 = vld [vmem:[%s4932_s16 + $0x20] ss:$16 sps:$4 sm:$0xff]  }
 0x3fd   : > { %v5933_v55 = vld [vmem:[%s4932_s16 + $0x28] ss:$16 sps:$4 sm:$0xff]   ;;  %v5938_v59 = vld [vmem:[%s4932_s16 + $0x4] ss:$16 sps:$4 sm:$0xff]   ;;  %v5941_v61 = vld [vmem:[%s4932_s16 + $0xc] ss:$16 sps:$4 sm:$0xff]  }
 0x3fe   : > { %2694 = vmatpush1.bf16.msra.mxu0 %v5864_v20  ;;  %2735 = vmatpush1.bf16.msra.mxu1 %v5867_v21  ;;  %v5946_v62 = vld [vmem:[%s4932_s16] ss:$16 sps:$4 sm:$0xff]   ;;  %v5949_v63 = vld [vmem:[%s4932_s16 + $0x8] ss:$16 sps:$4 sm:$0xff]   ;;  %v2526_v33 = vld [vmem:[#allocation4] sm:$0x3] }
 0x3ff   : > { %2695 = vmatprep.subr.bf16.mxu0 %v5872_v22  ;;  %2736 = vmatprep.subr.bf16.mxu1 %v5877_v23  ;;  %v2528_v0 = vpack.c.bf16 %v2526_v33, %v2526_v33  ;;  %v4749_v34 = vmov 1983009808   ;;  %v2781_v3 = vshrl.u32 %v2780_v36, 7  ;;  %v2527_v50 = vld [vmem:[#allocation3 + $0x30] sm:$0xff]  ;;  %v2820_v36 = vld [vmem:[#allocation5] sm:$0x3] }
 0x400   : > { %v2778_v1 = vunpack.c.l.s4 %v4749_v34  ;;  %p4196_p4 = scmp.ne.s32.totalorder %s4807_s25, 2 }
 0x402   : > { %2696 = vmatpush1.bf16.msra.mxu0 %v5880_v24  ;;  %2737 = vmatpush1.bf16.msra.mxu1 %v5885_v25  ;;  %v2779_v37 = vunpack.c.0.s8 %v2778_v1 }
 0x403   : > { %2697 = vmatprep.subr.bf16.mxu0 %v5888_v26  ;;  %2738 = vmatprep.subr.bf16.mxu1 %v5893_v27 }
 0x404   : > { %v5991_v40 = vsub.s32 %v2779_v37, %v2781_v3 }
 0x406   : > { %2698 = vmatpush1.bf16.msra.mxu0 %v5896_v28  ;;  %2739 = vmatpush1.bf16.msra.mxu1 %v5899_v29 }
 0x407   : > { %2699 = vmatprep.subr.bf16.mxu0 %v5904_v30  ;;  %2740 = vmatprep.subr.bf16.mxu1 %v5909_v31 }
 0x40a   : > { %2700 = vmatpush1.bf16.msra.mxu0 %v5914_v32  ;;  %2741 = vmatpush1.bf16.msra.mxu1 %v5917_v42 }
 0x40b   : > { %2701 = vmatprep.subr.bf16.mxu0 %v5922_v43  ;;  %2742 = vmatprep.subr.bf16.mxu1 %v5925_v44 }
 0x40e   : > { %2702 = vmatpush1.bf16.msra.mxu0 %v5930_v45  ;;  %2743 = vmatpush1.bf16.msra.mxu1 %v5933_v55 }
 0x40f   : > { %2703 = vmatprep.subr.bf16.mxu0 %v5938_v59  ;;  %2744 = vmatprep.subr.bf16.mxu1 %v5941_v61 }
 0x412   : > { %2704 = vmatpush1.bf16.msra.mxu0 %v5946_v62  ;;  %2745 = vmatpush1.bf16.msra.mxu1 %v5949_v63 }
 0x413   : > { %2833 = vmatprep.subr.bf16.mxu0 %v5826_v5  ;;  %2874 = vmatprep.subr.bf16.mxu1 %v5829_v6 }
 0x415   : > { %2722 = vmatmul.mubr.bf16.vlgmr.msra.gmra.mxu0 %v2528_v0  ;;  %2763 = vmatmul.mubr.bf16.vlgmr.msra.gmra.mxu1 %v2528_v0 }
 0x416   : > { %2834 = vmatpush1.bf16.msra.mxu0 %v5835_v48  ;;  %2875 = vmatpush1.bf16.msra.mxu1 %v5838_v13 }
 0x417   : > { %2835 = vmatprep.subr.bf16.mxu0 %v5842_v14  ;;  %2876 = vmatprep.subr.bf16.mxu1 %v5847_v15 }
 0x418   : > { %2865 = vmatprep.mubr.bf16.mxu0 %v4747_v39  ;;  %2906 = vmatprep.mubr.bf16.mxu1 %v4747_v39 }
 0x41a   : > { %2836 = vmatpush1.bf16.msra.mxu0 %v5850_v16  ;;  %2877 = vmatpush1.bf16.msra.mxu1 %v5854_v17 }
 0x41b   : > { %2837 = vmatprep.subr.bf16.mxu0 %v5858_v18  ;;  %2878 = vmatprep.subr.bf16.mxu1 %v5861_v19 }
 0x41e   : > { %2838 = vmatpush1.bf16.msra.mxu0 %v5864_v20  ;;  %2879 = vmatpush1.bf16.msra.mxu1 %v5867_v21 }
 0x41f   : > { %2839 = vmatprep.subr.bf16.mxu0 %v5872_v22  ;;  %2880 = vmatprep.subr.bf16.mxu1 %v5877_v23 }
 0x422   : > { %2840 = vmatpush1.bf16.msra.mxu0 %v5880_v24  ;;  %2881 = vmatpush1.bf16.msra.mxu1 %v5885_v25 }
 0x423   : > { %2841 = vmatprep.subr.bf16.mxu0 %v5888_v26  ;;  %2882 = vmatprep.subr.bf16.mxu1 %v5893_v27 }
 0x426   : > { %2842 = vmatpush1.bf16.msra.mxu0 %v5896_v28  ;;  %2883 = vmatpush1.bf16.msra.mxu1 %v5899_v29 }
 0x427   : > { %2843 = vmatprep.subr.bf16.mxu0 %v5904_v30  ;;  %2884 = vmatprep.subr.bf16.mxu1 %v5909_v31 }
 0x42a   : > { %2844 = vmatpush1.bf16.msra.mxu0 %v5914_v32  ;;  %2885 = vmatpush1.bf16.msra.mxu1 %v5917_v42 }
 0x42b   : > { %2845 = vmatprep.subr.bf16.mxu0 %v5922_v43  ;;  %2886 = vmatprep.subr.bf16.mxu1 %v5925_v44 }
 0x42e   : > { %2846 = vmatpush1.bf16.msra.mxu0 %v5930_v45  ;;  %2887 = vmatpush1.bf16.msra.mxu1 %v5933_v55 }
 0x42f   : > { %2847 = vmatprep.subr.bf16.mxu0 %v5938_v59  ;;  %2888 = vmatprep.subr.bf16.mxu1 %v5941_v61 }
 0x432   : > { %2848 = vmatpush1.bf16.msra.mxu0 %v5946_v62  ;;  %2889 = vmatpush1.bf16.msra.mxu1 %v5949_v63 }
 0x433   : > { %2978 = vmatprep.subr.bf16.mxu0 %v5826_v5  ;;  %3019 = vmatprep.subr.bf16.mxu1 %v5829_v6 }
 0x4d5   : > { %v2723_v38 = vpop.f32.mrf.mxu0  ;;  %v2764_v4 = vpop.f32.mrf.mxu1 }
 0x4d7   : > { %v2725_v2 = vpop.f32.mrf.mxu0  ;;  %v2766_v7 = vpop.f32.mrf.mxu1 }
 0x4d8   : > { %v2775_v8 = vcombine.low %v2723_v38, %v2725_v2  ;;  %v2776_v46 = vcombine.low %v2764_v4, %v2766_v7 }
 0x4d9   : > { %v2727_v56 = vpop.f32.mrf.mxu0  ;;  %v2768_v47 = vpop.f32.mrf.mxu1 }
 0x4da   : > { %v2783_v57 = vrot.slane %v2775_v8, %v5991_v40  ;;  %v2790_v49 = vrot.slane %v2776_v46, %v5991_v40 }
 0x4db   : > { %v2728_v60 = vpop.f32.mrf.mxu0  ;;  %v2769_v51 = vpop.f32.mrf.mxu1 }
 0x4dc   : > { %v2791_v35 = vcombine.low %v2783_v57, %v2790_v49 }
 0x4de   : > { %v2793_v9 = vadd.f32 %v2791_v35, %v2527_v50 }
 0x4e0   : > { %v4172_v10 = vmul.f32 -1.442695, %v2793_v9  ;;  %v2801_v52 = vrot.slane %v2793_v9, 2  ;;  %v2812_v54 = vrot.slane %v2793_v9, 6  ;;  %v2809_v12 = vrot.slane %v2793_v9, 4 }
 0x4e2   : > { %4447 = vpow2.f32 %v4172_v10  ;;  %v4173_v53 = vmul.f32 -1.442695, %v2801_v52  ;;  %v4174_v58 = vmul.f32 -1.442695, %v2812_v54 }
 0x4e4   : > { %4449 = vpow2.f32 %v4173_v53 }
 0x4e5   : > { %4451 = vpow2.f32 %v4174_v58  ;;  %v2831_v58 = vld [vmem:[#allocation3] sm:$0xff] }
 0x4ef   : > { %v4448_v11 = vpop.eup %4447 }
 0x4f0   : > { %v2797_v41 = vadd.f32 1.0, %v4448_v11 }
 0x4f1   : > { %v4450_v33 = vpop.eup %4449 }
 0x4f2   : > { %4453 = vrcp.f32 %v2797_v41  ;;  %v2806_v0 = vadd.f32 1.0, %v4450_v33  ;;  %v4452_v34 = vpop.eup %4451 }
 0x4f3   : > { %4455 = vtanh.f32 %v2809_v12  ;;  %v2817_v38 = vadd.f32 1.0, %v4452_v34 }
 0x4f4   : > { %4457 = vrcp.f32 %v2806_v0 }
 0x4f5   : > { %4459 = vrcp.f32 %v2817_v38 }
 0x4ff   : > { %v4454_v1 = vpop.eup %4453 }
 0x500   : > { %v4456_v37 = vpop.eup %4455 }
 0x501   : > { %v4458_v3 = vpop.eup %4457  ;;  %v2822_v2 = vmul.f32 %v4456_v37, %v4454_v1 }
 0x502   : > { %v2821_v4 = vmul.f32 %v4458_v3, %v2820_v36  ;;  %v4460_v8 = vpop.eup %4459 }
 0x504   : > { %v2823_v7 = vadd.f32 %v2822_v2, %v2821_v4 }
 0x506   : > { %4461 = vtanh.f32 %v2823_v7  ;;  %2826 = vst [vmem:[#allocation5] sm:$0x3] %v2823_v7 }
 0x513   : > { %v4462_v46 = vpop.eup %4461 }
 0x514   : > { %v2825_v56 = vmul.f32 %v4462_v46, %v4460_v8 }
 0x516   : > { %2827 = vst [vmem:[#allocation4] sm:$0x3] %v2825_v56  ;;  %2828 = vst [vmem:[#allocation2] sm:$0x3] %v2825_v56 }
 0x51d   : > { %v2829_v47 = vld [vmem:[#allocation4] sm:$0x3] }
 0x51e   : > { %v2832_v57 = vpack.c.bf16 %v2829_v47, %v2829_v47 }
 0x520   : > { %2866 = vmatmul.mubr.bf16.vlgmr.msra.gmra.mxu0 %v2832_v57  ;;  %2907 = vmatmul.mubr.bf16.vlgmr.msra.gmra.mxu1 %v2832_v57 }
 0x521   : > { %2979 = vmatpush1.bf16.msra.mxu0 %v5835_v48  ;;  %3020 = vmatpush1.bf16.msra.mxu1 %v5838_v13 }
 0x522   : > { %2980 = vmatprep.subr.bf16.mxu0 %v5842_v14  ;;  %3021 = vmatprep.subr.bf16.mxu1 %v5847_v15 }
 0x523   : > { %3010 = vmatprep.mubr.bf16.mxu0 %v4747_v39  ;;  %3051 = vmatprep.mubr.bf16.mxu1 %v4747_v39 }
 0x525   : > { %2981 = vmatpush1.bf16.msra.mxu0 %v5850_v16  ;;  %3022 = vmatpush1.bf16.msra.mxu1 %v5854_v17 }
 0x526   : > { %2982 = vmatprep.subr.bf16.mxu0 %v5858_v18  ;;  %3023 = vmatprep.subr.bf16.mxu1 %v5861_v19 }
 0x529   : > { %2983 = vmatpush1.bf16.msra.mxu0 %v5864_v20  ;;  %3024 = vmatpush1.bf16.msra.mxu1 %v5867_v21 }
 0x52a   : > { %2984 = vmatprep.subr.bf16.mxu0 %v5872_v22  ;;  %3025 = vmatprep.subr.bf16.mxu1 %v5877_v23 }
 0x52d   : > { %2985 = vmatpush1.bf16.msra.mxu0 %v5880_v24  ;;  %3026 = vmatpush1.bf16.msra.mxu1 %v5885_v25 }
 0x52e   : > { %2986 = vmatprep.subr.bf16.mxu0 %v5888_v26  ;;  %3027 = vmatprep.subr.bf16.mxu1 %v5893_v27 }
 0x531   : > { %2987 = vmatpush1.bf16.msra.mxu0 %v5896_v28  ;;  %3028 = vmatpush1.bf16.msra.mxu1 %v5899_v29 }
 0x532   : > { %2988 = vmatprep.subr.bf16.mxu0 %v5904_v30  ;;  %3029 = vmatprep.subr.bf16.mxu1 %v5909_v31 }
 0x535   : > { %2989 = vmatpush1.bf16.msra.mxu0 %v5914_v32  ;;  %3030 = vmatpush1.bf16.msra.mxu1 %v5917_v42 }
 0x536   : > { %2990 = vmatprep.subr.bf16.mxu0 %v5922_v43  ;;  %3031 = vmatprep.subr.bf16.mxu1 %v5925_v44 }
 0x539   : > { %2991 = vmatpush1.bf16.msra.mxu0 %v5930_v45  ;;  %3032 = vmatpush1.bf16.msra.mxu1 %v5933_v55 }
 0x53a   : > { %2992 = vmatprep.subr.bf16.mxu0 %v5938_v59  ;;  %3033 = vmatprep.subr.bf16.mxu1 %v5941_v61 }
 0x53d   : > { %2993 = vmatpush1.bf16.msra.mxu0 %v5946_v62  ;;  %3034 = vmatpush1.bf16.msra.mxu1 %v5949_v63 }
 0x53e   : > { %3123 = vmatprep.subr.bf16.mxu0 %v5826_v5  ;;  %3164 = vmatprep.subr.bf16.mxu1 %v5829_v6 }
 0x5e0   : > { %v2867_v49 = vpop.f32.mrf.mxu0  ;;  %v2908_v50 = vpop.f32.mrf.mxu1 }
 0x5e2   : > { %v2869_v60 = vpop.f32.mrf.mxu0  ;;  %v2910_v51 = vpop.f32.mrf.mxu1 }
 0x5e3   : > { %v2919_v35 = vcombine.low %v2867_v49, %v2869_v60  ;;  %v2920_v9 = vcombine.low %v2908_v50, %v2910_v51  ;;  %v2964_v49 = vld [vmem:[#allocation5] sm:$0x3] }
 0x5e4   : > { %v2871_v10 = vpop.f32.mrf.mxu0  ;;  %v2912_v52 = vpop.f32.mrf.mxu1 }
 0x5e5   : > { %v2927_v53 = vrot.slane %v2919_v35, %v5991_v40  ;;  %v2934_v54 = vrot.slane %v2920_v9, %v5991_v40 }
 0x5e6   : > { %v2872_v11 = vpop.f32.mrf.mxu0  ;;  %v2913_v12 = vpop.f32.mrf.mxu1 }
 0x5e7   : > { %v2935_v41 = vcombine.low %v2927_v53, %v2934_v54 }
 0x5e9   : > { %v2937_v33 = vadd.f32 %v2935_v41, %v2831_v58 }
 0x5eb   : > { %v4175_v0 = vmul.f32 -1.442695, %v2937_v33  ;;  %v2945_v34 = vrot.slane %v2937_v33, 2  ;;  %v2956_v36 = vrot.slane %v2937_v33, 6  ;;  %v2953_v38 = vrot.slane %v2937_v33, 4 }
 0x5ed   : > { %4463 = vpow2.f32 %v4175_v0  ;;  %v4176_v1 = vmul.f32 -1.442695, %v2945_v34  ;;  %v4177_v37 = vmul.f32 -1.442695, %v2956_v36 }
 0x5ef   : > { %4465 = vpow2.f32 %v4176_v1 }
 0x5f0   : > { %4467 = vpow2.f32 %v4177_v37  ;;  %v2976_v37 = vld [vmem:[#allocation3 + $0x18] sm:$0xff] }
 0x5fa   : > { %v4464_v3 = vpop.eup %4463 }
 0x5fb   : > { %v2941_v4 = vadd.f32 1.0, %v4464_v3 }
 0x5fc   : > { %v4466_v2 = vpop.eup %4465 }
 0x5fd   : > { %4469 = vrcp.f32 %v2941_v4  ;;  %v2950_v7 = vadd.f32 1.0, %v4466_v2  ;;  %v4468_v8 = vpop.eup %4467 }
 0x5fe   : > { %4471 = vtanh.f32 %v2953_v38  ;;  %v2961_v57 = vadd.f32 1.0, %v4468_v8 }
 0x5ff   : > { %4473 = vrcp.f32 %v2950_v7 }
 0x600   : > { %4475 = vrcp.f32 %v2961_v57 }
 0x60a   : > { %v4470_v46 = vpop.eup %4469 }
 0x60b   : > { %v4472_v56 = vpop.eup %4471 }
 0x60c   : > { %v4474_v47 = vpop.eup %4473  ;;  %v2966_v60 = vmul.f32 %v4472_v56, %v4470_v46 }
 0x60d   : > { %v2965_v50 = vmul.f32 %v4474_v47, %v2964_v49  ;;  %v4476_v35 = vpop.eup %4475 }
 0x60f   : > { %v2967_v51 = vadd.f32 %v2966_v60, %v2965_v50 }
 0x611   : > { %4477 = vtanh.f32 %v2967_v51  ;;  %2970 = vst [vmem:[#allocation5] sm:$0x3] %v2967_v51 }
 0x61e   : > { %v4478_v9 = vpop.eup %4477 }
 0x61f   : > { %v2969_v10 = vmul.f32 %v4478_v9, %v4476_v35 }
 0x621   : > { %2971 = vst [vmem:[#allocation4] sm:$0x3] %v2969_v10  ;;  %2973 = vst [vmem:[#allocation2 + $0x2] sm:$0x3] %v2969_v10 }
 0x628   : > { %v2974_v52 = vld [vmem:[#allocation4] sm:$0x3] }
 0x629   : > { %v2977_v53 = vpack.c.bf16 %v2974_v52, %v2974_v52 }
 0x62b   : > { %3011 = vmatmul.mubr.bf16.vlgmr.msra.gmra.mxu0 %v2977_v53  ;;  %3052 = vmatmul.mubr.bf16.vlgmr.msra.gmra.mxu1 %v2977_v53 }
 0x62c   : > { %3124 = vmatpush1.bf16.msra.mxu0 %v5835_v48  ;;  %3165 = vmatpush1.bf16.msra.mxu1 %v5838_v13 }
 0x62d   : > { %3125 = vmatprep.subr.bf16.mxu0 %v5842_v14  ;;  %3166 = vmatprep.subr.bf16.mxu1 %v5847_v15 }
 0x62e   : > { %3155 = vmatprep.mubr.bf16.mxu0 %v4747_v39  ;;  %3196 = vmatprep.mubr.bf16.mxu1 %v4747_v39 }
 0x630   : > { %3126 = vmatpush1.bf16.msra.mxu0 %v5850_v16  ;;  %3167 = vmatpush1.bf16.msra.mxu1 %v5854_v17 }
 0x631   : > { %3127 = vmatprep.subr.bf16.mxu0 %v5858_v18  ;;  %3168 = vmatprep.subr.bf16.mxu1 %v5861_v19 }
 0x634   : > { %3128 = vmatpush1.bf16.msra.mxu0 %v5864_v20  ;;  %3169 = vmatpush1.bf16.msra.mxu1 %v5867_v21 }
 0x635   : > { %3129 = vmatprep.subr.bf16.mxu0 %v5872_v22  ;;  %3170 = vmatprep.subr.bf16.mxu1 %v5877_v23 }
 0x638   : > { %3130 = vmatpush1.bf16.msra.mxu0 %v5880_v24  ;;  %3171 = vmatpush1.bf16.msra.mxu1 %v5885_v25 }
 0x639   : > { %3131 = vmatprep.subr.bf16.mxu0 %v5888_v26  ;;  %3172 = vmatprep.subr.bf16.mxu1 %v5893_v27 }
 0x63c   : > { %3132 = vmatpush1.bf16.msra.mxu0 %v5896_v28  ;;  %3173 = vmatpush1.bf16.msra.mxu1 %v5899_v29 }
 0x63d   : > { %3133 = vmatprep.subr.bf16.mxu0 %v5904_v30  ;;  %3174 = vmatprep.subr.bf16.mxu1 %v5909_v31 }
 0x640   : > { %3134 = vmatpush1.bf16.msra.mxu0 %v5914_v32  ;;  %3175 = vmatpush1.bf16.msra.mxu1 %v5917_v42 }
 0x641   : > { %3135 = vmatprep.subr.bf16.mxu0 %v5922_v43  ;;  %3176 = vmatprep.subr.bf16.mxu1 %v5925_v44 }
 0x644   : > { %3136 = vmatpush1.bf16.msra.mxu0 %v5930_v45  ;;  %3177 = vmatpush1.bf16.msra.mxu1 %v5933_v55 }
 0x645   : > { %3137 = vmatprep.subr.bf16.mxu0 %v5938_v59  ;;  %3178 = vmatprep.subr.bf16.mxu1 %v5941_v61 }
 0x648   : > { %3138 = vmatpush1.bf16.msra.mxu0 %v5946_v62  ;;  %3179 = vmatpush1.bf16.msra.mxu1 %v5949_v63 }
 0x649   : > { %3268 = vmatprep.subr.bf16.mxu0 %v5826_v5  ;;  %3309 = vmatprep.subr.bf16.mxu1 %v5829_v6 }
 0x6eb   : > { %v3012_v54 = vpop.f32.mrf.mxu0  ;;  %v3053_v58 = vpop.f32.mrf.mxu1 }
 0x6ed   : > { %v3014_v11 = vpop.f32.mrf.mxu0  ;;  %v3055_v12 = vpop.f32.mrf.mxu1 }
 0x6ee   : > { %v3064_v41 = vcombine.low %v3012_v54, %v3014_v11  ;;  %v3065_v33 = vcombine.low %v3053_v58, %v3055_v12  ;;  %v3109_v54 = vld [vmem:[#allocation5] sm:$0x3] }
 0x6ef   : > { %v3016_v0 = vpop.f32.mrf.mxu0  ;;  %v3057_v34 = vpop.f32.mrf.mxu1 }
 0x6f0   : > { %v3072_v1 = vrot.slane %v3064_v41, %v5991_v40  ;;  %v3079_v36 = vrot.slane %v3065_v33, %v5991_v40 }
 0x6f1   : > { %v3017_v3 = vpop.f32.mrf.mxu0  ;;  %v3058_v38 = vpop.f32.mrf.mxu1 }
 0x6f2   : > { %v3080_v4 = vcombine.low %v3072_v1, %v3079_v36 }
 0x6f4   : > { %v3082_v2 = vadd.f32 %v3080_v4, %v2976_v37 }
 0x6f6   : > { %v4178_v7 = vmul.f32 -1.442695, %v3082_v2  ;;  %v3090_v8 = vrot.slane %v3082_v2, 2  ;;  %v3101_v56 = vrot.slane %v3082_v2, 6  ;;  %v3098_v49 = vrot.slane %v3082_v2, 4 }
 0x6f8   : > { %4479 = vpow2.f32 %v4178_v7  ;;  %v4179_v46 = vmul.f32 -1.442695, %v3090_v8  ;;  %v4180_v47 = vmul.f32 -1.442695, %v3101_v56 }
 0x6fa   : > { %4481 = vpow2.f32 %v4179_v46 }
 0x6fb   : > { %4483 = vpow2.f32 %v4180_v47  ;;  %v3121_v47 = vld [vmem:[#allocation3 + $0x10] sm:$0xff] }
 0x705   : > { %v4480_v57 = vpop.eup %4479 }
 0x706   : > { %v3086_v50 = vadd.f32 1.0, %v4480_v57 }
 0x707   : > { %v4482_v60 = vpop.eup %4481 }
 0x708   : > { %4485 = vrcp.f32 %v3086_v50  ;;  %v3095_v51 = vadd.f32 1.0, %v4482_v60  ;;  %v4484_v35 = vpop.eup %4483 }
 0x709   : > { %4487 = vtanh.f32 %v3098_v49  ;;  %v3106_v53 = vadd.f32 1.0, %v4484_v35 }
 0x70a   : > { %4489 = vrcp.f32 %v3095_v51 }
 0x70b   : > { %4491 = vrcp.f32 %v3106_v53 }
 0x715   : > { %v4486_v9 = vpop.eup %4485 }
 0x716   : > { %v4488_v10 = vpop.eup %4487 }
 0x717   : > { %v4490_v52 = vpop.eup %4489  ;;  %v3111_v11 = vmul.f32 %v4488_v10, %v4486_v9 }
 0x718   : > { %v3110_v58 = vmul.f32 %v4490_v52, %v3109_v54  ;;  %v4492_v41 = vpop.eup %4491 }
 0x71a   : > { %v3112_v12 = vadd.f32 %v3111_v11, %v3110_v58 }
 0x71c   : > { %4493 = vtanh.f32 %v3112_v12  ;;  %3115 = vst [vmem:[#allocation5] sm:$0x3] %v3112_v12 }
 0x729   : > { %v4494_v33 = vpop.eup %4493 }
 0x72a   : > { %v3114_v0 = vmul.f32 %v4494_v33, %v4492_v41 }
 0x72c   : > { %3116 = vst [vmem:[#allocation4] sm:$0x3] %v3114_v0  ;;  %3118 = vst [vmem:[#allocation2 + $0x4] sm:$0x3] %v3114_v0 }
 0x733   : > { %v3119_v34 = vld [vmem:[#allocation4] sm:$0x3] }
 0x734   : > { %v3122_v1 = vpack.c.bf16 %v3119_v34, %v3119_v34 }
 0x736   : > { %3156 = vmatmul.mubr.bf16.vlgmr.msra.gmra.mxu0 %v3122_v1  ;;  %3197 = vmatmul.mubr.bf16.vlgmr.msra.gmra.mxu1 %v3122_v1 }
 0x737   : > { %3269 = vmatpush1.bf16.msra.mxu0 %v5835_v48  ;;  %3310 = vmatpush1.bf16.msra.mxu1 %v5838_v13 }
 0x738   : > { %3270 = vmatprep.subr.bf16.mxu0 %v5842_v14  ;;  %3311 = vmatprep.subr.bf16.mxu1 %v5847_v15 }
 0x739   : > { %3300 = vmatprep.mubr.bf16.mxu0 %v4747_v39  ;;  %3341 = vmatprep.mubr.bf16.mxu1 %v4747_v39 }
 0x73b   : > { %3271 = vmatpush1.bf16.msra.mxu0 %v5850_v16  ;;  %3312 = vmatpush1.bf16.msra.mxu1 %v5854_v17 }
 0x73c   : > { %3272 = vmatprep.subr.bf16.mxu0 %v5858_v18  ;;  %3313 = vmatprep.subr.bf16.mxu1 %v5861_v19 }
 0x73f   : > { %3273 = vmatpush1.bf16.msra.mxu0 %v5864_v20  ;;  %3314 = vmatpush1.bf16.msra.mxu1 %v5867_v21 }
 0x740   : > { %3274 = vmatprep.subr.bf16.mxu0 %v5872_v22  ;;  %3315 = vmatprep.subr.bf16.mxu1 %v5877_v23 }
 0x743   : > { %3275 = vmatpush1.bf16.msra.mxu0 %v5880_v24  ;;  %3316 = vmatpush1.bf16.msra.mxu1 %v5885_v25 }
 0x744   : > { %3276 = vmatprep.subr.bf16.mxu0 %v5888_v26  ;;  %3317 = vmatprep.subr.bf16.mxu1 %v5893_v27 }
 0x747   : > { %3277 = vmatpush1.bf16.msra.mxu0 %v5896_v28  ;;  %3318 = vmatpush1.bf16.msra.mxu1 %v5899_v29 }
 0x748   : > { %3278 = vmatprep.subr.bf16.mxu0 %v5904_v30  ;;  %3319 = vmatprep.subr.bf16.mxu1 %v5909_v31 }
 0x74b   : > { %3279 = vmatpush1.bf16.msra.mxu0 %v5914_v32  ;;  %3320 = vmatpush1.bf16.msra.mxu1 %v5917_v42 }
 0x74c   : > { %3280 = vmatprep.subr.bf16.mxu0 %v5922_v43  ;;  %3321 = vmatprep.subr.bf16.mxu1 %v5925_v44 }
 0x74f   : > { %3281 = vmatpush1.bf16.msra.mxu0 %v5930_v45  ;;  %3322 = vmatpush1.bf16.msra.mxu1 %v5933_v55 }
 0x750   : > { %3282 = vmatprep.subr.bf16.mxu0 %v5938_v59  ;;  %3323 = vmatprep.subr.bf16.mxu1 %v5941_v61 }
 0x753   : > { %3283 = vmatpush1.bf16.msra.mxu0 %v5946_v62  ;;  %3324 = vmatpush1.bf16.msra.mxu1 %v5949_v63 }
 0x754   : > { %3413 = vmatprep.subr.bf16.mxu0 %v5826_v5  ;;  %3454 = vmatprep.subr.bf16.mxu1 %v5829_v6 }
 0x7f6   : > { %v3157_v36 = vpop.f32.mrf.mxu0  ;;  %v3198_v37 = vpop.f32.mrf.mxu1 }
 0x7f8   : > { %v3159_v3 = vpop.f32.mrf.mxu0  ;;  %v3200_v38 = vpop.f32.mrf.mxu1 }
 0x7f9   : > { %v3209_v4 = vcombine.low %v3157_v36, %v3159_v3  ;;  %v3210_v2 = vcombine.low %v3198_v37, %v3200_v38  ;;  %v3254_v36 = vld [vmem:[#allocation5] sm:$0x3] }
 0x7fa   : > { %v3161_v7 = vpop.f32.mrf.mxu0  ;;  %v3202_v8 = vpop.f32.mrf.mxu1 }
 0x7fb   : > { %v3217_v46 = vrot.slane %v3209_v4, %v5991_v40  ;;  %v3224_v56 = vrot.slane %v3210_v2, %v5991_v40 }
 0x7fc   : > { %v3162_v57 = vpop.f32.mrf.mxu0  ;;  %v3203_v49 = vpop.f32.mrf.mxu1 }
 0x7fd   : > { %v3225_v50 = vcombine.low %v3217_v46, %v3224_v56 }
 0x7ff   : > { %v3227_v60 = vadd.f32 %v3225_v50, %v3121_v47 }
 0x801   : > { %v4181_v51 = vmul.f32 -1.442695, %v3227_v60  ;;  %v3235_v35 = vrot.slane %v3227_v60, 2  ;;  %v3246_v10 = vrot.slane %v3227_v60, 6  ;;  %v3243_v54 = vrot.slane %v3227_v60, 4 }
 0x803   : > { %4495 = vpow2.f32 %v4181_v51  ;;  %v4182_v9 = vmul.f32 -1.442695, %v3235_v35  ;;  %v4183_v52 = vmul.f32 -1.442695, %v3246_v10 }
 0x805   : > { %4497 = vpow2.f32 %v4182_v9 }
 0x806   : > { %4499 = vpow2.f32 %v4183_v52 }
 0x810   : > { %v4496_v53 = vpop.eup %4495 }
 0x811   : > { %v3231_v58 = vadd.f32 1.0, %v4496_v53 }
 0x812   : > { %v4498_v11 = vpop.eup %4497 }
 0x813   : > { %4501 = vrcp.f32 %v3231_v58  ;;  %v3240_v12 = vadd.f32 1.0, %v4498_v11  ;;  %v4500_v41 = vpop.eup %4499 }
 0x814   : > { %4503 = vtanh.f32 %v3243_v54  ;;  %v3251_v1 = vadd.f32 1.0, %v4500_v41 }
 0x815   : > { %4505 = vrcp.f32 %v3240_v12 }
 0x816   : > { %4507 = vrcp.f32 %v3251_v1 }
 0x820   : > { %v4502_v33 = vpop.eup %4501 }
 0x821   : > { %v4504_v0 = vpop.eup %4503 }
 0x822   : > { %v4506_v34 = vpop.eup %4505  ;;  %v3256_v3 = vmul.f32 %v4504_v0, %v4502_v33 }
 0x823   : > { %v3255_v37 = vmul.f32 %v4506_v34, %v3254_v36  ;;  %v4508_v4 = vpop.eup %4507 }
 0x825   : > { %v3257_v38 = vadd.f32 %v3256_v3, %v3255_v37 }
 0x827   : > { %4509 = vtanh.f32 %v3257_v38  ;;  %3260 = vst [vmem:[#allocation5] sm:$0x3] %v3257_v38 }
 0x82e   : > { %v3399_v41 = vld [vmem:[#allocation5] sm:$0x3] }
 0x834   : > { %v4510_v2 = vpop.eup %4509 }
 0x835   : > { %v3259_v7 = vmul.f32 %v4510_v2, %v4508_v4  ;;  %v6140_v4 = vld [vmem:[%s4932_s16 + $0xe0] ss:$16 sps:$4 sm:$0xff]   ;;  %v6144_v2 = vld [vmem:[%s4932_s16 + $0xe8] ss:$16 sps:$4 sm:$0xff]  }
 0x837   : > { %3263 = vst [vmem:[#allocation2 + $0x6] sm:$0x3] %v3259_v7  ;;  %3261 = vst [vmem:[#allocation4] sm:$0x3] %v3259_v7  ;;  %v6148_v7 = vld [vmem:[%s4932_s16 + $0xc4] ss:$16 sps:$4 sm:$0xff]  }
 0x83e   : > { %v3264_v8 = vld [vmem:[#allocation4] sm:$0x3] }
 0x83f   : > { %v3267_v46 = vpack.c.bf16 %v3264_v8, %v3264_v8  ;;  %v6152_v8 = vld [vmem:[%s4932_s16 + $0xcc] ss:$16 sps:$4 sm:$0xff]  }
 0x841   : > { %3301 = vmatmul.mubr.bf16.vlgmr.msra.gmra.mxu0 %v3267_v46  ;;  %3342 = vmatmul.mubr.bf16.vlgmr.msra.gmra.mxu1 %v3267_v46  ;;  %v6158_v46 = vld [vmem:[%s4932_s16 + $0xc0] ss:$16 sps:$4 sm:$0xff]  }
 0x842   : > { %3414 = vmatpush1.bf16.msra.mxu0 %v5835_v48  ;;  %3455 = vmatpush1.bf16.msra.mxu1 %v5838_v13 }
 0x843   : > { %3415 = vmatprep.subr.bf16.mxu0 %v5842_v14  ;;  %3456 = vmatprep.subr.bf16.mxu1 %v5847_v15 }
 0x844   : > { %3445 = vmatprep.mubr.bf16.mxu0 %v4747_v39  ;;  %3486 = vmatprep.mubr.bf16.mxu1 %v4747_v39 }
 0x846   : > { %3416 = vmatpush1.bf16.msra.mxu0 %v5850_v16  ;;  %3457 = vmatpush1.bf16.msra.mxu1 %v5854_v17 }
 0x847   : > { %3417 = vmatprep.subr.bf16.mxu0 %v5858_v18  ;;  %3458 = vmatprep.subr.bf16.mxu1 %v5861_v19 }
 0x84a   : > { %3418 = vmatpush1.bf16.msra.mxu0 %v5864_v20  ;;  %3459 = vmatpush1.bf16.msra.mxu1 %v5867_v21 }
 0x84b   : > { %3419 = vmatprep.subr.bf16.mxu0 %v5872_v22  ;;  %3460 = vmatprep.subr.bf16.mxu1 %v5877_v23  ;;  %v3266_v22 = vld [vmem:[#allocation3 + $0x8] sm:$0xff] }
 0x84e   : > { %3420 = vmatpush1.bf16.msra.mxu0 %v5880_v24  ;;  %3461 = vmatpush1.bf16.msra.mxu1 %v5885_v25 }
 0x84f   : > { %3421 = vmatprep.subr.bf16.mxu0 %v5888_v26  ;;  %3462 = vmatprep.subr.bf16.mxu1 %v5893_v27 }
 0x852   : > { %3422 = vmatpush1.bf16.msra.mxu0 %v5896_v28  ;;  %3463 = vmatpush1.bf16.msra.mxu1 %v5899_v29 }
 0x853   : > { %3423 = vmatprep.subr.bf16.mxu0 %v5904_v30  ;;  %3464 = vmatprep.subr.bf16.mxu1 %v5909_v31 }
 0x856   : > { %3424 = vmatpush1.bf16.msra.mxu0 %v5914_v32  ;;  %3465 = vmatpush1.bf16.msra.mxu1 %v5917_v42 }
 0x857   : > { %3425 = vmatprep.subr.bf16.mxu0 %v5922_v43  ;;  %3466 = vmatprep.subr.bf16.mxu1 %v5925_v44 }
 0x85a   : > { %3426 = vmatpush1.bf16.msra.mxu0 %v5930_v45  ;;  %3467 = vmatpush1.bf16.msra.mxu1 %v5933_v55 }
 0x85b   : > { %3427 = vmatprep.subr.bf16.mxu0 %v5938_v59  ;;  %3468 = vmatprep.subr.bf16.mxu1 %v5941_v61 }
 0x85e   : > { %3428 = vmatpush1.bf16.msra.mxu0 %v5946_v62  ;;  %3469 = vmatpush1.bf16.msra.mxu1 %v5949_v63 }
 0x85f   : > { %3558 = vmatprep.subr.bf16.mxu0 %v5826_v5  ;;  %3599 = vmatprep.subr.bf16.mxu1 %v5829_v6 }
 0x901   : > { %v3302_v48 = vpop.f32.mrf.mxu0  ;;  %v3343_v13 = vpop.f32.mrf.mxu1 }
 0x903   : > { %v3304_v14 = vpop.f32.mrf.mxu0  ;;  %v3345_v15 = vpop.f32.mrf.mxu1 }
 0x904   : > { %v3354_v16 = vcombine.low %v3302_v48, %v3304_v14  ;;  %v3355_v17 = vcombine.low %v3343_v13, %v3345_v15  ;;  %v6162_v48 = vld [vmem:[%s4932_s16 + $0xc8] ss:$16 sps:$4 sm:$0xff]   ;;  %v6166_v13 = vld [vmem:[%s4932_s16 + $0xa4] ss:$16 sps:$4 sm:$0xff]   ;;  %v6170_v14 = vld [vmem:[%s4932_s16 + $0xac] ss:$16 sps:$4 sm:$0xff]  }
 0x905   : > { %v3306_v18 = vpop.f32.mrf.mxu0  ;;  %v3347_v19 = vpop.f32.mrf.mxu1  ;;  %v6174_v15 = vld [vmem:[%s4932_s16 + $0xa0] ss:$16 sps:$4 sm:$0xff]  }
 0x906   : > { %v3362_v20 = vrot.slane %v3354_v16, %v5991_v40  ;;  %v3369_v21 = vrot.slane %v3355_v17, %v5991_v40  ;;  %v6178_v16 = vld [vmem:[%s4932_s16 + $0xa8] ss:$16 sps:$4 sm:$0xff]   ;;  %v6182_v17 = vld [vmem:[%s4932_s16 + $0x84] ss:$16 sps:$4 sm:$0xff]   ;;  %v6186_v18 = vld [vmem:[%s4932_s16 + $0x8c] ss:$16 sps:$4 sm:$0xff]  }
 0x907   : > { %v3307_v23 = vpop.f32.mrf.mxu0  ;;  %v3348_v56 = vpop.f32.mrf.mxu1 }
 0x908   : > { %v3370_v47 = vcombine.low %v3362_v20, %v3369_v21 }
 0x90a   : > { %v3372_v57 = vadd.f32 %v3370_v47, %v3266_v22 }
 0x90c   : > { %v4184_v5 = vmul.f32 -1.442695, %v3372_v57  ;;  %v3380_v49 = vrot.slane %v3372_v57, 2  ;;  %v3391_v50 = vrot.slane %v3372_v57, 6  ;;  %v3388_v35 = vrot.slane %v3372_v57, 4 }
 0x90e   : > { %4511 = vpow2.f32 %v4184_v5  ;;  %v4185_v6 = vmul.f32 -1.442695, %v3380_v49  ;;  %v4186_v60 = vmul.f32 -1.442695, %v3391_v50 }
 0x910   : > { %4513 = vpow2.f32 %v4185_v6 }
 0x911   : > { %4515 = vpow2.f32 %v4186_v60 }
 0x91b   : > { %v4512_v51 = vpop.eup %4511 }
 0x91c   : > { %v3376_v9 = vadd.f32 1.0, %v4512_v51 }
 0x91d   : > { %v4514_v10 = vpop.eup %4513 }
 0x91e   : > { %4517 = vrcp.f32 %v3376_v9  ;;  %v3385_v52 = vadd.f32 1.0, %v4514_v10  ;;  %v4516_v53 = vpop.eup %4515 }
 0x91f   : > { %4519 = vtanh.f32 %v3388_v35  ;;  %v3396_v12 = vadd.f32 1.0, %v4516_v53 }
 0x920   : > { %4521 = vrcp.f32 %v3385_v52 }
 0x921   : > { %4523 = vrcp.f32 %v3396_v12 }
 0x92b   : > { %v4518_v54 = vpop.eup %4517 }
 0x92c   : > { %v4520_v58 = vpop.eup %4519 }
 0x92d   : > { %v4522_v11 = vpop.eup %4521  ;;  %v3401_v0 = vmul.f32 %v4520_v58, %v4518_v54 }
 0x92e   : > { %v3400_v33 = vmul.f32 %v4522_v11, %v3399_v41  ;;  %v4524_v1 = vpop.eup %4523  ;;  %v4590_v41 = vld [vmem:[%s4932_s16 + $0x88] ss:$16 sps:$4 sm:$0xff]  }
 0x930   : > { %v3402_v34 = vadd.f32 %v3401_v0, %v3400_v33  ;;  %v4591_v33 = vld [vmem:[%s4932_s16 + $0x64] ss:$16 sps:$4 sm:$0xff]   ;;  %v4592_v0 = vld [vmem:[%s4932_s16 + $0x6c] ss:$16 sps:$4 sm:$0xff]  }
 0x932   : > { %4525 = vtanh.f32 %v3402_v34  ;;  %3405 = vst [vmem:[#allocation5] sm:$0x3] %v3402_v34  ;;  %v4593_v34 = vld [vmem:[%s4932_s16 + $0x60] ss:$16 sps:$4 sm:$0xff]  }
 0x939   : > { %v3544_v35 = vld [vmem:[#allocation5] sm:$0x3] }
 0x93f   : > { %v4526_v36 = vpop.eup %4525 }
 0x940   : > { %v3404_v37 = vmul.f32 %v4526_v36, %v4524_v1  ;;  %v4594_v1 = vld [vmem:[%s4932_s16 + $0x68] ss:$16 sps:$4 sm:$0xff]   ;;  %v4595_v36 = vld [vmem:[%s4932_s16 + $0x44] ss:$16 sps:$4 sm:$0xff]  }
 0x942   : > { %3408 = vst [vmem:[#allocation2 + $0x8] sm:$0x3] %v3404_v37  ;;  %3406 = vst [vmem:[#allocation4] sm:$0x3] %v3404_v37  ;;  %v4596_v37 = vld [vmem:[%s4932_s16 + $0x4c] ss:$16 sps:$4 sm:$0xff]  }
 0x949   : > { %v3409_v3 = vld [vmem:[#allocation4] sm:$0x3] }
 0x94a   : > { %v3412_v38 = vpack.c.bf16 %v3409_v3, %v3409_v3  ;;  %v4597_v3 = vld [vmem:[%s4932_s16 + $0x40] ss:$16 sps:$4 sm:$0xff]  }
 0x94c   : > { %3446 = vmatmul.mubr.bf16.vlgmr.msra.gmra.mxu0 %v3412_v38  ;;  %3487 = vmatmul.mubr.bf16.vlgmr.msra.gmra.mxu1 %v3412_v38  ;;  %v4598_v38 = vld [vmem:[%s4932_s16 + $0x48] ss:$16 sps:$4 sm:$0xff]  }
 0x94d   : > { %3559 = vmatpush1.bf16.msra.mxu0 %v6140_v4  ;;  %3600 = vmatpush1.bf16.msra.mxu1 %v6144_v2 }
 0x94e   : > { %3560 = vmatprep.subr.bf16.mxu0 %v6148_v7  ;;  %3601 = vmatprep.subr.bf16.mxu1 %v6152_v8 }
 0x94f   : > { %3590 = vmatprep.mubr.bf16.mxu0 %v4747_v39  ;;  %3631 = vmatprep.mubr.bf16.mxu1 %v4747_v39 }
 0x951   : > { %3561 = vmatpush1.bf16.msra.mxu0 %v6158_v46  ;;  %3602 = vmatpush1.bf16.msra.mxu1 %v6162_v48 }
 0x952   : > { %3562 = vmatprep.subr.bf16.mxu0 %v6166_v13  ;;  %3603 = vmatprep.subr.bf16.mxu1 %v6170_v14 }
 0x955   : > { %3563 = vmatpush1.bf16.msra.mxu0 %v6174_v15  ;;  %3604 = vmatpush1.bf16.msra.mxu1 %v6178_v16 }
 0x956   : > { %3564 = vmatprep.subr.bf16.mxu0 %v6182_v17  ;;  %3605 = vmatprep.subr.bf16.mxu1 %v6186_v18 }
 0x959   : > { %3565 = vmatpush1.bf16.msra.mxu0 %v5880_v24  ;;  %3606 = vmatpush1.bf16.msra.mxu1 %v5885_v25  ;;  %v4587_v24 = vld [vmem:[%s4932_s16 + $0xe4] ss:$16 sps:$4 sm:$0xff]   ;;  %v4588_v25 = vld [vmem:[%s4932_s16 + $0xec] ss:$16 sps:$4 sm:$0xff]  }
 0x95a   : > { %3566 = vmatprep.subr.bf16.mxu0 %v5888_v26  ;;  %3607 = vmatprep.subr.bf16.mxu1 %v5893_v27 }
 0x95d   : > { %3567 = vmatpush1.bf16.msra.mxu0 %v5896_v28  ;;  %3608 = vmatpush1.bf16.msra.mxu1 %v5899_v29 }
 0x95e   : > { %3568 = vmatprep.subr.bf16.mxu0 %v5904_v30  ;;  %3609 = vmatprep.subr.bf16.mxu1 %v5909_v31 }
 0x961   : > { %3569 = vmatpush1.bf16.msra.mxu0 %v5914_v32  ;;  %3610 = vmatpush1.bf16.msra.mxu1 %v5917_v42 }
 0x962   : > { %3570 = vmatprep.subr.bf16.mxu0 %v5922_v43  ;;  %3611 = vmatprep.subr.bf16.mxu1 %v5925_v44 }
 0x965   : > { %3571 = vmatpush1.bf16.msra.mxu0 %v5930_v45  ;;  %3612 = vmatpush1.bf16.msra.mxu1 %v5933_v55  ;;  %v3411_v45 = vld [vmem:[#allocation3 + $0x20] sm:$0xff] }
 0x966   : > { %3572 = vmatprep.subr.bf16.mxu0 %v5938_v59  ;;  %3613 = vmatprep.subr.bf16.mxu1 %v5941_v61 }
 0x969   : > { %3573 = vmatpush1.bf16.msra.mxu0 %v5946_v62  ;;  %3614 = vmatpush1.bf16.msra.mxu1 %v5949_v63 }
 0x96a   : > { %3703 = vmatprep.subr.bf16.mxu0 %v4587_v24  ;;  %3744 = vmatprep.subr.bf16.mxu1 %v4588_v25 }
 0xa0c   : > { %v3447_v26 = vpop.f32.mrf.mxu0  ;;  %v3488_v27 = vpop.f32.mrf.mxu1 }
 0xa0e   : > { %v3449_v28 = vpop.f32.mrf.mxu0  ;;  %v3490_v29 = vpop.f32.mrf.mxu1 }
 0xa0f   : > { %v3499_v30 = vcombine.low %v3447_v26, %v3449_v28  ;;  %v3500_v31 = vcombine.low %v3488_v27, %v3490_v29 }
 0xa10   : > { %v3451_v32 = vpop.f32.mrf.mxu0  ;;  %v3492_v42 = vpop.f32.mrf.mxu1 }
 0xa11   : > { %v3507_v43 = vrot.slane %v3499_v30, %v5991_v40  ;;  %v3514_v44 = vrot.slane %v3500_v31, %v5991_v40  ;;  %v3556_v30 = vld [vmem:[#allocation3 + $0x28] sm:$0xff] }
 0xa12   : > { %v3452_v55 = vpop.f32.mrf.mxu0  ;;  %v3493_v59 = vpop.f32.mrf.mxu1 }
 0xa13   : > { %v3515_v61 = vcombine.low %v3507_v43, %v3514_v44 }
 0xa15   : > { %v3517_v62 = vadd.f32 %v3515_v61, %v3411_v45 }
 0xa17   : > { %v4187_v63 = vmul.f32 -1.442695, %v3517_v62  ;;  %v3525_v19 = vrot.slane %v3517_v62, 2  ;;  %v3536_v21 = vrot.slane %v3517_v62, 6  ;;  %v3533_v56 = vrot.slane %v3517_v62, 4 }
 0xa19   : > { %4527 = vpow2.f32 %v4187_v63  ;;  %v4188_v20 = vmul.f32 -1.442695, %v3525_v19  ;;  %v4189_v22 = vmul.f32 -1.442695, %v3536_v21 }
 0xa1b   : > { %4529 = vpow2.f32 %v4188_v20 }
 0xa1c   : > { %4531 = vpow2.f32 %v4189_v22 }
 0xa26   : > { %v4528_v23 = vpop.eup %4527 }
 0xa27   : > { %v3521_v47 = vadd.f32 1.0, %v4528_v23 }
 0xa28   : > { %v4530_v57 = vpop.eup %4529 }
 0xa29   : > { %4533 = vrcp.f32 %v3521_v47  ;;  %v3530_v5 = vadd.f32 1.0, %v4530_v57  ;;  %v4532_v49 = vpop.eup %4531 }
 0xa2a   : > { %4535 = vtanh.f32 %v3533_v56  ;;  %v3541_v51 = vadd.f32 1.0, %v4532_v49 }
 0xa2b   : > { %4537 = vrcp.f32 %v3530_v5 }
 0xa2c   : > { %4539 = vrcp.f32 %v3541_v51 }
 0xa36   : > { %v4534_v6 = vpop.eup %4533 }
 0xa37   : > { %v4536_v50 = vpop.eup %4535 }
 0xa38   : > { %v4538_v60 = vpop.eup %4537  ;;  %v3546_v10 = vmul.f32 %v4536_v50, %v4534_v6 }
 0xa39   : > { %v3545_v9 = vmul.f32 %v4538_v60, %v3544_v35  ;;  %v4540_v53 = vpop.eup %4539 }
 0xa3b   : > { %v3547_v52 = vadd.f32 %v3546_v10, %v3545_v9 }
 0xa3d   : > { %4541 = vtanh.f32 %v3547_v52  ;;  %3550 = vst [vmem:[#allocation5] sm:$0x3] %v3547_v52 }
 0xa44   : > { %v3689_v5 = vld [vmem:[#allocation5] sm:$0x3] }
 0xa4a   : > { %v4542_v54 = vpop.eup %4541 }
 0xa4b   : > { %v3549_v58 = vmul.f32 %v4542_v54, %v4540_v53 }
 0xa4d   : > { %3553 = vst [vmem:[#allocation2 + $0xa] sm:$0x3] %v3549_v58  ;;  %3551 = vst [vmem:[#allocation4] sm:$0x3] %v3549_v58 }
 0xa54   : > { %v3554_v11 = vld [vmem:[#allocation4] sm:$0x3] }
 0xa55   : > { %v3557_v12 = vpack.c.bf16 %v3554_v11, %v3554_v11 }
 0xa57   : > { %3591 = vmatmul.mubr.bf16.vlgmr.msra.gmra.mxu0 %v3557_v12  ;;  %3632 = vmatmul.mubr.bf16.vlgmr.msra.gmra.mxu1 %v3557_v12 }
 0xa58   : > { %3704 = vmatpush1.bf16.msra.mxu0 %v6140_v4  ;;  %3745 = vmatpush1.bf16.msra.mxu1 %v6144_v2  ;;  %v4599_v4 = vld [vmem:[%s4932_s16 + $0x24] ss:$16 sps:$4 sm:$0xff]   ;;  %v4600_v2 = vld [vmem:[%s4932_s16 + $0x2c] ss:$16 sps:$4 sm:$0xff]  }
 0xa59   : > { %3705 = vmatprep.subr.bf16.mxu0 %v6148_v7  ;;  %3746 = vmatprep.subr.bf16.mxu1 %v6152_v8  ;;  %v4601_v7 = vld [vmem:[%s4932_s16 + $0x20] ss:$16 sps:$4 sm:$0xff]   ;;  %v4602_v8 = vld [vmem:[%s4932_s16 + $0x28] ss:$16 sps:$4 sm:$0xff]  }
 0xa5a   : > { %3735 = vmatprep.mubr.bf16.mxu0 %v4747_v39  ;;  %3776 = vmatprep.mubr.bf16.mxu1 %v4747_v39  ;;  %v4589_v39 = vld [vmem:[%s4932_s16 + $0x80] ss:$16 sps:$4 sm:$0xff]  }
 0xa5c   : > { %3706 = vmatpush1.bf16.msra.mxu0 %v6158_v46  ;;  %3747 = vmatpush1.bf16.msra.mxu1 %v6162_v48  ;;  %v4603_v46 = vld [vmem:[%s4932_s16 + $0x4] ss:$16 sps:$4 sm:$0xff]   ;;  %v4604_v48 = vld [vmem:[%s4932_s16 + $0xc] ss:$16 sps:$4 sm:$0xff]  }
 0xa5d   : > { %3707 = vmatprep.subr.bf16.mxu0 %v6166_v13  ;;  %3748 = vmatprep.subr.bf16.mxu1 %v6170_v14  ;;  %v4605_v13 = vld [vmem:[%s4932_s16] ss:$16 sps:$4 sm:$0xff]   ;;  %v4606_v14 = vld [vmem:[%s4932_s16 + $0x8] ss:$16 sps:$4 sm:$0xff]  }
 0xa60   : > { %3708 = vmatpush1.bf16.msra.mxu0 %v6174_v15  ;;  %3749 = vmatpush1.bf16.msra.mxu1 %v6178_v16 }
 0xa61   : > { %3709 = vmatprep.subr.bf16.mxu0 %v6182_v17  ;;  %3750 = vmatprep.subr.bf16.mxu1 %v6186_v18 }
 0xa64   : > { %3710 = vmatpush1.bf16.msra.mxu0 %v4589_v39  ;;  %3751 = vmatpush1.bf16.msra.mxu1 %v4590_v41 }
 0xa65   : > { %3711 = vmatprep.subr.bf16.mxu0 %v4591_v33  ;;  %3752 = vmatprep.subr.bf16.mxu1 %v4592_v0 }
 0xa68   : > { %3712 = vmatpush1.bf16.msra.mxu0 %v4593_v34  ;;  %3753 = vmatpush1.bf16.msra.mxu1 %v4594_v1  ;;  %v3701_v34 = vld [vmem:[#allocation3 + $0x38] sm:$0xff] }
 0xa69   : > { %3713 = vmatprep.subr.bf16.mxu0 %v4595_v36  ;;  %3754 = vmatprep.subr.bf16.mxu1 %v4596_v37 }
 0xa6c   : > { %3714 = vmatpush1.bf16.msra.mxu0 %v4597_v3  ;;  %3755 = vmatpush1.bf16.msra.mxu1 %v4598_v38 }
 0xa6d   : > { %3715 = vmatprep.subr.bf16.mxu0 %v4599_v4  ;;  %3756 = vmatprep.subr.bf16.mxu1 %v4600_v2 }
 0xa70   : > { %3716 = vmatpush1.bf16.msra.mxu0 %v4601_v7  ;;  %3757 = vmatpush1.bf16.msra.mxu1 %v4602_v8 }
 0xa71   : > { %3717 = vmatprep.subr.bf16.mxu0 %v4603_v46  ;;  %3758 = vmatprep.subr.bf16.mxu1 %v4604_v48 }
 0xa74   : > { %3718 = vmatpush1.bf16.msra.mxu0 %v4605_v13  ;;  %3759 = vmatpush1.bf16.msra.mxu1 %v4606_v14 }
 0xb17   : > { %v3592_v15 = vpop.f32.mrf.mxu0  ;;  %v3633_v16 = vpop.f32.mrf.mxu1 }
 0xb19   : > { %v3594_v17 = vpop.f32.mrf.mxu0  ;;  %v3635_v18 = vpop.f32.mrf.mxu1 }
 0xb1a   : > { %v3644_v24 = vcombine.low %v3592_v15, %v3594_v17  ;;  %v3645_v25 = vcombine.low %v3633_v16, %v3635_v18 }
 0xb1b   : > { %v3596_v26 = vpop.f32.mrf.mxu0  ;;  %v3637_v27 = vpop.f32.mrf.mxu1 }
 0xb1c   : > { %v3652_v28 = vrot.slane %v3644_v24, %v5991_v40  ;;  %v3659_v29 = vrot.slane %v3645_v25, %v5991_v40 }
 0xb1d   : > { %v3597_v31 = vpop.f32.mrf.mxu0  ;;  %v3638_v32 = vpop.f32.mrf.mxu1 }
 0xb1e   : > { %v3660_v42 = vcombine.low %v3652_v28, %v3659_v29 }
 0xb20   : > { %v3662_v43 = vadd.f32 %v3660_v42, %v3556_v30 }
 0xb22   : > { %v4190_v44 = vmul.f32 -1.442695, %v3662_v43  ;;  %v3670_v45 = vrot.slane %v3662_v43, 2  ;;  %v3681_v59 = vrot.slane %v3662_v43, 6  ;;  %v3678_v63 = vrot.slane %v3662_v43, 4 }
 0xb24   : > { %4543 = vpow2.f32 %v4190_v44  ;;  %v4191_v55 = vmul.f32 -1.442695, %v3670_v45  ;;  %v4192_v61 = vmul.f32 -1.442695, %v3681_v59 }
 0xb26   : > { %4545 = vpow2.f32 %v4191_v55 }
 0xb27   : > { %4547 = vpow2.f32 %v4192_v61 }
 0xb31   : > { %v4544_v62 = vpop.eup %4543 }
 0xb32   : > { %v3666_v19 = vadd.f32 1.0, %v4544_v62 }
 0xb33   : > { %v4546_v20 = vpop.eup %4545 }
 0xb34   : > { %4549 = vrcp.f32 %v3666_v19  ;;  %v3675_v21 = vadd.f32 1.0, %v4546_v20  ;;  %v4548_v22 = vpop.eup %4547 }
 0xb35   : > { %4551 = vtanh.f32 %v3678_v63  ;;  %v3686_v57 = vadd.f32 1.0, %v4548_v22 }
 0xb36   : > { %4553 = vrcp.f32 %v3675_v21 }
 0xb37   : > { %4555 = vrcp.f32 %v3686_v57 }
 0xb41   : > { %v4550_v23 = vpop.eup %4549 }
 0xb42   : > { %v4552_v56 = vpop.eup %4551 }
 0xb43   : > { %v4554_v47 = vpop.eup %4553  ;;  %v3691_v6 = vmul.f32 %v4552_v56, %v4550_v23 }
 0xb44   : > { %v3690_v49 = vmul.f32 %v4554_v47, %v3689_v5  ;;  %v4556_v60 = vpop.eup %4555 }
 0xb46   : > { %v3692_v50 = vadd.f32 %v3691_v6, %v3690_v49 }
 0xb48   : > { %4557 = vtanh.f32 %v3692_v50  ;;  %3695 = vst [vmem:[#allocation5] sm:$0x3] %v3692_v50 }
 0xb4f   : > { %v3834_v25 = vld [vmem:[#allocation5] sm:$0x3] }
 0xb55   : > { %v4558_v51 = vpop.eup %4557 }
 0xb56   : > { %v3694_v35 = vmul.f32 %v4558_v51, %v4556_v60 }
 0xb58   : > { %3698 = vst [vmem:[#allocation2 + $0xc] sm:$0x3] %v3694_v35  ;;  %3696 = vst [vmem:[#allocation4] sm:$0x3] %v3694_v35 }
 0xb5f   : > { %v3699_v9 = vld [vmem:[#allocation4] sm:$0x3] }
 0xb60   : > { %v3702_v10 = vpack.c.bf16 %v3699_v9, %v3699_v9 }
 0xb62   : > { %3736 = vmatmul.mubr.bf16.vlgmr.msra.gmra.mxu0 %v3702_v10  ;;  %3777 = vmatmul.mubr.bf16.vlgmr.msra.gmra.mxu1 %v3702_v10 }
 0xc22   : > { %v3737_v52 = vpop.f32.mrf.mxu0  ;;  %v3778_v53 = vpop.f32.mrf.mxu1 }
 0xc24   : > { %v3739_v54 = vpop.f32.mrf.mxu0  ;;  %v3780_v58 = vpop.f32.mrf.mxu1 }
 0xc25   : > { %v3789_v11 = vcombine.low %v3737_v52, %v3739_v54  ;;  %v3790_v12 = vcombine.low %v3778_v53, %v3780_v58 }
 0xc26   : > { %v3741_v39 = vpop.f32.mrf.mxu0  ;;  %v3782_v41 = vpop.f32.mrf.mxu1 }
 0xc27   : > { %v3797_v33 = vrot.slane %v3789_v11, %v5991_v40  ;;  %v3804_v0 = vrot.slane %v3790_v12, %v5991_v40 }
 0xc28   : > { %v3742_v1 = vpop.f32.mrf.mxu0  ;;  %v3783_v36 = vpop.f32.mrf.mxu1 }
 0xc29   : > { %v3805_v37 = vcombine.low %v3797_v33, %v3804_v0 }
 0xc2b   : > { %v3807_v3 = vadd.f32 %v3805_v37, %v3701_v34 }
 0xc2d   : > { %v4193_v38 = vmul.f32 -1.442695, %v3807_v3  ;;  %v3815_v4 = vrot.slane %v3807_v3, 2  ;;  %v3826_v7 = vrot.slane %v3807_v3, 6  ;;  %v3823_v48 = vrot.slane %v3807_v3, 4 }
 0xc2f   : > { %4559 = vpow2.f32 %v4193_v38  ;;  %v4194_v2 = vmul.f32 -1.442695, %v3815_v4  ;;  %v4195_v8 = vmul.f32 -1.442695, %v3826_v7 }
 0xc31   : > { %4561 = vpow2.f32 %v4194_v2 }
 0xc32   : > { %4563 = vpow2.f32 %v4195_v8 }
 0xc3c   : > { %v4560_v46 = vpop.eup %4559 }
 0xc3d   : > { %v3811_v13 = vadd.f32 1.0, %v4560_v46 }
 0xc3e   : > { %v4562_v14 = vpop.eup %4561 }
 0xc3f   : > { %4565 = vrcp.f32 %v3811_v13  ;;  %v3820_v15 = vadd.f32 1.0, %v4562_v14  ;;  %v4564_v40 = vpop.eup %4563 }
 0xc40   : > { %4567 = vtanh.f32 %v3823_v48  ;;  %v3831_v24 = vadd.f32 1.0, %v4564_v40 }
 0xc41   : > { %4569 = vrcp.f32 %v3820_v15 }
 0xc42   : > { %4571 = vrcp.f32 %v3831_v24 }
 0xc4c   : > { %v4566_v16 = vpop.eup %4565 }
 0xc4d   : > { %v4568_v17 = vpop.eup %4567 }
 0xc4e   : > { %v4570_v18 = vpop.eup %4569  ;;  %v3836_v27 = vmul.f32 %v4568_v17, %v4566_v16 }
 0xc4f   : > { %v3835_v26 = vmul.f32 %v4570_v18, %v3834_v25  ;;  %v4572_v29 = vpop.eup %4571 }
 0xc51   : > { %v3837_v28 = vadd.f32 %v3836_v27, %v3835_v26 }
 0xc53   : > { %4573 = vtanh.f32 %v3837_v28  ;;  %3840 = vst [vmem:[#allocation5] sm:$0x3] %v3837_v28 }
 0xc5f   : > { %3847 = sbr.rel (%p4196_p4) target bundleno = 3404 (0xd4c), region = 64 }
 0xc60   : > { %v4574_v30 = vpop.eup %4573 }
 0xc61   : > { %v3839_v31 = vmul.f32 %v4574_v30, %v4572_v29 }
 0xc63   : > { %3841 = vst [vmem:[#allocation4] sm:$0x3] %v3839_v31  ;;  %3843 = vst [vmem:[#allocation2 + $0xe] sm:$0x3] %v3839_v31 }
 0xc64   : > { %v4607_v32 = vld [vmem:[%s6304_s4 + $0x38] sm:$0xff]   ;;  %v4750_v42 = vmov 0.0   ;;  %v4608_v43 = vld [vmem:[%s6304_s4 + $0x30] sm:$0xff]   ;;  %vm4751_vm0 = vmmov 0   ;;  %v4609_v44 = vld [vmem:[%s6304_s4 + $0x28] sm:$0xff]  }
 0xc65   : > { %4221 = vmatprep.subr.bf16.mxu0 %v4750_v42  ;;  %4237 = vmatprep.mubr.msk.bf16.mxu0 %vm4751_vm0, %v4750_v42  ;;  %v4610_v45 = vld [vmem:[%s6304_s4 + $0x20] sm:$0xff]   ;;  %v4611_v55 = vld [vmem:[%s6304_s4 + $0x18] sm:$0xff]   ;;  %v4612_v59 = vld [vmem:[%s6304_s4 + $0x10] sm:$0xff]  }
 0xc66   : > { %4222 = vmatpush3.bf16.msra.mxu0 %v4607_v32  ;;  %v4613_v61 = vld [vmem:[%s6304_s4 + $0x8] sm:$0xff]   ;;  %v4614_v62 = vld [vmem:[%s6304_s4] sm:$0xff]  }
 0xc67   : > { %4223 = vmatprep.subr.bf16.mxu0 %v4750_v42  ;;  %v4197_v20 = vld [vmem:[%s6305_s5] ss:$0 sm:$0xff] }
 0xc6a   : > { %4224 = vmatpush3.bf16.msra.mxu0 %v4608_v43  ;;  %v3848_v63 = vld [vmem:[#allocation4] sm:$0x3] }
 0xc6b   : > { %4225 = vmatprep.subr.bf16.mxu0 %v4750_v42  ;;  %v3849_v19 = vpack.c.bf16 %v3848_v63, %v3848_v63 }
 0xc6e   : > { %4226 = vmatpush3.bf16.msra.mxu0 %v4609_v44 }
 0xc6f   : > { %4227 = vmatprep.subr.bf16.mxu0 %v4750_v42 }
 0xc72   : > { %4228 = vmatpush3.bf16.msra.mxu0 %v4610_v45 }
 0xc73   : > { %4229 = vmatprep.subr.bf16.mxu0 %v4750_v42 }
 0xc76   : > { %4230 = vmatpush3.bf16.msra.mxu0 %v4611_v55 }
 0xc77   : > { %4231 = vmatprep.subr.bf16.mxu0 %v4750_v42 }
 0xc7a   : > { %4232 = vmatpush3.bf16.msra.mxu0 %v4612_v59 }
 0xc7b   : > { %4233 = vmatprep.subr.bf16.mxu0 %v4750_v42 }
 0xc7e   : > { %4234 = vmatpush3.bf16.msra.mxu0 %v4613_v61 }
 0xc7f   : > { %4235 = vmatprep.subr.bf16.mxu0 %v4750_v42 }
 0xc82   : > { %4236 = vmatpush3.bf16.msra.mxu0 %v4614_v62 }
 0xc85   : > { %4238 = vmatmul.mubr.bf16.vlgmr.msra.gmra.mxu0 %v3849_v19 }
 0xd45   : > { %v3955_v21 = vpop.f32.mrf.mxu0 }
 0xd46   : > { %v3956_v22 = vadd.f32 %v4197_v20, %v3955_v21 }
 0xd47   : > { %v4239_v23 = vpop.f32.mrf.mxu0 }
 0xd48   : > { %3961 = vst [vmem:[#allocation11] sm:$0x3] %v3956_v22 }
 0xd49   : > { %v3958_v56 = vpop.f32.mrf.mxu0 }
 0xd4b   : > { %v4240_v47 = vpop.f32.mrf.mxu0 }
 0xd4c PF: > { %p4257_p6 = scmp.eq.s32.totalorder %s4807_s25, 2  ;;  %s4752_s27 = smov [#allocation11]  }
 0xd4d   : > { %s3969_s9 = sshll.u32 %s4752_s27, 4  ;;  %s3970_s9 = int_to_ptr.vmem [resolvable:$true] %s3969_s9 }
 0xd4e   : > { %s4671_s16 = scalar_lea.vmem %s3970_s9, 32  ;;  %p4678_p9 = scmp.lt.s32.totalorder %s3970_s9, %s3970_s9 }
 0xd4f   : > { %p4672_p10 = scmp.ne.s32.totalorder %s3970_s9, %s4671_s16  ;;  %p4679_p13 = scmp.lt.s32.totalorder %s4671_s16, %s4671_s16 }
 0xd51   : > { %p4673_p12 = pnand %p4672_p10, %p4257_p6  ;;  %p4680_p2 = por %p4679_p13, %p4678_p9 }
 0xd53   : > { %p4674_p0 = pneg %p4673_p12 }
 0xd55   : > { %p4681_p3 = pnand %p4680_p2, %p4674_p0 }
 0xd57   : > { %4684 = shalt.err (!%p4681_p3)
}
 0xd58   : > { %4246 = dma.vmem_to_hbm [thread:$0]  (%p4257_p6), %s3970_s9, 32, %s6306_s6, [#allocation8]  }
 0xd59   : > { %4720 = dma.done.wait (%p4257_p6), [#allocation8], 32  }
 0xd5a   : > { %4722 = vsyncadd (%p4257_p6), [#allocation8], 4294967264 }
 0xd5b PF: > { %p20_p5 = scmp.ge.s32.totalorder %s4810_s26, 5   ;;  %s6313_s21 = smov %s4729_s22 }
 0xd5c   : > { %s6314_s22 = smov %s4733_s23  ;;  %s6315_s23 = smov %s4820_s29 }
 0xd5d   : > { %s6316_s24 = smov %s4810_s26  ;;  %22 = sbr.rel (!%p20_p5) target bundleno = 6 (0x6), region = 151 }
 0xd62   :  { %3982 = vsyncpa [#allocation7], 1 }
 0xd63   :  { %3984 = vsyncpa [#allocation7 + $0x1], 1 }
 0xd64   :  { %3985 = vsyncpa [#allocation10], 1 }
 0xd65   :  { %3987 = vsyncpa [#allocation10 + $0x1], 1 }
 0xd66   :  { %3988 = vsyncpa [#allocation8], 1 }
 0xd67   :  { %3990 = vsyncpa [#allocation8 + $0x1], 1 }

</bundles_post_ra>
